<compile_context>
chip_gen: v7x
topology: tpu7x:2x2x1
jax: 0.10.0
libtpu: 0.0.40
codegen_flags: <defaults>
</compile_context>

<pallas_src>
import functools

import jax
import jax.numpy as jnp
import numpy as np
from jax.experimental import pallas as pl
from jax.experimental.pallas import tpu as pltpu

VMEM_LIMIT = 32 * 1024 * 1024  # safe on v5e/v6e/v7x; tiles are sized well below this


# ---------------------------------------------------------------------------
# Pass 1: per-(sample, row-tile) GroupNorm partial sums (MXU ones-reduction).
# ---------------------------------------------------------------------------
def gn_stats_kernel(x_ref, st_ref):
    th, w, c = x_ref.shape[1], x_ref.shape[2], x_ref.shape[3]
    xf = x_ref[0].astype(jnp.float32).reshape(th * w, c)
    ones = jnp.ones((1, th * w), jnp.float32)
    s = jnp.dot(ones, xf, preferred_element_type=jnp.float32)        # (1, C)
    ss = jnp.dot(ones, xf * xf, preferred_element_type=jnp.float32)  # (1, C)
    st_ref[0, 0] = jnp.concatenate([s, ss], axis=0)                  # (2, C)


def _gn_stats(x, row_tile):
    n, h, w, c = x.shape
    t = h // row_tile
    return pl.pallas_call(
        gn_stats_kernel,
        out_shape=jax.ShapeDtypeStruct((n, t, 2, c), jnp.float32),
        grid_spec=pltpu.PrefetchScalarGridSpec(
            num_scalar_prefetch=0,
            grid=(n, t),
            in_specs=[pl.BlockSpec((1, row_tile, w, c), lambda i, j: (i, j, 0, 0))],
            out_specs=pl.BlockSpec((1, 1, 2, c), lambda i, j: (i, j, 0, 0)),
        ),
        compiler_params=pltpu.CompilerParams(
            dimension_semantics=("parallel", "parallel"),
            vmem_limit_bytes=VMEM_LIMIT),
    )(x)


# ---------------------------------------------------------------------------
# Wrapper-side GN folding: partial sums -> per-channel scale/shift (tiny (N,C)).
# ---------------------------------------------------------------------------
def _fold_gn(stats, gamma, beta, num_groups, hw, eps=1e-5):
    s = stats.sum(axis=1)                       # (N, 2, C)
    ssum, ssq = s[:, 0], s[:, 1]                # (N, C)
    n, c = ssum.shape
    g = num_groups
    cg = c // g
    cnt = float(hw * cg)
    gs = ssum.reshape(n, g, cg).sum(-1) / cnt                       # group mean
    gss = ssq.reshape(n, g, cg).sum(-1) / cnt                       # group E[x^2]
    var = jnp.maximum(gss - gs * gs, 0.0)                           # clamp: no NaN from rsqrt
    inv = jax.lax.rsqrt(var + eps)                                  # (N, G)
    mean_c = jnp.repeat(gs, cg, axis=1)                             # (N, C)
    inv_c = jnp.repeat(inv, cg, axis=1)
    scale = gamma.reshape(1, c) * inv_c
    shift = beta.reshape(1, c) - mean_c * scale
    return (scale.reshape(n, 1, c).astype(jnp.float32),
            shift.reshape(n, 1, c).astype(jnp.float32))


# ---------------------------------------------------------------------------
# Pass 2/3: folded GN affine + SiLU + 3x3 conv over one row tile (+1-row halos),
#           bf16 MXU with f32 accumulation.  When emit_stats, also emits GN
#           partial sums of the (pre-cast, f32) conv output.
# ---------------------------------------------------------------------------
def gn_silu_conv_kernel(x_ref, top_ref, bot_ref, sc_ref, sh_ref, w_ref, b_ref,
                        o_ref, *st_refs, row_tile, img_h, emit_stats):
    th = row_tile
    w = x_ref.shape[2]
    ci = x_ref.shape[3]
    co = o_ref.shape[3]
    t = pl.program_id(1)

    # (TH+2, W, Ci) window: top halo row + main tile + bottom halo row.
    win = jnp.concatenate([top_ref[0], x_ref[0], bot_ref[0]],
                          axis=0).astype(jnp.float32)

    # Folded GroupNorm affine + SiLU, all in f32 (VPU/EUP; v5e has no bf16 VPU).
    sc = sc_ref[0].astype(jnp.float32).reshape(1, 1, ci)
    sh = sh_ref[0].astype(jnp.float32).reshape(1, 1, ci)
    a = win * sc + sh
    a = a * jax.nn.sigmoid(a)

    # Zero halo rows that fall outside the image: the conv's zero padding applies
    # to the post-activation tensor (matches PyTorch Conv2d padding=1 after SiLU).
    row = t * th - 1 + jax.lax.broadcasted_iota(jnp.int32, (th + 2, 1, 1), 0)
    a = jnp.where((row >= 0) & (row < img_h), a, 0.0)

    # im2col along kx only -> (TH+2, W, 3*Ci); cast to bf16 at the MXU boundary.
    zcol = jnp.zeros((th + 2, 1, ci), jnp.float32)
    aw = jnp.concatenate([zcol, a, zcol], axis=1)                    # (TH+2, W+2, Ci)
    p = jnp.concatenate([aw[:, 0:w], aw[:, 1:w + 1], aw[:, 2:w + 2]],
                        axis=-1).astype(jnp.bfloat16)                # (TH+2, W, 3Ci)

    wk = w_ref[...]                                                  # (3, 3Ci, Co) bf16
    acc = jnp.zeros((th * w, co), jnp.float32)
    for ky in range(3):                                              # 3 wide-K matmuls
        acc = acc + jnp.dot(p[ky:ky + th].reshape(th * w, 3 * ci), wk[ky],
                            preferred_element_type=jnp.float32)

    hout = acc + b_ref[0].astype(jnp.float32)                        # (TH*W, Co) f32
    o_ref[0] = hout.reshape(th, w, co).astype(o_ref.dtype)

    if emit_stats:
        # Partial GN sums of the conv output, from the exact f32 accumulator
        # (computed before any bf16 output cast).  Used as GN2 statistics.
        ones = jnp.ones((1, th * w), jnp.float32)
        s = jnp.dot(ones, hout, preferred_element_type=jnp.float32)
        ss = jnp.dot(ones, hout * hout, preferred_element_type=jnp.float32)
        st_refs[0][0, 0] = jnp.concatenate([s, ss], axis=0)


def _gn_silu_conv(x, scale, shift, w3, bias, row_tile, out_dtype, emit_stats):
    n, h, w, ci = x.shape
    co = w3.shape[-1]
    t = h // row_tile
    kern = functools.partial(gn_silu_conv_kernel, row_tile=row_tile, img_h=h,
                             emit_stats=emit_stats)

    in_specs = [
        # main row tile
        pl.BlockSpec((1, row_tile, w, ci), lambda i, j: (i, j, 0, 0)),
        # 1-row halos (clamped at the image edges; masked in-kernel)
        pl.BlockSpec((1, 1, w, ci),
                     lambda i, j: (i, jnp.maximum(j * row_tile - 1, 0), 0, 0)),
        pl.BlockSpec((1, 1, w, ci),
                     lambda i, j: (i, jnp.minimum((j + 1) * row_tile, h - 1), 0, 0)),
        # folded GN scale / shift (per sample, per channel)
        pl.BlockSpec((1, 1, ci), lambda i, j: (i, 0, 0)),
        pl.BlockSpec((1, 1, ci), lambda i, j: (i, 0, 0)),
        # conv weights (bf16, constant across the grid) + bias
        pl.BlockSpec((3, 3 * ci, co), lambda i, j: (0, 0, 0)),
        pl.BlockSpec((1, 1, co), lambda i, j: (0, 0, 0)),
    ]
    out_block = pl.BlockSpec((1, row_tile, w, co), lambda i, j: (i, j, 0, 0))

    if emit_stats:
        out_shape = (jax.ShapeDtypeStruct((n, h, w, co), out_dtype),
                     jax.ShapeDtypeStruct((n, t, 2, co), jnp.float32))
        out_specs = [out_block,
                     pl.BlockSpec((1, 1, 2, co), lambda i, j: (i, j, 0, 0))]
    else:
        out_shape = jax.ShapeDtypeStruct((n, h, w, co), out_dtype)
        out_specs = out_block

    res = pl.pallas_call(
        kern,
        out_shape=out_shape,
        grid_spec=pltpu.PrefetchScalarGridSpec(
            num_scalar_prefetch=0,
            grid=(n, t),
            in_specs=in_specs,
            out_specs=out_specs,
        ),
        compiler_params=pltpu.CompilerParams(
            dimension_semantics=("parallel", "parallel"),
            vmem_limit_bytes=VMEM_LIMIT),
    )(x, x, x, scale, shift, w3, bias)

    if emit_stats:
        return res          # (out, stats)
    return res, None


# ---------------------------------------------------------------------------
# Full block (NHWC native; NCHW wrapper below).
# ---------------------------------------------------------------------------
def non_resnet_block(x_nhwc, params, num_groups, row_tile=8):
    n, h, w, cin = x_nhwc.shape
    cout = params["c2_b"].shape[-1]
    assert h % row_tile == 0, "row_tile must divide H"
    hw = h * w

    # (9, Ci, Co) tap-major -> (3, 3*Ci, Co): ky-major, K packs (kx, ci); bf16 for MXU.
    w1 = params["w1_9"].reshape(3, 3 * cin, cout).astype(jnp.bfloat16)
    w2 = params["w2_9"].reshape(3, 3 * cout, cout).astype(jnp.bfloat16)
    b1 = params["c1_b"].reshape(1, 1, cout).astype(jnp.float32)
    b2 = params["c2_b"].reshape(1, 1, cout).astype(jnp.float32)

    # GN1 stats -> folded per-channel affine.
    stats1 = _gn_stats(x_nhwc, row_tile)
    sc1, sh1 = _fold_gn(stats1, params["gn1_g"], params["gn1_b"], num_groups, hw)

    # SiLU(GN1) + conv1; emits GN2 partial sums for free.  The intermediate is
    # stored in bf16 to halve the inter-pass HBM traffic (GN2 stats are exact f32).
    h1, stats2 = _gn_silu_conv(x_nhwc, sc1, sh1, w1, b1, row_tile,
                               jnp.bfloat16, emit_stats=True)
    sc2, sh2 = _fold_gn(stats2, params["gn2_g"], params["gn2_b"], num_groups, hw)

    # nn.Dropout: eval-mode identity.  SiLU(GN2) + conv2 (no stats output).
    out, _ = _gn_silu_conv(h1, sc2, sh2, w2, b2, row_tile,
                           x_nhwc.dtype, emit_stats=False)
    return out


def non_resnet_block_nchw(x_nchw, params, num_groups, row_tile=8):
    """PyTorch-layout entry point: NCHW in, NCHW out."""
    x_nhwc = jnp.transpose(x_nchw, (0, 2, 3, 1))
    y = non_resnet_block(x_nhwc, params, num_groups, row_tile)
    return jnp.transpose(y, (0, 3, 1, 2))


# ---------------------------------------------------------------------------
# Pure-JAX reference (NHWC, f32) for the correctness check.
# ---------------------------------------------------------------------------
def ref_forward(x, p, num_groups):
    def gn(h, gamma, beta, eps=1e-5):
        n, hh, ww, c = h.shape
        hg = h.reshape(n, hh, ww, num_groups, c // num_groups)
        m = hg.mean(axis=(1, 2, 4), keepdims=True)
        v = hg.var(axis=(1, 2, 4), keepdims=True)
        hn = ((hg - m) / jnp.sqrt(v + eps)).reshape(n, hh, ww, c)
        return hn * gamma.reshape(1, 1, 1, c) + beta.reshape(1, 1, 1, c)

    def silu(h):
        return h * jax.nn.sigmoid(h)

    def conv(h, w9, b):
        k = w9.reshape(3, 3, w9.shape[1], w9.shape[2])  # HWIO
        y = jax.lax.conv_general_dilated(
            h, k, (1, 1), ((1, 1), (1, 1)),
            dimension_numbers=("NHWC", "HWIO", "NHWC"))
        return y + b.reshape(1, 1, 1, -1)

    h = conv(silu(gn(x, p["gn1_g"], p["gn1_b"])), p["w1_9"], p["c1_b"])
    h = conv(silu(gn(h, p["gn2_g"], p["gn2_b"])), p["w2_9"], p["c2_b"])
    return h


def make_params(key, in_c, out_c):
    ks = jax.random.split(key, 8)
    # PyTorch conv weight layout (out_c, in_c, 3, 3) -> tap-major (9, in_c, out_c)
    w1 = jax.random.normal(ks[0], (out_c, in_c, 3, 3), jnp.float32) / np.sqrt(9 * in_c)
    w2 = jax.random.normal(ks[1], (out_c, out_c, 3, 3), jnp.float32) / np.sqrt(9 * out_c)
    return {
        "gn1_g": 1.0 + 0.1 * jax.random.normal(ks[2], (1, in_c), jnp.float32),
        "gn1_b": 0.1 * jax.random.normal(ks[3], (1, in_c), jnp.float32),
        "w1_9": jnp.transpose(w1, (2, 3, 1, 0)).reshape(9, in_c, out_c),
        "c1_b": 0.1 * jax.random.normal(ks[4], (1, out_c), jnp.float32),
        "gn2_g": 1.0 + 0.1 * jax.random.normal(ks[5], (1, out_c), jnp.float32),
        "gn2_b": 0.1 * jax.random.normal(ks[6], (1, out_c), jnp.float32),
        "w2_9": jnp.transpose(w2, (2, 3, 1, 0)).reshape(9, out_c, out_c),
        "c2_b": 0.1 * jax.random.normal(ks[7], (1, out_c), jnp.float32),
        # NOTE: the PyTorch module builds a 1x1 shortcut conv when in_c != out_c, but
        # its result is never used by forward(), so it is omitted here.
    }


if __name__ == "__main__":
    N, H, W = 2, 16, 16
    in_c, out_c, num_groups = 8, 16, 4

    key = jax.random.PRNGKey(0)
    kx, kp = jax.random.split(key)
    x_nchw = jax.random.normal(kx, (N, in_c, H, W), jnp.float32)   # PyTorch layout
    params = make_params(kp, in_c, out_c)

    fwd = jax.jit(functools.partial(non_resnet_block_nchw,
                                    num_groups=num_groups, row_tile=8))
    out = jax.block_until_ready(fwd(x_nchw, params))

    x_nhwc = jnp.transpose(x_nchw, (0, 2, 3, 1))
    ref = jnp.transpose(ref_forward(x_nhwc, params, num_groups), (0, 3, 1, 2))
    ref = jax.block_until_ready(ref)
    # Mixed precision path (bf16 MXU operands + bf16 intermediate): 2e-2 tolerance.
    np.testing.assert_allclose(np.asarray(out), np.asarray(ref), rtol=2e-2, atol=2e-2)

    print("KERNEL_OK")
</pallas_src>

<mosaic_0001>
module attributes {stable_mosaic.version = 11 : i64} {
  func.func @gn_stats_kernel(%arg0: i32, %arg1: i32, %arg2: memref<1x8x16x8xf32, #tpu.memory_space<vmem>>, %arg3: memref<1x1x2x8xf32, #tpu.memory_space<vmem>>) attributes {dimension_semantics = [#tpu.dimension_semantics<parallel>, #tpu.dimension_semantics<parallel>], iteration_bounds = array<i64: 2, 2>, scalar_prefetch = 0 : i64, scratch_operands = 0 : i64, tpu.core_type = #tpu.core_type<tc>, window_params = [{transform_indices = @transform_0, window_bounds = array<i64: 1, 8, 16, 8>}, {transform_indices = @transform_1, window_bounds = array<i64: 1, 1, 2, 8>}]} {
    %c0 = arith.constant 0 : index
    %c0_0 = arith.constant 0 : index
    %c0_1 = arith.constant 0 : index
    %c0_2 = arith.constant 0 : index
    %0 = vector.load %arg2[%c0, %c0_0, %c0_1, %c0_2] : memref<1x8x16x8xf32, #tpu.memory_space<vmem>>, vector<1x8x16x8xf32>
    %1 = vector.shape_cast %0 : vector<1x8x16x8xf32> to vector<8x16x8xf32>
    %2 = vector.shape_cast %1 : vector<8x16x8xf32> to vector<128x8xf32>
    %cst = arith.constant 1.000000e+00 : f32
    %3 = vector.broadcast %cst : f32 to vector<1x128xf32>
    %cst_3 = arith.constant dense<0.000000e+00> : vector<1x8xf32>
    %4 = tpu.matmul %3, %2, %cst_3 {dimension_numbers = #tpu.dot_dimension_numbers<[1], [0], [0], [1], [0, 0, 1, 1], [], []>} : vector<1x128xf32>, vector<128x8xf32>, vector<1x8xf32> -> vector<1x8xf32>
    %5 = arith.mulf %2, %2 : vector<128x8xf32>
    %cst_4 = arith.constant dense<0.000000e+00> : vector<1x8xf32>
    %6 = tpu.matmul %3, %5, %cst_4 {dimension_numbers = #tpu.dot_dimension_numbers<[1], [0], [0], [1], [0, 0, 1, 1], [], []>} : vector<1x128xf32>, vector<128x8xf32>, vector<1x8xf32> -> vector<1x8xf32>
    %7 = tpu.concatenate %4, %6 in 0 : vector<1x8xf32>, vector<1x8xf32> -> vector<2x8xf32>
    %c0_5 = arith.constant 0 : index
    %c0_6 = arith.constant 0 : index
    %c0_7 = arith.constant 0 : index
    %c0_8 = arith.constant 0 : index
    %8 = vector.load %arg3[%c0_5, %c0_6, %c0_7, %c0_8] : memref<1x1x2x8xf32, #tpu.memory_space<vmem>>, vector<1x1x2x8xf32>
    %9 = vector.shape_cast %8 : vector<1x1x2x8xf32> to vector<2x8xf32>
    %10 = vector.shape_cast %7 : vector<2x8xf32> to vector<1x1x2x8xf32>
    tpu.vector_store %arg3[%c0_5, %c0_6, %c0_7, %c0_8], %10 {strides = array<i32>} : memref<1x1x2x8xf32, #tpu.memory_space<vmem>>, vector<1x1x2x8xf32>,
    return
  }
  func.func @transform_0(%arg0: i32, %arg1: i32) -> (i32, i32, i32, i32) {
    %c0_i32 = arith.constant 0 : i32
    %c0_i32_0 = arith.constant 0 : i32
    %c0_i32_1 = arith.constant 0 : i32
    return %arg0, %arg1, %c0_i32, %c0_i32_0 : i32, i32, i32, i32
  }
  func.func @transform_1(%arg0: i32, %arg1: i32) -> (i32, i32, i32, i32) {
    %c0_i32 = arith.constant 0 : i32
    %c0_i32_0 = arith.constant 0 : i32
    %c0_i32_1 = arith.constant 0 : i32
    return %arg0, %arg1, %c0_i32, %c0_i32_0 : i32, i32, i32, i32
  }
}

module attributes {stable_mosaic.version = 11 : i64} {
  func.func @gn_silu_conv_kernel(%arg0: i32, %arg1: i32, %arg2: memref<1x8x16x8xf32, #tpu.memory_space<vmem>>, %arg3: memref<1x1x16x8xf32, #tpu.memory_space<vmem>>, %arg4: memref<1x1x16x8xf32, #tpu.memory_space<vmem>>, %arg5: memref<1x1x8xf32, #tpu.memory_space<vmem>>, %arg6: memref<1x1x8xf32, #tpu.memory_space<vmem>>, %arg7: memref<3x24x16xbf16, #tpu.memory_space<vmem>>, %arg8: memref<1x1x16xf32, #tpu.memory_space<vmem>>, %arg9: memref<1x8x16x16xbf16, #tpu.memory_space<vmem>>, %arg10: memref<1x1x2x16xf32, #tpu.memory_space<vmem>>) attributes {dimension_semantics = [#tpu.dimension_semantics<parallel>, #tpu.dimension_semantics<parallel>], iteration_bounds = array<i64: 2, 2>, scalar_prefetch = 0 : i64, scratch_operands = 0 : i64, tpu.core_type = #tpu.core_type<tc>, window_params = [{transform_indices = @transform_0, window_bounds = array<i64: 1, 8, 16, 8>}, {transform_indices = @transform_1, window_bounds = array<i64: 1, 1, 16, 8>}, {transform_indices = @transform_2, window_bounds = array<i64: 1, 1, 16, 8>}, {transform_indices = @transform_3, window_bounds = array<i64: 1, 1, 8>}, {transform_indices = @transform_4, window_bounds = array<i64: 1, 1, 8>}, {pipeline_mode = #tpu.pipeline_mode<synchronous>, transform_indices = @transform_5, window_bounds = array<i64: 3, 24, 16>}, {pipeline_mode = #tpu.pipeline_mode<synchronous>, transform_indices = @transform_6, window_bounds = array<i64: 1, 1, 16>}, {transform_indices = @transform_7, window_bounds = array<i64: 1, 8, 16, 16>}, {transform_indices = @transform_8, window_bounds = array<i64: 1, 1, 2, 16>}]} {
    %c0 = arith.constant 0 : index
    %c0_0 = arith.constant 0 : index
    %c0_1 = arith.constant 0 : index
    %c0_2 = arith.constant 0 : index
    %0 = vector.load %arg3[%c0, %c0_0, %c0_1, %c0_2] : memref<1x1x16x8xf32, #tpu.memory_space<vmem>>, vector<1x1x16x8xf32>
    %1 = vector.shape_cast %0 : vector<1x1x16x8xf32> to vector<1x16x8xf32>
    %c0_3 = arith.constant 0 : index
    %c0_4 = arith.constant 0 : index
    %c0_5 = arith.constant 0 : index
    %c0_6 = arith.constant 0 : index
    %2 = vector.load %arg2[%c0_3, %c0_4, %c0_5, %c0_6] : memref<1x8x16x8xf32, #tpu.memory_space<vmem>>, vector<1x8x16x8xf32>
    %3 = vector.shape_cast %2 : vector<1x8x16x8xf32> to vector<8x16x8xf32>
    %c0_7 = arith.constant 0 : index
    %c0_8 = arith.constant 0 : index
    %c0_9 = arith.constant 0 : index
    %c0_10 = arith.constant 0 : index
    %4 = vector.load %arg4[%c0_7, %c0_8, %c0_9, %c0_10] : memref<1x1x16x8xf32, #tpu.memory_space<vmem>>, vector<1x1x16x8xf32>
    %5 = vector.shape_cast %4 : vector<1x1x16x8xf32> to vector<1x16x8xf32>
    %6 = tpu.concatenate %1, %3, %5 in 0 : vector<1x16x8xf32>, vector<8x16x8xf32>, vector<1x16x8xf32> -> vector<10x16x8xf32>
    %c0_11 = arith.constant 0 : index
    %c0_12 = arith.constant 0 : index
    %c0_13 = arith.constant 0 : index
    %7 = vector.load %arg5[%c0_11, %c0_12, %c0_13] : memref<1x1x8xf32, #tpu.memory_space<vmem>>, vector<1x1x8xf32>
    %8 = vector.shape_cast %7 : vector<1x1x8xf32> to vector<1x8xf32>
    %9 = vector.shape_cast %8 : vector<1x8xf32> to vector<1x1x8xf32>
    %c0_14 = arith.constant 0 : index
    %c0_15 = arith.constant 0 : index
    %c0_16 = arith.constant 0 : index
    %10 = vector.load %arg6[%c0_14, %c0_15, %c0_16] : memref<1x1x8xf32, #tpu.memory_space<vmem>>, vector<1x1x8xf32>
    %11 = vector.shape_cast %10 : vector<1x1x8xf32> to vector<1x8xf32>
    %12 = vector.shape_cast %11 : vector<1x8xf32> to vector<1x1x8xf32>
    %13 = vector.broadcast %9 : vector<1x1x8xf32> to vector<10x16x8xf32>
    %14 = arith.mulf %6, %13 : vector<10x16x8xf32>
    %15 = vector.broadcast %12 : vector<1x1x8xf32> to vector<10x16x8xf32>
    %16 = arith.addf %14, %15 : vector<10x16x8xf32>
    %17 = arith.negf %16 : vector<10x16x8xf32>
    %18 = math.exp %17 : vector<10x16x8xf32>
    %cst = arith.constant 1.000000e+00 : f32
    %19 = vector.broadcast %cst : f32 to vector<10x16x8xf32>
    %20 = arith.addf %19, %18 : vector<10x16x8xf32>
    %21 = arith.divf %19, %20 : vector<10x16x8xf32>
    %22 = arith.mulf %16, %21 : vector<10x16x8xf32>
    %c8_i32 = arith.constant 8 : i32
    %23 = arith.muli %arg1, %c8_i32 : i32
    %c1_i32 = arith.constant 1 : i32
    %24 = arith.subi %23, %c1_i32 : i32
    %25 = tpu.iota {dimensions = array<i32: 0>} : vector<10x1x1xi32>
    %26 = vector.broadcast %24 : i32 to vector<10x1x1xi32>
    %27 = arith.addi %26, %25 : vector<10x1x1xi32>
    %c0_i32 = arith.constant 0 : i32
    %28 = vector.broadcast %c0_i32 : i32 to vector<10x1x1xi32>
    %29 = arith.cmpi sge, %27, %28 : vector<10x1x1xi32>
    %c16_i32 = arith.constant 16 : i32
    %30 = vector.broadcast %c16_i32 : i32 to vector<10x1x1xi32>
    %31 = arith.cmpi slt, %27, %30 : vector<10x1x1xi32>
    %32 = arith.andi %29, %31 : vector<10x1x1xi1>
    %cst_17 = arith.constant 0.000000e+00 : f32
    %33 = vector.shape_cast %32 : vector<10x1x1xi1> to vector<10x1x1xi1>
    %34 = vector.broadcast %33 : vector<10x1x1xi1> to vector<10x16x8xi1>
    %35 = vector.broadcast %cst_17 : f32 to vector<10x16x8xf32>
    %36 = arith.select %34, %22, %35 : vector<10x16x8xi1>, vector<10x16x8xf32>
    %cst_18 = arith.constant 0.000000e+00 : f32
    %37 = vector.broadcast %cst_18 : f32 to vector<10x1x8xf32>
    %38 = tpu.concatenate %37, %36, %37 in 1 : vector<10x1x8xf32>, vector<10x16x8xf32>, vector<10x1x8xf32> -> vector<10x18x8xf32>
    %39 = vector.extract_strided_slice %38 {offsets = [0, 0, 0], sizes = [10, 16, 8], strides = [1, 1, 1]} : vector<10x18x8xf32> to vector<10x16x8xf32>
    %40 = vector.extract_strided_slice %38 {offsets = [0, 1, 0], sizes = [10, 16, 8], strides = [1, 1, 1]} : vector<10x18x8xf32> to vector<10x16x8xf32>
    %41 = vector.extract_strided_slice %38 {offsets = [0, 2, 0], sizes = [10, 16, 8], strides = [1, 1, 1]} : vector<10x18x8xf32> to vector<10x16x8xf32>
    %42 = tpu.concatenate %39, %40, %41 in 2 : vector<10x16x8xf32>, vector<10x16x8xf32>, vector<10x16x8xf32> -> vector<10x16x24xf32>
    %43 = arith.truncf %42 : vector<10x16x24xf32> to vector<10x16x24xbf16>
    %c0_19 = arith.constant 0 : index
    %c0_20 = arith.constant 0 : index
    %c0_21 = arith.constant 0 : index
    %44 = vector.load %arg7[%c0_19, %c0_20, %c0_21] : memref<3x24x16xbf16, #tpu.memory_space<vmem>>, vector<3x24x16xbf16>
    %cst_22 = arith.constant 0.000000e+00 : f32
    %45 = vector.broadcast %cst_22 : f32 to vector<128x16xf32>
    %46 = vector.extract_strided_slice %43 {offsets = [0, 0, 0], sizes = [8, 16, 24], strides = [1, 1, 1]} : vector<10x16x24xbf16> to vector<8x16x24xbf16>
    %47 = vector.shape_cast %46 : vector<8x16x24xbf16> to vector<128x24xbf16>
    %48 = vector.extract_strided_slice %44 {offsets = [0, 0, 0], sizes = [1, 24, 16], strides = [1, 1, 1]} : vector<3x24x16xbf16> to vector<1x24x16xbf16>
    %49 = vector.shape_cast %48 : vector<1x24x16xbf16> to vector<24x16xbf16>
    %cst_23 = arith.constant dense<0.000000e+00> : vector<128x16xf32>
    %50 = tpu.matmul %47, %49, %cst_23 {dimension_numbers = #tpu.dot_dimension_numbers<[1], [0], [0], [1], [0, 0, 1, 1], [], []>} : vector<128x24xbf16>, vector<24x16xbf16>, vector<128x16xf32> -> vector<128x16xf32>
    %51 = arith.addf %45, %50 : vector<128x16xf32>
    %52 = vector.extract_strided_slice %43 {offsets = [1, 0, 0], sizes = [8, 16, 24], strides = [1, 1, 1]} : vector<10x16x24xbf16> to vector<8x16x24xbf16>
    %53 = vector.shape_cast %52 : vector<8x16x24xbf16> to vector<128x24xbf16>
    %54 = vector.extract_strided_slice %44 {offsets = [1, 0, 0], sizes = [1, 24, 16], strides = [1, 1, 1]} : vector<3x24x16xbf16> to vector<1x24x16xbf16>
    %55 = vector.shape_cast %54 : vector<1x24x16xbf16> to vector<24x16xbf16>
    %cst_24 = arith.constant dense<0.000000e+00> : vector<128x16xf32>
    %56 = tpu.matmul %53, %55, %cst_24 {dimension_numbers = #tpu.dot_dimension_numbers<[1], [0], [0], [1], [0, 0, 1, 1], [], []>} : vector<128x24xbf16>, vector<24x16xbf16>, vector<128x16xf32> -> vector<128x16xf32>
    %57 = arith.addf %51, %56 : vector<128x16xf32>
    %58 = vector.extract_strided_slice %43 {offsets = [2, 0, 0], sizes = [8, 16, 24], strides = [1, 1, 1]} : vector<10x16x24xbf16> to vector<8x16x24xbf16>
    %59 = vector.shape_cast %58 : vector<8x16x24xbf16> to vector<128x24xbf16>
    %60 = vector.extract_strided_slice %44 {offsets = [2, 0, 0], sizes = [1, 24, 16], strides = [1, 1, 1]} : vector<3x24x16xbf16> to vector<1x24x16xbf16>
    %61 = vector.shape_cast %60 : vector<1x24x16xbf16> to vector<24x16xbf16>
    %cst_25 = arith.constant dense<0.000000e+00> : vector<128x16xf32>
    %62 = tpu.matmul %59, %61, %cst_25 {dimension_numbers = #tpu.dot_dimension_numbers<[1], [0], [0], [1], [0, 0, 1, 1], [], []>} : vector<128x24xbf16>, vector<24x16xbf16>, vector<128x16xf32> -> vector<128x16xf32>
    %63 = arith.addf %57, %62 : vector<128x16xf32>
    %c0_26 = arith.constant 0 : index
    %c0_27 = arith.constant 0 : index
    %c0_28 = arith.constant 0 : index
    %64 = vector.load %arg8[%c0_26, %c0_27, %c0_28] : memref<1x1x16xf32, #tpu.memory_space<vmem>>, vector<1x1x16xf32>
    %65 = vector.shape_cast %64 : vector<1x1x16xf32> to vector<1x16xf32>
    %66 = vector.broadcast %65 : vector<1x16xf32> to vector<128x16xf32>
    %67 = arith.addf %63, %66 : vector<128x16xf32>
    %68 = vector.shape_cast %67 : vector<128x16xf32> to vector<8x16x16xf32>
    %69 = arith.truncf %68 : vector<8x16x16xf32> to vector<8x16x16xbf16>
    %c0_29 = arith.constant 0 : index
    %c0_30 = arith.constant 0 : index
    %c0_31 = arith.constant 0 : index
    %c0_32 = arith.constant 0 : index
    %70 = vector.load %arg9[%c0_29, %c0_30, %c0_31, %c0_32] : memref<1x8x16x16xbf16, #tpu.memory_space<vmem>>, vector<1x8x16x16xbf16>
    %71 = vector.shape_cast %70 : vector<1x8x16x16xbf16> to vector<8x16x16xbf16>
    %72 = vector.shape_cast %69 : vector<8x16x16xbf16> to vector<1x8x16x16xbf16>
    tpu.vector_store %arg9[%c0_29, %c0_30, %c0_31, %c0_32], %72 {strides = array<i32>} : memref<1x8x16x16xbf16, #tpu.memory_space<vmem>>, vector<1x8x16x16xbf16>,
    %cst_33 = arith.constant 1.000000e+00 : f32
    %73 = vector.broadcast %cst_33 : f32 to vector<1x128xf32>
    %cst_34 = arith.constant dense<0.000000e+00> : vector<1x16xf32>
    %74 = tpu.matmul %73, %67, %cst_34 {dimension_numbers = #tpu.dot_dimension_numbers<[1], [0], [0], [1], [0, 0, 1, 1], [], []>} : vector<1x128xf32>, vector<128x16xf32>, vector<1x16xf32> -> vector<1x16xf32>
    %75 = arith.mulf %67, %67 : vector<128x16xf32>
    %cst_35 = arith.constant dense<0.000000e+00> : vector<1x16xf32>
    %76 = tpu.matmul %73, %75, %cst_35 {dimension_numbers = #tpu.dot_dimension_numbers<[1], [0], [0], [1], [0, 0, 1, 1], [], []>} : vector<1x128xf32>, vector<128x16xf32>, vector<1x16xf32> -> vector<1x16xf32>
    %77 = tpu.concatenate %74, %76 in 0 : vector<1x16xf32>, vector<1x16xf32> -> vector<2x16xf32>
    %c0_36 = arith.constant 0 : index
    %c0_37 = arith.constant 0 : index
    %c0_38 = arith.constant 0 : index
    %c0_39 = arith.constant 0 : index
    %78 = vector.load %arg10[%c0_36, %c0_37, %c0_38, %c0_39] : memref<1x1x2x16xf32, #tpu.memory_space<vmem>>, vector<1x1x2x16xf32>
    %79 = vector.shape_cast %78 : vector<1x1x2x16xf32> to vector<2x16xf32>
    %80 = vector.shape_cast %77 : vector<2x16xf32> to vector<1x1x2x16xf32>
    tpu.vector_store %arg10[%c0_36, %c0_37, %c0_38, %c0_39], %80 {strides = array<i32>} : memref<1x1x2x16xf32, #tpu.memory_space<vmem>>, vector<1x1x2x16xf32>,
    return
  }
  func.func @transform_0(%arg0: i32, %arg1: i32) -> (i32, i32, i32, i32) {
    %c0_i32 = arith.constant 0 : i32
    %c0_i32_0 = arith.constant 0 : i32
    %c0_i32_1 = arith.constant 0 : i32
    return %arg0, %arg1, %c0_i32, %c0_i32_0 : i32, i32, i32, i32
  }
  func.func @transform_1(%arg0: i32, %arg1: i32) -> (i32, i32, i32, i32) {
    %c8_i32 = arith.constant 8 : i32
    %0 = arith.muli %arg1, %c8_i32 : i32
    %c1_i32 = arith.constant 1 : i32
    %1 = arith.subi %0, %c1_i32 : i32
    %c0_i32 = arith.constant 0 : i32
    %2 = arith.maxsi %1, %c0_i32 : i32
    %c0_i32_0 = arith.constant 0 : i32
    %c0_i32_1 = arith.constant 0 : i32
    %c0_i32_2 = arith.constant 0 : i32
    return %arg0, %2, %c0_i32_0, %c0_i32_1 : i32, i32, i32, i32
  }
  func.func @transform_2(%arg0: i32, %arg1: i32) -> (i32, i32, i32, i32) {
    %c1_i32 = arith.constant 1 : i32
    %0 = arith.addi %arg1, %c1_i32 : i32
    %c8_i32 = arith.constant 8 : i32
    %1 = arith.muli %0, %c8_i32 : i32
    %c15_i32 = arith.constant 15 : i32
    %2 = arith.minsi %1, %c15_i32 : i32
    %c0_i32 = arith.constant 0 : i32
    %c0_i32_0 = arith.constant 0 : i32
    %c0_i32_1 = arith.constant 0 : i32
    return %arg0, %2, %c0_i32, %c0_i32_0 : i32, i32, i32, i32
  }
  func.func @transform_3(%arg0: i32, %arg1: i32) -> (i32, i32, i32) {
    %c0_i32 = arith.constant 0 : i32
    %c0_i32_0 = arith.constant 0 : i32
    %c0_i32_1 = arith.constant 0 : i32
    return %arg0, %c0_i32, %c0_i32_0 : i32, i32, i32
  }
  func.func @transform_4(%arg0: i32, %arg1: i32) -> (i32, i32, i32) {
    %c0_i32 = arith.constant 0 : i32
    %c0_i32_0 = arith.constant 0 : i32
    %c0_i32_1 = arith.constant 0 : i32
    return %arg0, %c0_i32, %c0_i32_0 : i32, i32, i32
  }
  func.func @transform_5(%arg0: i32, %arg1: i32) -> (i32, i32, i32) {
    %c0_i32 = arith.constant 0 : i32
    %c0_i32_0 = arith.constant 0 : i32
    %c0_i32_1 = arith.constant 0 : i32
    %c0_i32_2 = arith.constant 0 : i32
    return %c0_i32, %c0_i32_0, %c0_i32_1 : i32, i32, i32
  }
  func.func @transform_6(%arg0: i32, %arg1: i32) -> (i32, i32, i32) {
    %c0_i32 = arith.constant 0 : i32
    %c0_i32_0 = arith.constant 0 : i32
    %c0_i32_1 = arith.constant 0 : i32
    %c0_i32_2 = arith.constant 0 : i32
    return %c0_i32, %c0_i32_0, %c0_i32_1 : i32, i32, i32
  }
  func.func @transform_7(%arg0: i32, %arg1: i32) -> (i32, i32, i32, i32) {
    %c0_i32 = arith.constant 0 : i32
    %c0_i32_0 = arith.constant 0 : i32
    %c0_i32_1 = arith.constant 0 : i32
    return %arg0, %arg1, %c0_i32, %c0_i32_0 : i32, i32, i32, i32
  }
  func.func @transform_8(%arg0: i32, %arg1: i32) -> (i32, i32, i32, i32) {
    %c0_i32 = arith.constant 0 : i32
    %c0_i32_0 = arith.constant 0 : i32
    %c0_i32_1 = arith.constant 0 : i32
    return %arg0, %arg1, %c0_i32, %c0_i32_0 : i32, i32, i32, i32
  }
}

module attributes {stable_mosaic.version = 11 : i64} {
  func.func @gn_silu_conv_kernel(%arg0: i32, %arg1: i32, %arg2: memref<1x8x16x16xbf16, #tpu.memory_space<vmem>>, %arg3: memref<1x1x16x16xbf16, #tpu.memory_space<vmem>>, %arg4: memref<1x1x16x16xbf16, #tpu.memory_space<vmem>>, %arg5: memref<1x1x16xf32, #tpu.memory_space<vmem>>, %arg6: memref<1x1x16xf32, #tpu.memory_space<vmem>>, %arg7: memref<3x48x16xbf16, #tpu.memory_space<vmem>>, %arg8: memref<1x1x16xf32, #tpu.memory_space<vmem>>, %arg9: memref<1x8x16x16xf32, #tpu.memory_space<vmem>>) attributes {dimension_semantics = [#tpu.dimension_semantics<parallel>, #tpu.dimension_semantics<parallel>], iteration_bounds = array<i64: 2, 2>, scalar_prefetch = 0 : i64, scratch_operands = 0 : i64, tpu.core_type = #tpu.core_type<tc>, window_params = [{transform_indices = @transform_0, window_bounds = array<i64: 1, 8, 16, 16>}, {transform_indices = @transform_1, window_bounds = array<i64: 1, 1, 16, 16>}, {transform_indices = @transform_2, window_bounds = array<i64: 1, 1, 16, 16>}, {transform_indices = @transform_3, window_bounds = array<i64: 1, 1, 16>}, {transform_indices = @transform_4, window_bounds = array<i64: 1, 1, 16>}, {pipeline_mode = #tpu.pipeline_mode<synchronous>, transform_indices = @transform_5, window_bounds = array<i64: 3, 48, 16>}, {pipeline_mode = #tpu.pipeline_mode<synchronous>, transform_indices = @transform_6, window_bounds = array<i64: 1, 1, 16>}, {transform_indices = @transform_7, window_bounds = array<i64: 1, 8, 16, 16>}]} {
    %c0 = arith.constant 0 : index
    %c0_0 = arith.constant 0 : index
    %c0_1 = arith.constant 0 : index
    %c0_2 = arith.constant 0 : index
    %0 = vector.load %arg3[%c0, %c0_0, %c0_1, %c0_2] : memref<1x1x16x16xbf16, #tpu.memory_space<vmem>>, vector<1x1x16x16xbf16>
    %1 = vector.shape_cast %0 : vector<1x1x16x16xbf16> to vector<1x16x16xbf16>
    %c0_3 = arith.constant 0 : index
    %c0_4 = arith.constant 0 : index
    %c0_5 = arith.constant 0 : index
    %c0_6 = arith.constant 0 : index
    %2 = vector.load %arg2[%c0_3, %c0_4, %c0_5, %c0_6] : memref<1x8x16x16xbf16, #tpu.memory_space<vmem>>, vector<1x8x16x16xbf16>
    %3 = vector.shape_cast %2 : vector<1x8x16x16xbf16> to vector<8x16x16xbf16>
    %c0_7 = arith.constant 0 : index
    %c0_8 = arith.constant 0 : index
    %c0_9 = arith.constant 0 : index
    %c0_10 = arith.constant 0 : index
    %4 = vector.load %arg4[%c0_7, %c0_8, %c0_9, %c0_10] : memref<1x1x16x16xbf16, #tpu.memory_space<vmem>>, vector<1x1x16x16xbf16>
    %5 = vector.shape_cast %4 : vector<1x1x16x16xbf16> to vector<1x16x16xbf16>
    %6 = tpu.concatenate %1, %3, %5 in 0 : vector<1x16x16xbf16>, vector<8x16x16xbf16>, vector<1x16x16xbf16> -> vector<10x16x16xbf16>
    %7 = arith.extf %6 : vector<10x16x16xbf16> to vector<10x16x16xf32>
    %c0_11 = arith.constant 0 : index
    %c0_12 = arith.constant 0 : index
    %c0_13 = arith.constant 0 : index
    %8 = vector.load %arg5[%c0_11, %c0_12, %c0_13] : memref<1x1x16xf32, #tpu.memory_space<vmem>>, vector<1x1x16xf32>
    %9 = vector.shape_cast %8 : vector<1x1x16xf32> to vector<1x16xf32>
    %10 = vector.shape_cast %9 : vector<1x16xf32> to vector<1x1x16xf32>
    %c0_14 = arith.constant 0 : index
    %c0_15 = arith.constant 0 : index
    %c0_16 = arith.constant 0 : index
    %11 = vector.load %arg6[%c0_14, %c0_15, %c0_16] : memref<1x1x16xf32, #tpu.memory_space<vmem>>, vector<1x1x16xf32>
    %12 = vector.shape_cast %11 : vector<1x1x16xf32> to vector<1x16xf32>
    %13 = vector.shape_cast %12 : vector<1x16xf32> to vector<1x1x16xf32>
    %14 = vector.broadcast %10 : vector<1x1x16xf32> to vector<10x16x16xf32>
    %15 = arith.mulf %7, %14 : vector<10x16x16xf32>
    %16 = vector.broadcast %13 : vector<1x1x16xf32> to vector<10x16x16xf32>
    %17 = arith.addf %15, %16 : vector<10x16x16xf32>
    %18 = arith.negf %17 : vector<10x16x16xf32>
    %19 = math.exp %18 : vector<10x16x16xf32>
    %cst = arith.constant 1.000000e+00 : f32
    %20 = vector.broadcast %cst : f32 to vector<10x16x16xf32>
    %21 = arith.addf %20, %19 : vector<10x16x16xf32>
    %22 = arith.divf %20, %21 : vector<10x16x16xf32>
    %23 = arith.mulf %17, %22 : vector<10x16x16xf32>
    %c8_i32 = arith.constant 8 : i32
    %24 = arith.muli %arg1, %c8_i32 : i32
    %c1_i32 = arith.constant 1 : i32
    %25 = arith.subi %24, %c1_i32 : i32
    %26 = tpu.iota {dimensions = array<i32: 0>} : vector<10x1x1xi32>
    %27 = vector.broadcast %25 : i32 to vector<10x1x1xi32>
    %28 = arith.addi %27, %26 : vector<10x1x1xi32>
    %c0_i32 = arith.constant 0 : i32
    %29 = vector.broadcast %c0_i32 : i32 to vector<10x1x1xi32>
    %30 = arith.cmpi sge, %28, %29 : vector<10x1x1xi32>
    %c16_i32 = arith.constant 16 : i32
    %31 = vector.broadcast %c16_i32 : i32 to vector<10x1x1xi32>
    %32 = arith.cmpi slt, %28, %31 : vector<10x1x1xi32>
    %33 = arith.andi %30, %32 : vector<10x1x1xi1>
    %cst_17 = arith.constant 0.000000e+00 : f32
    %34 = vector.shape_cast %33 : vector<10x1x1xi1> to vector<10x1x1xi1>
    %35 = vector.broadcast %34 : vector<10x1x1xi1> to vector<10x16x16xi1>
    %36 = vector.broadcast %cst_17 : f32 to vector<10x16x16xf32>
    %37 = arith.select %35, %23, %36 : vector<10x16x16xi1>, vector<10x16x16xf32>
    %cst_18 = arith.constant 0.000000e+00 : f32
    %38 = vector.broadcast %cst_18 : f32 to vector<10x1x16xf32>
    %39 = tpu.concatenate %38, %37, %38 in 1 : vector<10x1x16xf32>, vector<10x16x16xf32>, vector<10x1x16xf32> -> vector<10x18x16xf32>
    %40 = vector.extract_strided_slice %39 {offsets = [0, 0, 0], sizes = [10, 16, 16], strides = [1, 1, 1]} : vector<10x18x16xf32> to vector<10x16x16xf32>
    %41 = vector.extract_strided_slice %39 {offsets = [0, 1, 0], sizes = [10, 16, 16], strides = [1, 1, 1]} : vector<10x18x16xf32> to vector<10x16x16xf32>
    %42 = vector.extract_strided_slice %39 {offsets = [0, 2, 0], sizes = [10, 16, 16], strides = [1, 1, 1]} : vector<10x18x16xf32> to vector<10x16x16xf32>
    %43 = tpu.concatenate %40, %41, %42 in 2 : vector<10x16x16xf32>, vector<10x16x16xf32>, vector<10x16x16xf32> -> vector<10x16x48xf32>
    %44 = arith.truncf %43 : vector<10x16x48xf32> to vector<10x16x48xbf16>
    %c0_19 = arith.constant 0 : index
    %c0_20 = arith.constant 0 : index
    %c0_21 = arith.constant 0 : index
    %45 = vector.load %arg7[%c0_19, %c0_20, %c0_21] : memref<3x48x16xbf16, #tpu.memory_space<vmem>>, vector<3x48x16xbf16>
    %cst_22 = arith.constant 0.000000e+00 : f32
    %46 = vector.broadcast %cst_22 : f32 to vector<128x16xf32>
    %47 = vector.extract_strided_slice %44 {offsets = [0, 0, 0], sizes = [8, 16, 48], strides = [1, 1, 1]} : vector<10x16x48xbf16> to vector<8x16x48xbf16>
    %48 = vector.shape_cast %47 : vector<8x16x48xbf16> to vector<128x48xbf16>
    %49 = vector.extract_strided_slice %45 {offsets = [0, 0, 0], sizes = [1, 48, 16], strides = [1, 1, 1]} : vector<3x48x16xbf16> to vector<1x48x16xbf16>
    %50 = vector.shape_cast %49 : vector<1x48x16xbf16> to vector<48x16xbf16>
    %cst_23 = arith.constant dense<0.000000e+00> : vector<128x16xf32>
    %51 = tpu.matmul %48, %50, %cst_23 {dimension_numbers = #tpu.dot_dimension_numbers<[1], [0], [0], [1], [0, 0, 1, 1], [], []>} : vector<128x48xbf16>, vector<48x16xbf16>, vector<128x16xf32> -> vector<128x16xf32>
    %52 = arith.addf %46, %51 : vector<128x16xf32>
    %53 = vector.extract_strided_slice %44 {offsets = [1, 0, 0], sizes = [8, 16, 48], strides = [1, 1, 1]} : vector<10x16x48xbf16> to vector<8x16x48xbf16>
    %54 = vector.shape_cast %53 : vector<8x16x48xbf16> to vector<128x48xbf16>
    %55 = vector.extract_strided_slice %45 {offsets = [1, 0, 0], sizes = [1, 48, 16], strides = [1, 1, 1]} : vector<3x48x16xbf16> to vector<1x48x16xbf16>
    %56 = vector.shape_cast %55 : vector<1x48x16xbf16> to vector<48x16xbf16>
    %cst_24 = arith.constant dense<0.000000e+00> : vector<128x16xf32>
    %57 = tpu.matmul %54, %56, %cst_24 {dimension_numbers = #tpu.dot_dimension_numbers<[1], [0], [0], [1], [0, 0, 1, 1], [], []>} : vector<128x48xbf16>, vector<48x16xbf16>, vector<128x16xf32> -> vector<128x16xf32>
    %58 = arith.addf %52, %57 : vector<128x16xf32>
    %59 = vector.extract_strided_slice %44 {offsets = [2, 0, 0], sizes = [8, 16, 48], strides = [1, 1, 1]} : vector<10x16x48xbf16> to vector<8x16x48xbf16>
    %60 = vector.shape_cast %59 : vector<8x16x48xbf16> to vector<128x48xbf16>
    %61 = vector.extract_strided_slice %45 {offsets = [2, 0, 0], sizes = [1, 48, 16], strides = [1, 1, 1]} : vector<3x48x16xbf16> to vector<1x48x16xbf16>
    %62 = vector.shape_cast %61 : vector<1x48x16xbf16> to vector<48x16xbf16>
    %cst_25 = arith.constant dense<0.000000e+00> : vector<128x16xf32>
    %63 = tpu.matmul %60, %62, %cst_25 {dimension_numbers = #tpu.dot_dimension_numbers<[1], [0], [0], [1], [0, 0, 1, 1], [], []>} : vector<128x48xbf16>, vector<48x16xbf16>, vector<128x16xf32> -> vector<128x16xf32>
    %64 = arith.addf %58, %63 : vector<128x16xf32>
    %c0_26 = arith.constant 0 : index
    %c0_27 = arith.constant 0 : index
    %c0_28 = arith.constant 0 : index
    %65 = vector.load %arg8[%c0_26, %c0_27, %c0_28] : memref<1x1x16xf32, #tpu.memory_space<vmem>>, vector<1x1x16xf32>
    %66 = vector.shape_cast %65 : vector<1x1x16xf32> to vector<1x16xf32>
    %67 = vector.broadcast %66 : vector<1x16xf32> to vector<128x16xf32>
    %68 = arith.addf %64, %67 : vector<128x16xf32>
    %69 = vector.shape_cast %68 : vector<128x16xf32> to vector<8x16x16xf32>
    %c0_29 = arith.constant 0 : index
    %c0_30 = arith.constant 0 : index
    %c0_31 = arith.constant 0 : index
    %c0_32 = arith.constant 0 : index
    %70 = vector.load %arg9[%c0_29, %c0_30, %c0_31, %c0_32] : memref<1x8x16x16xf32, #tpu.memory_space<vmem>>, vector<1x8x16x16xf32>
    %71 = vector.shape_cast %70 : vector<1x8x16x16xf32> to vector<8x16x16xf32>
    %72 = vector.shape_cast %69 : vector<8x16x16xf32> to vector<1x8x16x16xf32>
    tpu.vector_store %arg9[%c0_29, %c0_30, %c0_31, %c0_32], %72 {strides = array<i32>} : memref<1x8x16x16xf32, #tpu.memory_space<vmem>>, vector<1x8x16x16xf32>,
    return
  }
  func.func @transform_0(%arg0: i32, %arg1: i32) -> (i32, i32, i32, i32) {
    %c0_i32 = arith.constant 0 : i32
    %c0_i32_0 = arith.constant 0 : i32
    %c0_i32_1 = arith.constant 0 : i32
    return %arg0, %arg1, %c0_i32, %c0_i32_0 : i32, i32, i32, i32
  }
  func.func @transform_1(%arg0: i32, %arg1: i32) -> (i32, i32, i32, i32) {
    %c8_i32 = arith.constant 8 : i32
    %0 = arith.muli %arg1, %c8_i32 : i32
    %c1_i32 = arith.constant 1 : i32
    %1 = arith.subi %0, %c1_i32 : i32
    %c0_i32 = arith.constant 0 : i32
    %2 = arith.maxsi %1, %c0_i32 : i32
    %c0_i32_0 = arith.constant 0 : i32
    %c0_i32_1 = arith.constant 0 : i32
    %c0_i32_2 = arith.constant 0 : i32
    return %arg0, %2, %c0_i32_0, %c0_i32_1 : i32, i32, i32, i32
  }
  func.func @transform_2(%arg0: i32, %arg1: i32) -> (i32, i32, i32, i32) {
    %c1_i32 = arith.constant 1 : i32
    %0 = arith.addi %arg1, %c1_i32 : i32
    %c8_i32 = arith.constant 8 : i32
    %1 = arith.muli %0, %c8_i32 : i32
    %c15_i32 = arith.constant 15 : i32
    %2 = arith.minsi %1, %c15_i32 : i32
    %c0_i32 = arith.constant 0 : i32
    %c0_i32_0 = arith.constant 0 : i32
    %c0_i32_1 = arith.constant 0 : i32
    return %arg0, %2, %c0_i32, %c0_i32_0 : i32, i32, i32, i32
  }
  func.func @transform_3(%arg0: i32, %arg1: i32) -> (i32, i32, i32) {
    %c0_i32 = arith.constant 0 : i32
    %c0_i32_0 = arith.constant 0 : i32
    %c0_i32_1 = arith.constant 0 : i32
    return %arg0, %c0_i32, %c0_i32_0 : i32, i32, i32
  }
  func.func @transform_4(%arg0: i32, %arg1: i32) -> (i32, i32, i32) {
    %c0_i32 = arith.constant 0 : i32
    %c0_i32_0 = arith.constant 0 : i32
    %c0_i32_1 = arith.constant 0 : i32
    return %arg0, %c0_i32, %c0_i32_0 : i32, i32, i32
  }
  func.func @transform_5(%arg0: i32, %arg1: i32) -> (i32, i32, i32) {
    %c0_i32 = arith.constant 0 : i32
    %c0_i32_0 = arith.constant 0 : i32
    %c0_i32_1 = arith.constant 0 : i32
    %c0_i32_2 = arith.constant 0 : i32
    return %c0_i32, %c0_i32_0, %c0_i32_1 : i32, i32, i32
  }
  func.func @transform_6(%arg0: i32, %arg1: i32) -> (i32, i32, i32) {
    %c0_i32 = arith.constant 0 : i32
    %c0_i32_0 = arith.constant 0 : i32
    %c0_i32_1 = arith.constant 0 : i32
    %c0_i32_2 = arith.constant 0 : i32
    return %c0_i32, %c0_i32_0, %c0_i32_1 : i32, i32, i32
  }
  func.func @transform_7(%arg0: i32, %arg1: i32) -> (i32, i32, i32, i32) {
    %c0_i32 = arith.constant 0 : i32
    %c0_i32_0 = arith.constant 0 : i32
    %c0_i32_1 = arith.constant 0 : i32
    return %arg0, %arg1, %c0_i32, %c0_i32_0 : i32, i32, i32, i32
  }
}

</mosaic_0001>

<bundles_post_ra>
// kernel: squeeze.4
= control target key start
LH: loop header
LB: loop body
LE: loop exit
PB: predicated region body
PF: predicated region fallthrough
CT: control target
= control target key end

     0   :  { %s43_s8 = smov 122   ;;  %vm7_vm0 = vcmask 15360   ;;  %s44_s9 = smov 124   ;;  %s64_s0 = inlined_call_operand.vmem [shape: f32[2,8], index: 0, kind: input, shape index: {}]   ;;  %s65_s1 = inlined_call_operand.vmem [shape: f32[2,4,2], index: 1, kind: output, shape index: {}]  }
   0x1   :  { %v4_v0 = vld [vmem:[%s64_s0] sm:$0x3]  ;;  %s42_s0 = smov 126  }
   0x2   :  { %5 = vst [vmem:[#allocation1] sm:$0x3] %v4_v0 }
   0x9   :  { %v9_v1 = vld [vmem:[#allocation1] sm:$0x3]  }
   0xa   :  { %v21_v2 = vld [vmem:[#allocation1] sm:$0x3]   ;;  %10 = vrot.lane.b32.xlu0 %v9_v1, %s42_s0 }
   0xb   :  { %22 = vrot.lane.b32.xlu1 %v21_v2, %s43_s8  ;;  %v6_v3 = vld [vmem:[#allocation1] sm:$0x3]  }
   0xc   :  { %v15_v4 = vld [vmem:[#allocation1] sm:$0x3]   ;;  %8 = vst.msk [vmem:[#allocation0] ss:$8 sm:$0x3] %vm7_vm0, %v6_v3  }
   0xe   :  { %16 = vrot.lane.b32.xlu0 %v15_v4, %s44_s9 }
  0x7c   :  { %v11_v5 = vpop.permute.xlu0 %10  }
  0x7d   :  { %v23_v6 = vpop.permute.xlu1 %22   ;;  %14 = vst.msk [vmem:[#allocation0 + $0x1] ss:$8 sm:$0x3] %vm7_vm0, %v11_v5  }
  0x7e   :  { %26 = vst.msk [vmem:[#allocation0 + $0x3] ss:$8 sm:$0x3] %vm7_vm0, %v23_v6  }
  0x80   :  { %v17_v7 = vpop.permute.xlu0 %16  }
  0x81   :  { %20 = vst.msk [vmem:[#allocation0 + $0x2] ss:$8 sm:$0x3] %vm7_vm0, %v17_v7  }
  0x88   :  { %v30_v8 = vld [vmem:[#allocation0] sm:$0xf]  ;;  %v34_v9 = vld [vmem:[#allocation0 + $0x8] sm:$0xf] }
  0x89   :  { %32 = vst [vmem:[%s65_s1] sm:$0xf] %v30_v8  ;;  %38 = vst [vmem:[%s65_s1 + $0x4] sm:$0xf] %v34_v9 }

// kernel: squeeze.6
= control target key start
LH: loop header
LB: loop body
LE: loop exit
PB: predicated region body
PF: predicated region fallthrough
CT: control target
= control target key end

     0   :  { %s43_s8 = smov 116   ;;  %vm7_vm0 = vcmask 31744   ;;  %s44_s9 = smov 120   ;;  %s64_s0 = inlined_call_operand.vmem [shape: f32[2,16], index: 0, kind: input, shape index: {}]   ;;  %s65_s1 = inlined_call_operand.vmem [shape: f32[2,4,4], index: 1, kind: output, shape index: {}]  }
   0x1   :  { %v4_v0 = vld [vmem:[%s64_s0] sm:$0x3]  ;;  %s42_s0 = smov 124  }
   0x2   :  { %5 = vst [vmem:[#allocation1] sm:$0x3] %v4_v0 }
   0x9   :  { %v9_v1 = vld [vmem:[#allocation1] sm:$0x3]  }
   0xa   :  { %v21_v2 = vld [vmem:[#allocation1] sm:$0x3]   ;;  %10 = vrot.lane.b32.xlu0 %v9_v1, %s42_s0 }
   0xb   :  { %22 = vrot.lane.b32.xlu1 %v21_v2, %s43_s8  ;;  %v6_v3 = vld [vmem:[#allocation1] sm:$0x3]  }
   0xc   :  { %v15_v4 = vld [vmem:[#allocation1] sm:$0x3]   ;;  %8 = vst.msk [vmem:[#allocation0] ss:$8 sm:$0x3] %vm7_vm0, %v6_v3  }
   0xe   :  { %16 = vrot.lane.b32.xlu0 %v15_v4, %s44_s9 }
  0x7c   :  { %v11_v5 = vpop.permute.xlu0 %10  }
  0x7d   :  { %v23_v6 = vpop.permute.xlu1 %22   ;;  %14 = vst.msk [vmem:[#allocation0 + $0x1] ss:$8 sm:$0x3] %vm7_vm0, %v11_v5  }
  0x7e   :  { %26 = vst.msk [vmem:[#allocation0 + $0x3] ss:$8 sm:$0x3] %vm7_vm0, %v23_v6  }
  0x80   :  { %v17_v7 = vpop.permute.xlu0 %16  }
  0x81   :  { %20 = vst.msk [vmem:[#allocation0 + $0x2] ss:$8 sm:$0x3] %vm7_vm0, %v17_v7  }
  0x88   :  { %v30_v8 = vld [vmem:[#allocation0] sm:$0xf]  ;;  %v34_v9 = vld [vmem:[#allocation0 + $0x8] sm:$0xf] }
  0x89   :  { %32 = vst [vmem:[%s65_s1] sm:$0xf] %v30_v8  ;;  %38 = vst [vmem:[%s65_s1 + $0x4] sm:$0xf] %v34_v9 }

// kernel: non_resnet_block_nchw.3
= control target key start
LH: loop header
LB: loop body
LE: loop exit
PB: predicated region body
PF: predicated region fallthrough
CT: control target
= control target key end

     0   :  { %s687_s6 = smov 0   ;;  %s689_s7 = smov 0   ;;  %s781_s0 = inlined_call_operand.vmem [shape: f32[2,16,16,8], index: 0, kind: input, shape index: {}]   ;;  %s782_s1 = inlined_call_operand.vmem [shape: f32[2,2,2,8], index: 1, kind: output, shape index: {}]  }
   0x1   :  { %s691_s8 = smov 0   ;;  %s693_s9 = smov 0  }
   0x2   :  { %s695_s10 = smov 0  }
   0x3 LB: > { %s20_s11 = sadd.s32 1, %s663_s8  ;;  %s23_s12 = sadd.s32 1, %s667_s9  ;;  %s671_s10 = sphi %s695_s10, %s11_s10   ;;  %s667_s9 = sphi %s693_s9, %s786_s9   ;;  %s663_s8 = sphi %s691_s8, %s785_s8   ;;  %s659_s7 = sphi %s689_s7, %s784_s7   ;;  %s655_s6 = sphi %s687_s6, %s783_s6  }
   0x4   : > { %p21_p0 = scmp.ge.s32.totalorder %s20_s11, 2  ;;  %p428_p1 = scmp.ge.s32.totalorder %s671_s10, 1 }
   0x5   : > { %p109_p2 = scmp.lt.s32.totalorder %s671_s10, 5 }
   0x6   : > { %s788_s11 = smov (%p21_p0, %s20_s11), 0  ;;  %s790_s12 = smov (!%p21_p0, %s23_s12), %s667_s9 }
   0x7   : > { %p110_p3 = pnand %p428_p1, %p109_p2  ;;  %p25_p4 = scmp.ge.s32.totalorder %s790_s12, 2 }
   0x8   : > { %s429_s13 = sshll.u32 (!%p110_p3), %s655_s6, 3  ;;  %p138_p5 = scmp.lt.s32.totalorder (!%p110_p3), %s659_s7, 1  ;;  %v673_v0 = vmov (!%p110_p3), 0.0|0.0   ;;  %vm674_vm0 = vmmov (!%p110_p3), 0   ;;  %v675_v1 = vmov (!%p110_p3), 0.0   ;;  %v676_v50 = vmov (!%p110_p3), 1.0  }
   0x9   : > { %s792_s12 = smov (%p25_p4, %s790_s12), 0  ;;  %113 = sbr.rel (%p110_p3) target bundleno = 273 (0x111), region = 24 }
   0xa   : > { %565 = vmatprep.subr.bf16.mxu1 (!%p110_p3), %v673_v0  ;;  %541 = vmatprep.subr.bf16.mxu0 (!%p110_p3), %v673_v0  ;;  %p140_p6 = scmp.lt.s32.totalorder (!%p110_p3), %s429_s13, 15  ;;  %p150_p7 = scmp.lt.s32.totalorder (!%p110_p3), %s655_s6, 1  ;;  %vm331_vm1 = vcmask (!%p110_p3), 1040384   ;;  %vm333_vm2 = vcmask (!%p110_p3), 58368  }
   0xb   : > { %538 = vmatprep.mubr.msk.f32.mxu1 (!%p110_p3), %vm674_vm0, %v675_v1  ;;  %503 = vmatprep.mubr.msk.f32.mxu0 (!%p110_p3), %vm674_vm0, %v675_v1 }
  0x10   : > { %s794_s7 = smov (!%p138_p5, %s659_s7), 1  ;;  %s796_s13 = smov (!%p140_p6, %s429_s13), 15 }
  0x11   : > { %s431_s14 = sshll.u32 %s794_s7, 5  ;;  %s430_s15 = sshll.u32 %s796_s13, 1 }
  0x12   : > { %s144_s16 = sadd.s32 %s431_s14, %s430_s15  ;;  %s798_s6 = smov (!%p150_p7, %s655_s6), 1 }
  0x13   : > { %s432_s17 = sshll.u32 %s144_s16, 3  ;;  %s433_s21 = sshll.u32 %s794_s7, 1 }
  0x14   : > { %s728_s20 = scalar_lea.vmem %s781_s0, %s432_s17  ;;  %s153_s22 = sadd.s32 %s433_s21, %s798_s6 }
  0x15   : > { %v156_v2 = vld [vmem:[%s728_s20] sm:$0xff]  ;;  %v157_v3 = vld [vmem:[%s728_s20 + $0x8] sm:$0xff]  ;;  %v158_v4 = vld [vmem:[%s728_s20 + $0x10] sm:$0xff]  ;;  %s434_s23 = sshll.u32 %s153_s22, 1 }
  0x16   : > { %v242_v5 = vmul.f32 %v156_v2, %v156_v2  ;;  %v243_v6 = vmul.f32 %v157_v3, %v157_v3  ;;  %v542_v7 = vpack.c.bf16 %v157_v3, %v156_v2  ;;  %v159_v8 = vld [vmem:[%s728_s20 + $0x18] sm:$0xff]  ;;  %v244_v9 = vmul.f32 %v158_v4, %v158_v4  ;;  %v160_v11 = vld [vmem:[%s728_s20 + $0x20] sm:$0xff]  ;;  %v161_v12 = vld [vmem:[%s728_s20 + $0x28] sm:$0xff]  ;;  %s155_s26 = scalar_lea.vmem %s782_s1, %s434_s23 }
  0x17   : > { %v245_v10 = vmul.f32 %v159_v8, %v159_v8  ;;  %v545_v14 = vpack.c.bf16 %v159_v8, %v158_v4  ;;  %v246_v16 = vmul.f32 %v160_v11, %v160_v11  ;;  %v247_v17 = vmul.f32 %v161_v12, %v161_v12  ;;  %v162_v18 = vld [vmem:[%s728_s20 + $0x30] sm:$0xff]  ;;  %v163_v19 = vld [vmem:[%s728_s20 + $0x38] sm:$0xff]  ;;  %v164_v24 = vld [vmem:[%s728_s20 + $0x40] sm:$0xff] }
  0x18   : > { %v566_v13 = vpack.c.bf16 %v243_v6, %v242_v5  ;;  %543 = vmatpush3.bf16.msra.mxu0 %v542_v7  ;;  %v548_v20 = vpack.c.bf16 %v161_v12, %v160_v11  ;;  %v248_v22 = vmul.f32 %v162_v18, %v162_v18  ;;  %v249_v23 = vmul.f32 %v163_v19, %v163_v19  ;;  %v165_v25 = vld [vmem:[%s728_s20 + $0x48] sm:$0xff]  ;;  %v166_v30 = vld [vmem:[%s728_s20 + $0x50] sm:$0xff]  ;;  %v167_v31 = vld [vmem:[%s728_s20 + $0x58] sm:$0xff] }
  0x19   : > { %544 = vmatprep.subr.bf16.mxu0 %v673_v0  ;;  %v569_v15 = vpack.c.bf16 %v245_v10, %v244_v9  ;;  %v572_v21 = vpack.c.bf16 %v247_v17, %v246_v16  ;;  %v551_v26 = vpack.c.bf16 %v163_v19, %v162_v18  ;;  %v250_v28 = vmul.f32 %v164_v24, %v164_v24  ;;  %v168_v36 = vld [vmem:[%s728_s20 + $0x60] sm:$0xff]  ;;  %v169_v37 = vld [vmem:[%s728_s20 + $0x68] sm:$0xff]  ;;  %v170_v42 = vld [vmem:[%s728_s20 + $0x70] sm:$0xff] }
  0x1a   : > { %567 = vmatpush3.bf16.msra.mxu1 %v566_v13  ;;  %v575_v27 = vpack.c.bf16 %v249_v23, %v248_v22  ;;  %v251_v29 = vmul.f32 %v165_v25, %v165_v25  ;;  %v554_v32 = vpack.c.bf16 %v165_v25, %v164_v24  ;;  %v252_v34 = vmul.f32 %v166_v30, %v166_v30  ;;  %v171_v43 = vld [vmem:[%s728_s20 + $0x78] sm:$0xff] }
  0x1b   : > { %568 = vmatprep.subr.bf16.mxu1 %v673_v0  ;;  %v253_v35 = vmul.f32 %v167_v31, %v167_v31  ;;  %v557_v38 = vpack.c.bf16 %v167_v31, %v166_v30  ;;  %v254_v40 = vmul.f32 %v168_v36, %v168_v36  ;;  %v255_v41 = vmul.f32 %v169_v37, %v169_v37 }
  0x1c   : > { %546 = vmatpush3.bf16.msra.mxu0 %v545_v14  ;;  %v578_v33 = vpack.c.bf16 %v251_v29, %v250_v28  ;;  %v560_v44 = vpack.c.bf16 %v169_v37, %v168_v36  ;;  %v256_v46 = vmul.f32 %v170_v42, %v170_v42  ;;  %v257_v47 = vmul.f32 %v171_v43, %v171_v43 }
  0x1d   : > { %547 = vmatprep.subr.bf16.mxu0 %v673_v0  ;;  %v581_v39 = vpack.c.bf16 %v253_v35, %v252_v34  ;;  %v584_v45 = vpack.c.bf16 %v255_v41, %v254_v40  ;;  %v563_v48 = vpack.c.bf16 %v171_v43, %v170_v42 }
  0x1e   : > { %570 = vmatpush3.bf16.msra.mxu1 %v569_v15  ;;  %v587_v49 = vpack.c.bf16 %v257_v47, %v256_v46 }
  0x1f   : > { %571 = vmatprep.subr.bf16.mxu1 %v673_v0 }
  0x20   : > { %549 = vmatpush3.bf16.msra.mxu0 %v548_v20 }
  0x21   : > { %550 = vmatprep.subr.bf16.mxu0 %v673_v0 }
  0x22   : > { %573 = vmatpush3.bf16.msra.mxu1 %v572_v21 }
  0x23   : > { %574 = vmatprep.subr.bf16.mxu1 %v673_v0 }
  0x24   : > { %552 = vmatpush3.bf16.msra.mxu0 %v551_v26 }
  0x25   : > { %553 = vmatprep.subr.bf16.mxu0 %v673_v0 }
  0x26   : > { %576 = vmatpush3.bf16.msra.mxu1 %v575_v27 }
  0x27   : > { %577 = vmatprep.subr.bf16.mxu1 %v673_v0 }
  0x28   : > { %555 = vmatpush3.bf16.msra.mxu0 %v554_v32 }
  0x29   : > { %556 = vmatprep.subr.bf16.mxu0 %v673_v0 }
  0x2a   : > { %579 = vmatpush3.bf16.msra.mxu1 %v578_v33 }
  0x2b   : > { %580 = vmatprep.subr.bf16.mxu1 %v673_v0 }
  0x2c   : > { %558 = vmatpush3.bf16.msra.mxu0 %v557_v38 }
  0x2d   : > { %559 = vmatprep.subr.bf16.mxu0 %v673_v0 }
  0x2e   : > { %582 = vmatpush3.bf16.msra.mxu1 %v581_v39 }
  0x2f   : > { %583 = vmatprep.subr.bf16.mxu1 %v673_v0 }
  0x30   : > { %561 = vmatpush3.bf16.msra.mxu0 %v560_v44 }
  0x31   : > { %562 = vmatprep.subr.bf16.mxu0 %v673_v0 }
  0x32   : > { %585 = vmatpush3.bf16.msra.mxu1 %v584_v45 }
  0x33   : > { %586 = vmatprep.subr.bf16.mxu1 %v673_v0 }
  0x34   : > { %564 = vmatpush3.bf16.msra.mxu0 %v563_v48 }
  0x36   : > { %588 = vmatpush3.bf16.msra.mxu1 %v587_v49 }
  0x37   : > { %504 = vmatmul.mubr.f32.vlgmr.msra.gmra.mrb[0].mxu0 %v676_v50 }
  0x39   : > { %539 = vmatmul.mubr.f32.vlgmr.msra.gmra.mrb[0].mxu1 %v676_v50 }
 0x10a   : > { %v238_v51 = vpop.f32.mrb[0].mxu0 }
 0x10b   : > { %v505_v52 = vpop.f32.mrb[1].mxu0 }
 0x10c   : > { %v324_v53 = vpop.f32.mrb[0].mxu1 }
 0x10d   : > { %v329_v54 = vrot.slane %v324_v53, 7  ;;  %v540_v55 = vpop.f32.mrb[1].mxu1 }
 0x10f   : > { %v332_v56 = vsel %vm331_vm1, %v238_v51, %v329_v54 }
 0x110   : > { %334 = vst.msk [vmem:[%s155_s26] sm:$0x3] %vm333_vm2, %v332_v56 }
 0x111 PF: > { %s11_s10 = sadd.s32 1, %s671_s10   ;;  %s783_s6 = smov %s663_s8 }
 0x112   : > { %p8_p8 = scmp.ge.s32.totalorder %s11_s10, 6   ;;  %s784_s7 = smov %s667_s9 }
 0x113   : > { %s785_s8 = smov %s788_s11  ;;  %s786_s9 = smov %s792_s12 }
 0x114   :  { %10 = sbr.rel (!%p8_p8) target bundleno = 3 (0x3), region = 54 }

// kernel: non_resnet_block_nchw.4
= control target key start
LH: loop header
LB: loop body
LE: loop exit
PB: predicated region body
PF: predicated region fallthrough
CT: control target
= control target key end

     0   :  { %s2806_s27 = smov 0   ;;  %s2808_s28 = smov 0   ;;  %s3644_s0 = inlined_call_operand.vmem [shape: f32[2,16,16,8], index: 0, kind: input, shape index: {}, may-alias: {0,1,2}]   ;;  %s3645_s1 = inlined_call_operand.vmem [shape: f32[2,16,16,8], index: 1, kind: input, shape index: {}, may-alias: {0,1,2}]   ;;  %s3646_s2 = inlined_call_operand.vmem [shape: f32[2,16,16,8], index: 2, kind: input, shape index: {}, may-alias: {0,1,2}]   ;;  %s3647_s3 = inlined_call_operand.vmem [shape: f32[2,1,8], index: 3, kind: input, shape index: {}]   ;;  %s3648_s4 = inlined_call_operand.vmem [shape: f32[2,1,8], index: 4, kind: input, shape index: {}]   ;;  %s3649_s5 = inlined_call_operand.vmem [shape: bf16[3,24,16], index: 5, kind: input, shape index: {}]   ;;  %s3650_s6 = inlined_call_operand.vmem [shape: f32[1,1,16], index: 6, kind: input, shape index: {}]   ;;  %s3651_s7 = inlined_call_operand.vmem [shape: bf16[2,16,16,16], index: 7, kind: output, shape index: {0}]   ;;  %s3652_s8 = inlined_call_operand.vmem [shape: f32[2,2,2,16], index: 8, kind: output, shape index: {1}]  }
   0x1   :  { %s2810_s29 = smov 0   ;;  %s2812_s30 = smov 0  }
   0x2   :  { %s2814_s9 = smov 0  }
   0x3 LB: > { %3654 = sst [smem:[#allocation2_spill]] %s2749_s30  ;;  %s28_s10 = sadd.s32 1, %s2745_s29  ;;  %s2753_s9 = sphi %s2814_s9, %s19_s9   ;;  %s2749_s30 = sphi %s2812_s30, %s3678_s30   ;;  %s2745_s29 = sphi %s2810_s29, %s3680_s29   ;;  %s2741_s28 = sphi %s2808_s28, %s3676_s28   ;;  %s2737_s27 = sphi %s2806_s27, %s3679_s27  }
   0x4   : > { %s31_s11 = sadd.s32 1, %s2749_s30  ;;  %p29_p0 = scmp.ge.s32.totalorder %s28_s10, 2 }
   0x5   : > { %p2081_p1 = scmp.ge.s32.totalorder %s2753_s9, 1  ;;  %p369_p2 = scmp.lt.s32.totalorder %s2753_s9, 5 }
   0x6   : > { %s3682_s10 = smov (%p29_p0, %s28_s10), 0  ;;  %s3684_s11 = smov (!%p29_p0, %s31_s11), %s2749_s30 }
   0x7   : > { %3655 = sst [smem:[#allocation3_spill]] %s3682_s10  ;;  %p370_p3 = pnand %p2081_p1, %p369_p2 }
   0x8   : > { %p33_p4 = scmp.ge.s32.totalorder %s3684_s11, 2  ;;  %s2839_s12 = sshll.u32 (!%p370_p3), %s2737_s27, 3  ;;  %vm840_vm2 = vcmask (!%p370_p3), 1040384   ;;  %vm1052_vm4 = vcmask (!%p370_p3), 1045504   ;;  %vm941_vm5 = vcmask (!%p370_p3), 1046528  }
   0x9   : > { %373 = sbr.rel (%p370_p3) target bundleno = 747 (0x2eb), region = 48  ;;  %p454_p5 = scmp.lt.s32.totalorder (!%p370_p3), %s2741_s28, 1 }
   0xa   : > { %s3686_s11 = smov (%p33_p4, %s3684_s11), 0  ;;  %s2842_s13 = sadd.s32 (!%p370_p3), 4294967295, %s2839_s12 }
   0xb   : > { %3656 = sst [smem:[#allocation4_spill]] %s3686_s11  ;;  %p466_p6 = scmp.gt.s32.totalorder (!%p370_p3), %s2842_s13, 0  ;;  %v2974_v59 = vstv (!%p370_p3), %s2842_s13 }
   0xc   : > { %p2088_p7 = scmp.lt.s32.totalorder (!%p370_p3), %s2842_s13, 15  ;;  %p456_p8 = scmp.lt.s32.totalorder (!%p370_p3), %s2839_s12, 15  ;;  %vm750_vm0 = vcmp.ge.s32.totalorder (!%p370_p3), %v2974_v59, 0  ;;  %vm760_vm1 = vcmp.lt.s32.totalorder (!%p370_p3), %v2974_v59, 16 }
   0xd   : > { %s2189_s30 = sadd.s32 (!%p370_p3), 8, %s2839_s12  ;;  %vm3027_vm7 = vmand (!%p370_p3), %vm750_vm0, %vm760_vm1  ;;  %p517_p10 = scmp.lt.s32.totalorder (!%p370_p3), %s2737_s27, 1 }
   0xe   : > { %p2891_p9 = scmp.lt.s32.totalorder (!%p370_p3), %s2189_s30, 15 }
  0x10   : > { %s3688_s28 = smov (!%p454_p5, %s2741_s28), 1  ;;  %s3692_s30 = smov (!%p2891_p9, %s2189_s30), 15 }
  0x11   : > { %s2849_s14 = sshll.u32 %s3688_s28, 5  ;;  %s500_s18 = scalar_lea.vmem %s3647_s3, %s3688_s28 }
  0x12   : > { %s467_s15 = scalar_select %p466_p6, %s2842_s13, 0  ;;  %v2863_v0 = vld [vmem:[%s500_s18] ss:$0 sm:$0xff] }
  0x13   : > { %s457_s19 = scalar_select %p456_p8, %s2839_s12, 15 }
  0x14   : > { %s3690_s15 = smov (!%p2088_p7, %s467_s15), 15  ;;  %s503_s23 = scalar_lea.vmem %s3648_s4, %s3688_s28 }
  0x15   : > { %s2093_s20 = sshll.u32 %s3690_s15, 1  ;;  %s2083_s25 = sshll.u32 %s457_s19, 1  ;;  %v2872_v3 = vld [vmem:[%s503_s23] ss:$0 sm:$0xff] }
  0x16   : > { %s474_s24 = sadd.s32 %s2093_s20, %s2849_s14  ;;  %s2866_s11 = sadd.s32 %s2849_s14, %s2083_s25 }
  0x17   : > { %s2095_s26 = sshll.u32 %s474_s24, 3  ;;  %s2085_s17 = sshll.u32 %s2866_s11, 3 }
  0x18   : > { %s476_s16 = scalar_lea.vmem %s3645_s1, %s2095_s26  ;;  %s2877_s20 = scalar_lea.vmem %s3644_s0, %s2085_s17 }
  0x19   : > { %v524_v1 = vld [vmem:[%s476_s16] sm:$0xff]  ;;  %v525_v2 = vld [vmem:[%s476_s16 + $0x8] sm:$0xff]  ;;  %v528_v13 = vld [vmem:[%s2877_s20 + $0x10] sm:$0xff]  ;;  %s3694_s30 = smov (!%p2891_p9, %s3692_s30), 15  ;;  %s2755_s25 = smov 16  }
  0x1a   : > { %v552_v4 = vmul.f32 %v2863_v0, %v524_v1  ;;  %v553_v5 = vmul.f32 %v2863_v0, %v525_v2  ;;  %v526_v6 = vld [vmem:[%s2877_s20] sm:$0xff]  ;;  %v527_v7 = vld [vmem:[%s2877_s20 + $0x8] sm:$0xff]  ;;  %v529_v14 = vld [vmem:[%s2877_s20 + $0x18] sm:$0xff]  ;;  %v556_v18 = vmul.f32 %v2863_v0, %v528_v13  ;;  %s2100_s12 = sshll.u32 %s3694_s30, 1  ;;  %s2756_s26 = smov 8  }
  0x1b   : > { %v530_v8 = vld [vmem:[%s2877_s20 + $0x20] sm:$0xff]  ;;  %v554_v9 = vmul.f32 %v2863_v0, %v526_v6  ;;  %v555_v10 = vmul.f32 %v2863_v0, %v527_v7  ;;  %v531_v11 = vld [vmem:[%s2877_s20 + $0x28] sm:$0xff]  ;;  %v557_v22 = vmul.f32 %v2863_v0, %v529_v14  ;;  %v532_v29 = vld [vmem:[%s2877_s20 + $0x30] sm:$0xff]  ;;  %s491_s18 = sadd.s32 %s2100_s12, %s2849_s14  ;;  %s3696_s27 = smov (!%p517_p10, %s2737_s27), 1 }
  0x1c   : > { %v558_v12 = vmul.f32 %v2863_v0, %v530_v8  ;;  %v2896_v15 = vadd.f32 %v2872_v3, %v552_v4  ;;  %v2899_v16 = vadd.f32 %v2872_v3, %v553_v5  ;;  %v559_v17 = vmul.f32 %v2863_v0, %v531_v11  ;;  %v534_v23 = vld [vmem:[%s2877_s20 + $0x40] sm:$0xff]  ;;  %v535_v28 = vld [vmem:[%s2877_s20 + $0x48] sm:$0xff]  ;;  %v533_v33 = vld [vmem:[%s2877_s20 + $0x38] sm:$0xff]  ;;  %s2102_s19 = sshll.u32 %s491_s18, 3 }
  0x1d   : > { %v2904_v19 = vadd.f32 %v2872_v3, %v554_v9  ;;  %v2907_v20 = vadd.f32 %v2872_v3, %v555_v10  ;;  %v2924_v27 = vadd.f32 %v2872_v3, %v556_v18  ;;  %v2931_v32 = vadd.f32 %v2872_v3, %v557_v22  ;;  %v538_v34 = vld [vmem:[%s2877_s20 + $0x60] sm:$0xff]  ;;  %s493_s24 = scalar_lea.vmem %s3646_s2, %s2102_s19  ;;  %v539_v60 = vld [vmem:[%s2877_s20 + $0x68] sm:$0xff]  ;;  %v536_v4 = vld [vmem:[%s2877_s20 + $0x50] sm:$0xff] }
  0x1e   : > { %v2910_v21 = vadd.f32 %v2872_v3, %v558_v12  ;;  %v2111_v24 = vmul.f32 -1.442695, %v2896_v15  ;;  %v2112_v25 = vmul.f32 -1.442695, %v2899_v16  ;;  %v2921_v26 = vadd.f32 %v2872_v3, %v559_v17  ;;  %v542_v53 = vld [vmem:[%s493_s24] sm:$0xff]  ;;  %v543_v54 = vld [vmem:[%s493_s24 + $0x8] sm:$0xff] }
  0x1f   : > { %v2113_v30 = vmul.f32 -1.442695, %v2904_v19  ;;  %v2114_v31 = vmul.f32 -1.442695, %v2907_v20  ;;  %v562_v37 = vmul.f32 %v2863_v0, %v534_v23  ;;  %v2115_v38 = vmul.f32 -1.442695, %v2924_v27 }
  0x20   : > { %2635 = vpow2.f32 %v2111_v24  ;;  %v2117_v35 = vmul.f32 -1.442695, %v2910_v21  ;;  %v2118_v36 = vmul.f32 -1.442695, %v2921_v26  ;;  %v563_v39 = vmul.f32 %v2863_v0, %v535_v28  ;;  %v537_v9 = vld [vmem:[%s2877_s20 + $0x58] sm:$0xff]  ;;  %v540_v13 = vld [vmem:[%s2877_s20 + $0x70] sm:$0xff] }
  0x21   : > { %2637 = vpow2.f32 %v2112_v25  ;;  %v560_v40 = vmul.f32 %v2863_v0, %v532_v29  ;;  %v2945_v41 = vadd.f32 %v2872_v3, %v562_v37  ;;  %v561_v42 = vmul.f32 %v2863_v0, %v533_v33  ;;  %v541_v23 = vld [vmem:[%s2877_s20 + $0x78] sm:$0xff]  ;;  %s2106_s24 = sshll.u32 %s2866_s11, 2  ;;  %s2107_s11 = sshll.u32 %s3688_s28, 1 }
  0x22   : > { %2639 = vpow2.f32 %v2113_v30  ;;  %v566_v43 = vmul.f32 %v2863_v0, %v538_v34  ;;  %v2116_v44 = vmul.f32 -1.442695, %v2931_v32  ;;  %v2951_v45 = vadd.f32 %v2872_v3, %v563_v39 }
  0x23   : > { %2641 = vpow2.f32 %v2114_v31  ;;  %v2954_v46 = vadd.f32 %v2872_v3, %v560_v40  ;;  %v2121_v47 = vmul.f32 -1.442695, %v2945_v41  ;;  %v2958_v48 = vadd.f32 %v2872_v3, %v561_v42 }
  0x24   : > { %2643 = vpow2.f32 %v2117_v35  ;;  %v2961_v49 = vadd.f32 %v2872_v3, %v566_v43  ;;  %v2122_v50 = vmul.f32 -1.442695, %v2951_v45  ;;  %v570_v56 = vmul.f32 %v2863_v0, %v542_v53 }
  0x25   : > { %2645 = vpow2.f32 %v2118_v36  ;;  %v2119_v51 = vmul.f32 -1.442695, %v2954_v46  ;;  %v2120_v52 = vmul.f32 -1.442695, %v2958_v48  ;;  %v571_v57 = vmul.f32 %v2863_v0, %v543_v54 }
  0x26   : > { %2647 = vpow2.f32 %v2115_v38  ;;  %v2125_v55 = vmul.f32 -1.442695, %v2961_v49  ;;  %v2978_v61 = vadd.f32 %v2872_v3, %v570_v56  ;;  %v567_v8 = vmul.f32 %v2863_v0, %v539_v60 }
  0x27   : > { %2649 = vpow2.f32 %v2116_v44  ;;  %v2982_v5 = vadd.f32 %v2872_v3, %v571_v57  ;;  %v741_v12 = vadd.s32 1, %v2974_v59  ;;  %v2991_v18 = vadd.s32 3, %v2974_v59 }
  0x28   : > { %2651 = vpow2.f32 %v2121_v47  ;;  %v564_v22 = vmul.f32 %v2863_v0, %v536_v4  ;;  %v2996_v28 = vadd.s32 2, %v2974_v59  ;;  %v565_v29 = vmul.f32 %v2863_v0, %v537_v9 }
  0x29   : > { %2653 = vpow2.f32 %v2122_v50  ;;  %v3000_v33 = vadd.f32 %v2872_v3, %v567_v8  ;;  %v568_v34 = vmul.f32 %v2863_v0, %v540_v13  ;;  %v3004_v37 = vadd.s32 5, %v2974_v59 }
  0x2a   : > { %v2636_v58 = vpop.eup %2635  ;;  %2655 = vpow2.f32 %v2119_v51  ;;  %v569_v38 = vmul.f32 %v2863_v0, %v541_v23  ;;  %v3008_v42 = vadd.s32 4, %v2974_v59  ;;  %v3011_v43 = vadd.f32 %v2872_v3, %v564_v22 }
  0x2b   : > { %v2638_v62 = vpop.eup %2637  ;;  %v658_v63 = vadd.f32 1.0, %v2636_v58  ;;  %2657 = vpow2.f32 %v2120_v52  ;;  %vm751_vm3 = vcmp.ge.s32.totalorder %v741_v12, 0  ;;  %v3014_v50 = vadd.f32 %v2872_v3, %v565_v29 }
  0x2c   : > { %v2640_v1 = vpop.eup %2639  ;;  %v659_v2 = vadd.f32 1.0, %v2638_v62  ;;  %2659 = vpow2.f32 %v2125_v55  ;;  %v2126_v0 = vmul.f32 -1.442695, %v3000_v33  ;;  %v3018_v53 = vadd.f32 %v2872_v3, %v568_v34 }
  0x2d   : > { %v2642_v6 = vpop.eup %2641  ;;  %2661 = vrcp.f32 %v658_v63  ;;  %v660_v7 = vadd.f32 1.0, %v2640_v1  ;;  %vm761_vm6 = vcmp.lt.s32.totalorder %v741_v12, 16  ;;  %v3021_v56 = vadd.f32 %v2872_v3, %v569_v38  ;;  %v2629_v3 = vld [vmem:[%s3649_s5] sm:$0xff]  }
  0x2e   : > { %v2644_v10 = vpop.eup %2643  ;;  %2663 = vrcp.f32 %v659_v2  ;;  %v661_v11 = vadd.f32 1.0, %v2642_v6  ;;  %v3032_v62 = vadd.s32 7, %v2974_v59  ;;  %v2123_v63 = vmul.f32 -1.442695, %v3011_v43  ;;  %vm3044_vm9 = vmand %vm751_vm3, %vm761_vm6  ;;  %2290 = vmatprep.subr.bf16.mxu0 %v2629_v3 }
  0x2f   : > { %v2646_v14 = vpop.eup %2645  ;;  %2665 = vrcp.f32 %v660_v7  ;;  %v664_v17 = vadd.f32 1.0, %v2644_v10  ;;  %vm753_vm8 = vcmp.ge.s32.totalorder %v2991_v18, 0  ;;  %v2124_v4 = vmul.f32 -1.442695, %v3014_v50  ;;  %2291 = vmatpush3.bf16.msra.mxu0 %v2629_v3 }
  0x30   : > { %v2648_v24 = vpop.eup %2647  ;;  %2667 = vrcp.f32 %v661_v11  ;;  %v665_v25 = vadd.f32 1.0, %v2646_v14  ;;  %vm763_vm10 = vcmp.lt.s32.totalorder %v2991_v18, 16  ;;  %v3050_v9 = vmul.f32 -1.442695, %v3018_v53 }
  0x31   : > { %v2650_v30 = vpop.eup %2649  ;;  %2669 = vrcp.f32 %v664_v17  ;;  %v662_v31 = vadd.f32 1.0, %v2648_v24  ;;  %vm752_vm11 = vcmp.ge.s32.totalorder %v2996_v28, 0  ;;  %vm762_vm12 = vcmp.lt.s32.totalorder %v2996_v28, 16  ;;  %vm3076_vm13 = vmand %vm753_vm8, %vm763_vm10 }
  0x32   : > { %v2652_v35 = vpop.eup %2651  ;;  %2671 = vrcp.f32 %v665_v25  ;;  %v663_v36 = vadd.f32 1.0, %v2650_v30  ;;  %vm755_vm14 = vcmp.ge.s32.totalorder %v3004_v37, 0  ;;  %vm765_vm15 = vcmp.lt.s32.totalorder %v3004_v37, 16  ;;  %vm3135_vm3 = vmand %vm752_vm11, %vm762_vm12 }
  0x33   : > { %v2654_v39 = vpop.eup %2653  ;;  %2673 = vrcp.f32 %v662_v31  ;;  %v668_v40 = vadd.f32 1.0, %v2652_v35  ;;  %vm754_vm0 = vcmp.ge.s32.totalorder %v3008_v42, 0  ;;  %vm764_vm1 = vcmp.lt.s32.totalorder %v3008_v42, 16  ;;  %vm3181_vm6 = vmand %vm755_vm14, %vm765_vm15 }
  0x34   : > { %v2656_v44 = vpop.eup %2655  ;;  %2675 = vrcp.f32 %v663_v36  ;;  %v669_v47 = vadd.f32 1.0, %v2654_v39  ;;  %vm767_vm8 = vcmp.lt.s32.totalorder %v3032_v62, 16  ;;  %vm1258_vm11 = vcmask 1043456  }
  0x35   : > { %v2658_v51 = vpop.eup %2657  ;;  %2677 = vrcp.f32 %v668_v40  ;;  %v666_v52 = vadd.f32 1.0, %v2656_v44 }
  0x36   : > { %v2660_v54 = vpop.eup %2659  ;;  %2679 = vrcp.f32 %v669_v47  ;;  %v667_v55 = vadd.f32 1.0, %v2658_v51 }
  0x37   : > { %v2662_v57 = vpop.eup %2661  ;;  %2681 = vrcp.f32 %v666_v52  ;;  %v672_v60 = vadd.f32 1.0, %v2660_v54 }
  0x38   : > { %v2664_v1 = vpop.eup %2663  ;;  %v718_v2 = vmul.f32 %v2662_v57, %v2896_v15  ;;  %2683 = vrcp.f32 %v667_v55 }
  0x39   : > { %v2666_v6 = vpop.eup %2665  ;;  %v719_v7 = vmul.f32 %v2664_v1, %v2899_v16  ;;  %2685 = vpow2.f32 %v2126_v0  ;;  %v3058_v16 = vmul.f32 -1.442695, %v3021_v56 }
  0x3a   : > { %v2668_v15 = vpop.eup %2667  ;;  %v800_v10 = vsel %vm3027_vm7, %v718_v2, 0.0  ;;  %v720_v11 = vmul.f32 %v2666_v6, %v2904_v19  ;;  %2687 = vrcp.f32 %v672_v60 }
  0x3b   : > { %v2670_v12 = vpop.eup %2669  ;;  %v801_v13 = vsel %vm3027_vm7, %v719_v7, 0.0  ;;  %v841_v14 = vrot.slane %v800_v10, 7  ;;  %v721_v17 = vmul.f32 %v2668_v15, %v2907_v20  ;;  %2689 = vpow2.f32 %v2123_v63 }
  0x3c   : > { %v2672_v22 = vpop.eup %2671  ;;  %v842_v23 = vrot.slane %v801_v13, 7  ;;  %v802_v19 = vsel %vm3044_vm9, %v720_v11, 0.0  ;;  %v724_v24 = vmul.f32 %v2670_v12, %v2910_v21  ;;  %2691 = vpow2.f32 %v2124_v4 }
  0x3d   : > { %v2674_v25 = vpop.eup %2673  ;;  %v3067_v29 = vsel %vm840_vm2, 0.0, %v841_v14  ;;  %v803_v30 = vsel %vm3044_vm9, %v721_v17, 0.0  ;;  %v844_v31 = vrot.slane %v802_v19, 7  ;;  %v725_v34 = vmul.f32 %v2672_v22, %v2921_v26  ;;  %vm3203_vm9 = vmand %vm754_vm0, %vm764_vm1 }
  0x3e   : > { %v2676_v21 = vpop.eup %2675  ;;  %v3081_v35 = vsel %vm840_vm2, %v841_v14, %v842_v23  ;;  %v911_v36 = vsel %vm840_vm2, %v842_v23, 0.0  ;;  %v1053_v38 = vrot.slane %v3067_v29, 2  ;;  %v942_v39 = vrot.slane %v3067_v29, 1 }
  0x3f   : > { %v3086_v40 = vpop.eup %2677  ;;  %v1054_v26 = vrot.slane %v3081_v35, 2  ;;  %v1056_v44 = vrot.slane %v911_v36, 2  ;;  %v943_v18 = vrot.slane %v3081_v35, 1  ;;  %v945_v47 = vrot.slane %v911_v36, 1 }
  0x40   : > { %v3090_v51 = vpop.eup %2679  ;;  %v845_v52 = vrot.slane %v803_v30, 7  ;;  %v3093_v0 = vsel %vm840_vm2, 0.0, %v844_v31  ;;  %v806_v54 = vsel %vm3076_vm13, %v724_v24, 0.0  ;;  %v807_v55 = vsel %vm3076_vm13, %v725_v34, 0.0 }
  0x41   : > { %v3099_v57 = vpop.eup %2681  ;;  %v1055_v58 = vsel %vm1052_vm4, %v1053_v38, %v1054_v26  ;;  %v1057_v60 = vsel %vm1052_vm4, %v1054_v26, %v1056_v44  ;;  %v944_v63 = vsel %vm941_vm5, %v942_v39, %v943_v18  ;;  %v946_v3 = vsel %vm941_vm5, %v943_v18, %v945_v47 }
  0x42   : > { %v3107_v1 = vpop.eup %2683  ;;  %v2539_v2 = vpack.i.bf16 %v1057_v60, %v1055_v58  ;;  %v2529_v4 = vpack.i.bf16 %v946_v3, %v944_v63  ;;  %v3110_v6 = vsel %vm840_vm2, %v844_v31, %v845_v52  ;;  %v912_v7 = vsel %vm840_vm2, %v845_v52, 0.0 }
  0x43   : > { %v3113_v8 = vpop.eup %2685  ;;  %v1058_v15 = vrot.slane %v3093_v0, 2  ;;  %v1059_v10 = vrot.slane %v3110_v6, 2  ;;  %v1061_v11 = vrot.slane %v912_v7, 2  ;;  %v947_v12 = vrot.slane %v3093_v0, 1 }
  0x44   : > { %v3118_v13 = vpop.eup %2687  ;;  %2540 = vrot.lane.b32.xlu1 %v2539_v2, %s2755_s25  ;;  %2530 = vrot.lane.b32.xlu0 %v2529_v4, %s2756_s26  ;;  %v948_v14 = vrot.slane %v3110_v6, 1  ;;  %v950_v17 = vrot.slane %v912_v7, 1  ;;  %v850_v22 = vrot.slane %v806_v54, 7  ;;  %v851_v23 = vrot.slane %v807_v55, 7 }
  0x45   : > { %v3125_v19 = vpop.eup %2689  ;;  %v1060_v24 = vsel %vm1052_vm4, %v1058_v15, %v1059_v10  ;;  %v1062_v30 = vsel %vm1052_vm4, %v1059_v10, %v1061_v11  ;;  %v722_v31 = vmul.f32 %v2674_v25, %v2924_v27  ;;  %v723_v34 = vmul.f32 %v2676_v21, %v2931_v32  ;;  %v2631_v27 = vld [vmem:[%s3649_s5 + $0xc] sm:$0xff]  }
  0x46   : > { %v3139_v36 = vpop.eup %2691  ;;  %v2544_v38 = vpack.i.bf16 %v1062_v30, %v1060_v24  ;;  %v949_v39 = vsel %vm941_vm5, %v947_v12, %v948_v14  ;;  %v951_v26 = vsel %vm941_vm5, %v948_v14, %v950_v17  ;;  %v3144_v44 = vsel %vm840_vm2, %v850_v22, %v851_v23  ;;  %2270 = vmatprep.subr.bf16.mxu1 %v2631_v27 }
  0x47   : > { %v2534_v32 = vpack.i.bf16 %v951_v26, %v949_v39  ;;  %v3150_v28 = vsel %vm840_vm2, 0.0, %v850_v22  ;;  %v914_v25 = vsel %vm840_vm2, %v851_v23, 0.0  ;;  %v958_v21 = vrot.slane %v3144_v44, 1  ;;  %2271 = vmatpush3.bf16.msra.mxu1 %v2631_v27 }
  0x48   : > { %2545 = vrot.lane.b32.xlu1 %v2544_v38, %s2755_s25  ;;  %v957_v18 = vrot.slane %v3150_v28, 1  ;;  %v960_v47 = vrot.slane %v914_v25, 1  ;;  %v804_v52 = vsel %vm3135_vm3, %v722_v31, 0.0  ;;  %v805_v54 = vsel %vm3135_vm3, %v723_v34, 0.0 }
  0x49   : > { %2535 = vrot.lane.b32.xlu0 %v2534_v32, %s2756_s26  ;;  %v847_v55 = vrot.slane %v804_v52, 7  ;;  %v848_v58 = vrot.slane %v805_v54, 7  ;;  %v1068_v60 = vrot.slane %v3150_v28, 2  ;;  %v1069_v63 = vrot.slane %v3144_v44, 2 }
  0x4a   : > { %v959_v3 = vsel %vm941_vm5, %v957_v18, %v958_v21  ;;  %v961_v2 = vsel %vm941_vm5, %v958_v21, %v960_v47  ;;  %v1071_v4 = vrot.slane %v914_v25, 2  ;;  %v728_v7 = vmul.f32 %v3086_v40, %v2945_v41 }
  0x4b   : > { %v2554_v15 = vpack.i.bf16 %v961_v2, %v959_v3  ;;  %v3168_v10 = vsel %vm840_vm2, %v847_v55, %v848_v58  ;;  %v3171_v11 = vsel %vm840_vm2, 0.0, %v847_v55  ;;  %v913_v12 = vsel %vm840_vm2, %v848_v58, 0.0 }
  0x4c   : > { %v952_v14 = vrot.slane %v3171_v11, 1  ;;  %v953_v17 = vrot.slane %v3168_v10, 1  ;;  %v955_v22 = vrot.slane %v913_v12, 1  ;;  %v1070_v23 = vsel %vm1052_vm4, %v1068_v60, %v1069_v63 }
  0x4d   : > { %vm757_vm7 = vcmp.ge.s32.totalorder %v3032_v62, 0  ;;  %2555 = vrot.lane.b32.xlu1 %v2554_v15, %s2756_s26  ;;  %v1072_v40 = vsel %vm1052_vm4, %v1069_v63, %v1071_v4  ;;  %v1063_v24 = vrot.slane %v3171_v11, 2  ;;  %v1064_v30 = vrot.slane %v3168_v10, 2 }
  0x4e   : > { %v1066_v31 = vrot.slane %v913_v12, 2  ;;  %v954_v34 = vsel %vm941_vm5, %v952_v14, %v953_v17  ;;  %v956_v37 = vsel %vm941_vm5, %v953_v17, %v955_v22  ;;  %v2564_v20 = vpack.i.bf16 %v1072_v40, %v1070_v23  ;;  %v2630_v14 = vld [vmem:[%s3649_s5 + $0x8] ss:$0 sps:$4 sm:$0xff]   ;;  %vm3254_vm10 = vmand %vm757_vm7, %vm767_vm8 }
  0x4f   : > { %v729_v38 = vmul.f32 %v3090_v51, %v2951_v45  ;;  %v2549_v39 = vpack.i.bf16 %v956_v37, %v954_v34  ;;  %v1065_v26 = vsel %vm1052_vm4, %v1063_v24, %v1064_v30  ;;  %v810_v32 = vsel %vm3181_vm6, %v728_v7, 0.0  ;;  %v2633_v24 = vld [vmem:[%s3649_s5 + $0x14] ss:$0 sps:$4 sm:$0xff]   ;;  %2481 = vmatprep.subr.msk.bf16.mxu0 %vm1258_vm11, %v2630_v14 }
  0x50   : > { %v1067_v27 = vsel %vm1052_vm4, %v1064_v30, %v1066_v31  ;;  %v856_v51 = vrot.slane %v810_v32, 7  ;;  %v726_v18 = vmul.f32 %v3099_v57, %v2954_v46  ;;  %v727_v42 = vmul.f32 %v3107_v1, %v2958_v48  ;;  %2480 = vmatprep.subr.msk.bf16.mxu1 %vm1258_vm11, %v2633_v24 }
  0x51   : > { %v2559_v21 = vpack.i.bf16 %v1067_v27, %v1065_v26  ;;  %v811_v45 = vsel %vm3181_vm6, %v729_v38, 0.0  ;;  %2550 = vrot.lane.b32.xlu0 %v2549_v39, %s2756_s26  ;;  %2565 = vrot.lane.b32.xlu1 %v2564_v20, %s2755_s25  ;;  %v673_v52 = vadd.f32 1.0, %v3113_v8  ;;  %v732_v54 = vmul.f32 %v3118_v13, %v2961_v49 }
  0x52   : > { %v857_v47 = vrot.slane %v811_v45, 7  ;;  %v3219_v55 = vsel %vm840_vm2, 0.0, %v856_v51  ;;  %v808_v58 = vsel %vm3203_vm9, %v726_v18, 0.0  ;;  %v670_v46 = vadd.f32 1.0, %v3125_v19 }
  0x53   : > { %v671_v57 = vadd.f32 1.0, %v3139_v36  ;;  %v967_v1 = vrot.slane %v3219_v55, 1  ;;  %v809_v49 = vsel %vm3203_vm9, %v727_v42, 0.0  ;;  %v853_v63 = vrot.slane %v808_v58, 7 }
  0x54   : > { %v3226_v60 = vsel %vm840_vm2, %v856_v51, %v857_v47  ;;  %v916_v48 = vsel %vm840_vm2, %v857_v47, 0.0  ;;  %v854_v3 = vrot.slane %v809_v49, 7  ;;  %v1078_v19 = vrot.slane %v3219_v55, 2  ;;  %v3277_v51 = vld [vmem:[%s3649_s5 + $0x18] sm:$0xff]  }
  0x55   : > { %v968_v8 = vrot.slane %v3226_v60, 1  ;;  %v970_v13 = vrot.slane %v916_v48, 1  ;;  %2560 = vrot.lane.b32.xlu0 %v2559_v21, %s2755_s25  ;;  %v1079_v36 = vrot.slane %v3226_v60, 2  ;;  %v1081_v2 = vrot.slane %v916_v48, 2 }
  0x56   : > { %2693 = vrcp.f32 %v673_v52  ;;  %v3239_v15 = vsel %vm840_vm2, %v853_v63, %v854_v3  ;;  %v3242_v12 = vsel %vm840_vm2, 0.0, %v853_v63  ;;  %v915_v22 = vsel %vm840_vm2, %v854_v3, 0.0 }
  0x57   : > { %v969_v4 = vsel %vm941_vm5, %v967_v1, %v968_v8  ;;  %v971_v7 = vsel %vm941_vm5, %v968_v8, %v970_v13  ;;  %v962_v23 = vrot.slane %v3242_v12, 1  ;;  %v963_v41 = vrot.slane %v3239_v15, 1 }
  0x58   : > { %v2574_v17 = vpack.i.bf16 %v971_v7, %v969_v4  ;;  %v965_v30 = vrot.slane %v915_v22, 1  ;;  %v1080_v31 = vsel %vm1052_vm4, %v1078_v19, %v1079_v36  ;;  %v1082_v34 = vsel %vm1052_vm4, %v1079_v36, %v1081_v2 }
  0x59   : > { %v1073_v37 = vrot.slane %v3242_v12, 2  ;;  %v964_v20 = vsel %vm941_vm5, %v962_v23, %v963_v41  ;;  %v2584_v62 = vpack.i.bf16 %v1082_v34, %v1080_v31  ;;  %v1074_v38 = vrot.slane %v3239_v15, 2 }
  0x5a   : > { %2575 = vrot.lane.b32.xlu1 %v2574_v17, %s2756_s26  ;;  %v1076_v39 = vrot.slane %v915_v22, 2  ;;  %v966_v26 = vsel %vm941_vm5, %v963_v41, %v965_v30  ;;  %v814_v27 = vsel %vm3254_vm10, %v732_v54, 0.0  ;;  %2695 = vrcp.f32 %v670_v46 }
  0x5b   : > { %v2569_v32 = vpack.i.bf16 %v966_v26, %v964_v20  ;;  %v1075_v25 = vsel %vm1052_vm4, %v1073_v37, %v1074_v38  ;;  %v2129_v45 = vmul.f32 -1.442695, %v2978_v61  ;;  %2697 = vrcp.f32 %v671_v57 }
  0x5c   : > { %v1077_v21 = vsel %vm1052_vm4, %v1074_v38, %v1076_v39  ;;  %v2130_v18 = vmul.f32 -1.442695, %v2982_v5  ;;  %v1372_v47 = vsel %vm1258_vm11, %v2630_v14, 0  ;;  %v862_v52 = vrot.slane %v814_v27, 7 }
  0x5d   : > { %2570 = vrot.lane.b32.xlu0 %v2569_v32, %s2756_s26  ;;  %v2579_v42 = vpack.i.bf16 %v1077_v21, %v1075_v25  ;;  %v746_v54 = vadd.s32 6, %v2974_v59  ;;  %2699 = vpow2.f32 %v3050_v9  ;;  %2293 = vmatpush3.bf16.msra.mxu0 %v1372_v47  ;;  %v1260_v58 = vsel %vm1258_vm11, %v2633_v24, 0 }
  0x5e   : > { %2585 = vrot.lane.b32.xlu1 %v2584_v62, %s2755_s25  ;;  %2701 = vpow2.f32 %v3058_v16  ;;  %2310 = vmatprep.subr.bf16.mxu0 %v3277_v51  ;;  %v3292_v48 = vsel %vm840_vm2, 0.0, %v862_v52  ;;  %vm1163_vm8 = vcmask 64512   ;;  %vm1184_vm9 = vcmask 130048  }
  0x5f   : > { %2703 = vpow2.f32 %v2129_v45  ;;  %2273 = vmatpush3.bf16.msra.mxu1 %v1260_v58  ;;  %vm756_vm12 = vcmp.ge.s32.totalorder %v746_v54, 0  ;;  %vm766_vm13 = vcmp.lt.s32.totalorder %v746_v54, 16  ;;  %v977_v49 = vrot.slane %v3292_v48, 1 }
  0x60   : > { %v2694_v46 = vpop.eup %2693  ;;  %2705 = vpow2.f32 %v2130_v18  ;;  %vm3297_vm14 = vmand %vm756_vm12, %vm766_vm13  ;;  %v748_v58 = vadd.s32 8, %v2974_v59 }
  0x61   : > { %v733_v57 = vmul.f32 %v2694_v46, %v3000_v33  ;;  %2580 = vrot.lane.b32.xlu0 %v2579_v42, %s2755_s25  ;;  %v1088_v33 = vrot.slane %v3292_v48, 2 }
  0x62   : > { %vm758_vm15 = vcmp.ge.s32.totalorder %v748_v58, 0  ;;  %vm768_vm0 = vcmp.lt.s32.totalorder %v748_v58, 16 }
  0x63   : > { %v815_v9 = vsel %vm3254_vm10, %v733_v57, 0.0  ;;  %vm778_vm1 = vmand %vm758_vm15, %vm768_vm0  ;;  %vm1686_vm10 = vcmask 125952  }
  0x64   : > { %v863_v16 = vrot.slane %v815_v9, 7  ;;  %v2696_v1 = vpop.eup %2695 }
  0x65   : > { %v730_v3 = vmul.f32 %v2696_v1, %v3011_v43  ;;  %v2698_v19 = vpop.eup %2697 }
  0x66   : > { %v3303_v13 = vsel %vm840_vm2, %v862_v52, %v863_v16  ;;  %v918_v63 = vsel %vm840_vm2, %v863_v16, 0.0  ;;  %v731_v17 = vmul.f32 %v2698_v19, %v3014_v50 }
  0x67   : > { %v978_v36 = vrot.slane %v3303_v13, 1  ;;  %v980_v2 = vrot.slane %v918_v63, 1  ;;  %v1089_v4 = vrot.slane %v3303_v13, 2  ;;  %v1091_v7 = vrot.slane %v918_v63, 2  ;;  %v2700_v14 = vpop.eup %2699 }
  0x68   : > { %v812_v22 = vsel %vm3297_vm14, %v730_v3, 0.0  ;;  %v2702_v23 = vpop.eup %2701  ;;  %v813_v34 = vsel %vm3297_vm14, %v731_v17, 0.0  ;;  %v674_v20 = vadd.f32 1.0, %v2700_v14 }
  0x69   : > { %v979_v41 = vsel %vm941_vm5, %v977_v49, %v978_v36  ;;  %v981_v40 = vsel %vm941_vm5, %v978_v36, %v980_v2  ;;  %v859_v24 = vrot.slane %v812_v22, 7  ;;  %v1090_v43 = vsel %vm1052_vm4, %v1088_v33, %v1089_v4  ;;  %v2704_v30 = vpop.eup %2703 }
  0x6a   : > { %v2594_v31 = vpack.i.bf16 %v981_v40, %v979_v41  ;;  %v1092_v37 = vsel %vm1052_vm4, %v1089_v4, %v1091_v7  ;;  %v2706_v50 = vpop.eup %2705  ;;  %v860_v62 = vrot.slane %v813_v34, 7  ;;  %v675_v26 = vadd.f32 1.0, %v2702_v23 }
  0x6b   : > { %v3319_v38 = vsel %vm840_vm2, 0.0, %v859_v24  ;;  %v2604_v39 = vpack.i.bf16 %v1092_v37, %v1090_v43  ;;  %2707 = vrcp.f32 %v674_v20  ;;  %v676_v25 = vadd.f32 1.0, %v2704_v30 }
  0x6c   : > { %2595 = vrot.lane.b32.xlu1 %v2594_v31, %s2756_s26  ;;  %v972_v27 = vrot.slane %v3319_v38, 1  ;;  %v1083_v32 = vrot.slane %v3319_v38, 2  ;;  %v3325_v21 = vsel %vm840_vm2, %v859_v24, %v860_v62  ;;  %v917_v45 = vsel %vm840_vm2, %v860_v62, 0.0 }
  0x6d   : > { %2709 = vrcp.f32 %v675_v26  ;;  %v677_v18 = vadd.f32 1.0, %v2706_v50  ;;  %v973_v47 = vrot.slane %v3325_v21, 1  ;;  %v975_v42 = vrot.slane %v917_v45, 1 }
  0x6e   : > { %v1084_v52 = vrot.slane %v3325_v21, 2  ;;  %v1086_v54 = vrot.slane %v917_v45, 2  ;;  %2711 = vrcp.f32 %v676_v25  ;;  %v749_v49 = vadd.s32 9, %v2974_v59 }
  0x6f   : > { %v974_v46 = vsel %vm941_vm5, %v972_v27, %v973_v47  ;;  %v976_v57 = vsel %vm941_vm5, %v973_v47, %v975_v42  ;;  %2713 = vrcp.f32 %v677_v18 }
  0x70   : > { %2605 = vrot.lane.b32.xlu1 %v2604_v39, %s2755_s25  ;;  %v1085_v9 = vsel %vm1052_vm4, %v1083_v32, %v1084_v52  ;;  %v1087_v16 = vsel %vm1052_vm4, %v1084_v52, %v1086_v54  ;;  %v2589_v1 = vpack.i.bf16 %v976_v57, %v974_v46  ;;  %vm759_vm3 = vcmp.ge.s32.totalorder %v749_v49, 0 }
  0x71   : > { %v2599_v8 = vpack.i.bf16 %v1087_v16, %v1085_v9  ;;  %vm769_vm6 = vcmp.lt.s32.totalorder %v749_v49, 16 }
  0x72   : > { %2590 = vrot.lane.b32.xlu0 %v2589_v1, %s2756_s26  ;;  %vm3341_vm7 = vmand %vm759_vm3, %vm769_vm6 }
  0x75   : > { %v2708_v33 = vpop.eup %2707 }
  0x76   : > { %2600 = vrot.lane.b32.xlu0 %v2599_v8, %s2755_s25  ;;  %v734_v3 = vmul.f32 %v2708_v33, %v3018_v53 }
  0x77   : > { %v2710_v63 = vpop.eup %2709 }
  0x78   : > { %v735_v19 = vmul.f32 %v2710_v63, %v3021_v56  ;;  %v2712_v36 = vpop.eup %2711  ;;  %v816_v2 = vsel %vm778_vm1, %v734_v3, 0.0 }
  0x79   : > { %v865_v7 = vrot.slane %v816_v2, 7  ;;  %v736_v14 = vmul.f32 %v2712_v36, %v2978_v61  ;;  %v2714_v17 = vpop.eup %2713 }
  0x7a   : > { %v817_v4 = vsel %vm778_vm1, %v735_v19, 0.0  ;;  %v737_v41 = vmul.f32 %v2714_v17, %v2982_v5 }
  0x7b   : > { %v866_v22 = vrot.slane %v817_v4, 7  ;;  %v3347_v23 = vsel %vm840_vm2, 0.0, %v865_v7  ;;  %v818_v53 = vsel %vm3341_vm7, %v736_v14, 0.0 }
  0x7c   : > { %v982_v24 = vrot.slane %v3347_v23, 1  ;;  %v868_v43 = vrot.slane %v818_v53, 7  ;;  %v819_v31 = vsel %vm3341_vm7, %v737_v41, 0.0  ;;  %v1093_v34 = vrot.slane %v3347_v23, 2 }
  0x7d   : > { %v3353_v56 = vsel %vm840_vm2, %v865_v7, %v866_v22  ;;  %v919_v40 = vsel %vm840_vm2, %v866_v22, 0.0  ;;  %v869_v5 = vrot.slane %v819_v31, 7 }
  0x7e   : > { %v983_v61 = vrot.slane %v3353_v56, 1  ;;  %v985_v30 = vrot.slane %v919_v40, 1  ;;  %v3362_v37 = vsel %vm840_vm2, 0.0, %v868_v43  ;;  %v1094_v20 = vrot.slane %v3353_v56, 2 }
  0x7f   : > { %v1096_v50 = vrot.slane %v919_v40, 2  ;;  %v987_v26 = vrot.slane %v3362_v37, 1  ;;  %v1098_v27 = vrot.slane %v3362_v37, 2  ;;  %v3370_v25 = vsel %vm840_vm2, %v868_v43, %v869_v5 }
  0x80   : > { %v984_v62 = vsel %vm941_vm5, %v982_v24, %v983_v61  ;;  %v986_v39 = vsel %vm941_vm5, %v983_v61, %v985_v30  ;;  %v920_v45 = vsel %vm840_vm2, %v869_v5, 0.0  ;;  %v1095_v18 = vsel %vm1052_vm4, %v1093_v34, %v1094_v20  ;;  %v2634_v5 = vld [vmem:[%s3649_s5 + $0x20] ss:$0 sps:$4 sm:$0xff]  }
  0x81   : > { %v2609_v32 = vpack.i.bf16 %v986_v39, %v984_v62  ;;  %v988_v47 = vrot.slane %v3370_v25, 1  ;;  %v990_v42 = vrot.slane %v920_v45, 1  ;;  %v1097_v52 = vsel %vm1052_vm4, %v1094_v20, %v1096_v50 }
  0x82   : > { %v1099_v54 = vrot.slane %v3370_v25, 2  ;;  %v2619_v58 = vpack.i.bf16 %v1097_v52, %v1095_v18  ;;  %v1101_v46 = vrot.slane %v920_v45, 2 }
  0x83   : > { %2610 = vrot.lane.b32.xlu0 %v2609_v32, %s2756_s26  ;;  %v989_v57 = vsel %vm941_vm5, %v987_v26, %v988_v47  ;;  %v991_v9 = vsel %vm941_vm5, %v988_v47, %v990_v42  ;;  %v1484_v26 = vsel %vm1258_vm11, %v2634_v5, 0  ;;  %vm2758_vm5 = vmmov 0  }
  0x84   : > { %v1100_v16 = vsel %vm1052_vm4, %v1098_v27, %v1099_v54  ;;  %v2614_v1 = vpack.i.bf16 %v991_v9, %v989_v57  ;;  %v1102_v49 = vsel %vm1052_vm4, %v1099_v54, %v1101_v46  ;;  %vm1233_vm4 = vcmask 195584  }
  0x85   : > { %v2624_v8 = vpack.i.bf16 %v1102_v49, %v1100_v16 }
  0x86   : > { %2615 = vrot.lane.b32.xlu1 %v2614_v1, %s2756_s26  ;;  %s520_s26 = sadd.s32 %s2107_s11, %s3696_s27 }
  0x87   : > { %2620 = vrot.lane.b32.xlu0 %v2619_v58, %s2755_s25  ;;  %s2108_s16 = sshll.u32 %s520_s26, 1 }
  0x88   : > { %s522_s21 = scalar_lea.vmem %s3652_s8, %s2108_s16 }
  0x8a   : > { %2625 = vrot.lane.b32.xlu1 %v2624_v8, %s2755_s25  ;;  %s3501_s25 = scalar_lea.vmem %s3651_s7, %s2106_s24 }
  0xb6   : > { %v2541_v33 = vpop.permute.xlu1 %2540  ;;  %v2531_v63 = vpop.permute.xlu0 %2530 }
  0xb7   : > { %v2543_v3 = vunpack.i.h.bf16 %v2541_v33  ;;  %v2542_v19 = vunpack.i.l.bf16 %v2541_v33  ;;  %v2533_v36 = vunpack.i.h.bf16 %v2531_v63  ;;  %v2532_v2 = vunpack.i.l.bf16 %v2531_v63 }
  0xb9   : > { %v1164_v59 = vsel %vm1163_vm8, %v3067_v29, %v2532_v2  ;;  %v1165_v4 = vsel %vm1163_vm8, %v3081_v35, %v2533_v36 }
  0xba   : > { %v2546_v7 = vpop.permute.xlu1 %2545  ;;  %v1185_v14 = vsel %vm1184_vm9, %v1164_v59, %v2542_v19  ;;  %v1186_v17 = vsel %vm1184_vm9, %v1165_v4, %v2543_v3 }
  0xbb   : > { %v2548_v22 = vunpack.i.h.bf16 %v2546_v7  ;;  %v2547_v41 = vunpack.i.l.bf16 %v2546_v7  ;;  %v2536_v53 = vpop.permute.xlu0 %2535  ;;  %v1205_v40 = vpack.c.bf16 %v1186_v17, %v1185_v14 }
  0xbc   : > { %v2538_v24 = vunpack.i.h.bf16 %v2536_v53  ;;  %v2537_v43 = vunpack.i.l.bf16 %v2536_v53 }
  0xbd   : > { %2294 = vmatprep.mubr.msk.bf16.mxu0 %vm1233_vm4, %v1205_v40 }
  0xbe   : > { %v1166_v29 = vsel %vm1163_vm8, %v3093_v0, %v2537_v43  ;;  %v1167_v35 = vsel %vm1163_vm8, %v3110_v6, %v2538_v24 }
  0xbf   : > { %v2556_v61 = vpop.permute.xlu1 %2555  ;;  %v1187_v30 = vsel %vm1184_vm9, %v1166_v29, %v2547_v41  ;;  %v1188_v31 = vsel %vm1184_vm9, %v1167_v35, %v2548_v22 }
  0xc0   : > { %v1206_v34 = vpack.c.bf16 %v1188_v31, %v1187_v30  ;;  %v2558_v20 = vunpack.i.h.bf16 %v2556_v61  ;;  %v2557_v50 = vunpack.i.l.bf16 %v2556_v61 }
  0xc2   : > { %2274 = vmatprep.mubr.msk.bf16.mxu1 %vm1233_vm4, %v1206_v34  ;;  %2295 = vmatmul.mubr.msk.bf16.vlgmr.msra.gmra.mrb[0].mxu0 %vm1233_vm4, %v1206_v34  ;;  %v1171_v45 = vsel %vm1163_vm8, %v3144_v44, %v2558_v20  ;;  %v1170_v18 = vsel %vm1163_vm8, %v3150_v28, %v2557_v50 }
  0xc3   : > { %v2551_v0 = vpop.permute.xlu0 %2550  ;;  %2311 = vmatpush3.bf16.msra.mxu0 %v3277_v51  ;;  %v2566_v6 = vpop.permute.xlu1 %2565 }
  0xc4   : > { %v2568_v62 = vunpack.i.h.bf16 %v2566_v6  ;;  %v2567_v39 = vunpack.i.l.bf16 %v2566_v6  ;;  %2482 = vmatprep.subr.msk.bf16.mxu0 %vm1258_vm11, %v2634_v5  ;;  %v2553_v27 = vunpack.i.h.bf16 %v2551_v0  ;;  %v2552_v32 = vunpack.i.l.bf16 %v2551_v0 }
  0xc5   : > { %vm1863_vm11 = vcmask 123904  }
  0xc6   : > { %v1191_v47 = vsel %vm1184_vm9, %v1170_v18, %v2567_v39  ;;  %v1192_v42 = vsel %vm1184_vm9, %v1171_v45, %v2568_v62  ;;  %v1169_v58 = vsel %vm1163_vm8, %v3168_v10, %v2553_v27  ;;  %v1168_v46 = vsel %vm1163_vm8, %v3171_v11, %v2552_v32 }
  0xc7   : > { %v2561_v51 = vpop.permute.xlu0 %2560  ;;  %2313 = vmatpush3.bf16.msra.mxu0 %v1484_v26  ;;  %v3416_v57 = vpack.c.bf16 %v1192_v42, %v1191_v47 }
  0xc8   : > { %v2563_v52 = vunpack.i.h.bf16 %v2561_v51  ;;  %v2562_v54 = vunpack.i.l.bf16 %v2561_v51 }
  0xca   : > { %v1189_v44 = vsel %vm1184_vm9, %v1168_v46, %v2562_v54  ;;  %v1190_v28 = vsel %vm1184_vm9, %v1169_v58, %v2563_v52 }
  0xcb   : > { %v1207_v9 = vpack.c.bf16 %v1190_v28, %v1189_v44 }
  0xcc   : > { %v2576_v16 = vpop.permute.xlu1 %2575 }
  0xcd   : > { %2275 = vmatmul.mubr.msk.bf16.vlgmr.msra.gmra.mrb[0].mxu1 %vm1233_vm4, %v1207_v9  ;;  %2298 = vmatprep.mubr.msk.bf16.mxu0 %vm1233_vm4, %v1207_v9  ;;  %v2578_v1 = vunpack.i.h.bf16 %v2576_v16  ;;  %v2577_v49 = vunpack.i.l.bf16 %v2576_v16 }
  0xce   : > { %2278 = vmatprep.mubr.msk.bf16.mxu1 %vm1233_vm4, %v3416_v57  ;;  %2299 = vmatmul.mubr.msk.bf16.gmra.mrb[4].mxu0 %vm1233_vm4, %v3416_v57 }
  0xcf   : > { %v2571_v10 = vpop.permute.xlu0 %2570  ;;  %v1175_v19 = vsel %vm1163_vm8, %v3226_v60, %v2578_v1  ;;  %v1174_v36 = vsel %vm1163_vm8, %v3219_v55, %v2577_v49 }
  0xd0   : > { %v2586_v11 = vpop.permute.xlu1 %2585  ;;  %v2573_v63 = vunpack.i.h.bf16 %v2571_v10  ;;  %v2572_v3 = vunpack.i.l.bf16 %v2571_v10 }
  0xd1   : > { %v2588_v8 = vunpack.i.h.bf16 %v2586_v11  ;;  %v2587_v33 = vunpack.i.l.bf16 %v2586_v11  ;;  %v2757_v11 = vmov 0.0|0.0  }
  0xd2   : > { %v1173_v17 = vsel %vm1163_vm8, %v3239_v15, %v2573_v63  ;;  %v1172_v22 = vsel %vm1163_vm8, %v3242_v12, %v2572_v3  ;;  %2400 = vmatprep.subr.bf16.mxu1 %v2757_v11 }
  0xd3   : > { %v1195_v2 = vsel %vm1184_vm9, %v1174_v36, %v2587_v33  ;;  %v1196_v59 = vsel %vm1184_vm9, %v1175_v19, %v2588_v8  ;;  %v2581_v4 = vpop.permute.xlu0 %2580  ;;  %v2759_v8 = vmov 0.0  }
  0xd4   : > { %v2583_v7 = vunpack.i.h.bf16 %v2581_v4  ;;  %v2582_v14 = vunpack.i.l.bf16 %v2581_v4  ;;  %v1210_v41 = vpack.c.bf16 %v1196_v59, %v1195_v2 }
  0xd6   : > { %v1193_v53 = vsel %vm1184_vm9, %v1172_v22, %v2582_v14  ;;  %v1194_v60 = vsel %vm1184_vm9, %v1173_v17, %v2583_v7  ;;  %v3494_v22 = vld [vmem:[%s3650_s6] ss:$0 sm:$0xff] }
  0xd7   : > { %v1209_v40 = vpack.c.bf16 %v1194_v60, %v1193_v53 }
  0xd9   : > { %2279 = vmatmul.mubr.msk.bf16.gmra.mrb[4].mxu1 %vm1233_vm4, %v1209_v40  ;;  %2302 = vmatprep.mubr.msk.bf16.mxu0 %vm1233_vm4, %v1209_v40 }
  0xda   : > { %2282 = vmatprep.mubr.msk.bf16.mxu1 %vm1233_vm4, %v1210_v41  ;;  %2303 = vmatmul.mubr.msk.bf16.gmra.mrb[8].mxu0 %vm1233_vm4, %v1210_v41 }
  0xde   : > { %v2596_v55 = vpop.permute.xlu1 %2595 }
  0xdf   : > { %v2598_v15 = vunpack.i.h.bf16 %v2596_v55  ;;  %v2597_v43 = vunpack.i.l.bf16 %v2596_v55 }
  0xe1   : > { %v1179_v31 = vsel %vm1163_vm8, %v3303_v13, %v2598_v15  ;;  %v1178_v34 = vsel %vm1163_vm8, %v3292_v48, %v2597_v43 }
  0xe2   : > { %v2606_v24 = vpop.permute.xlu1 %2605 }
  0xe3   : > { %v2608_v12 = vunpack.i.h.bf16 %v2606_v24  ;;  %v2607_v35 = vunpack.i.l.bf16 %v2606_v24 }
  0xe4   : > { %v2591_v29 = vpop.permute.xlu0 %2590 }
  0xe5   : > { %v2593_v61 = vunpack.i.h.bf16 %v2591_v29  ;;  %v2592_v30 = vunpack.i.l.bf16 %v2591_v29  ;;  %v1199_v5 = vsel %vm1184_vm9, %v1178_v34, %v2607_v35  ;;  %v1200_v20 = vsel %vm1184_vm9, %v1179_v31, %v2608_v12 }
  0xe6   : > { %v1212_v26 = vpack.c.bf16 %v1200_v20, %v1199_v5 }
  0xe7   : > { %v1177_v62 = vsel %vm1163_vm8, %v3325_v21, %v2593_v61  ;;  %v1176_v39 = vsel %vm1163_vm8, %v3319_v38, %v2592_v30 }
  0xe8   : > { %v2601_v50 = vpop.permute.xlu0 %2600 }
  0xe9   : > { %v2603_v0 = vunpack.i.h.bf16 %v2601_v50  ;;  %v2602_v6 = vunpack.i.l.bf16 %v2601_v50 }
  0xeb   : > { %v1197_v27 = vsel %vm1184_vm9, %v1176_v39, %v2602_v6  ;;  %v1198_v13 = vsel %vm1184_vm9, %v1177_v62, %v2603_v0 }
  0xec   : > { %v1211_v32 = vpack.c.bf16 %v1198_v13, %v1197_v27 }
  0xee   : > { %2283 = vmatmul.mubr.msk.bf16.gmra.mrb[8].mxu1 %vm1233_vm4, %v1211_v32  ;;  %2306 = vmatprep.mubr.msk.bf16.mxu0 %vm1233_vm4, %v1211_v32 }
  0xef   : > { %2286 = vmatprep.mubr.msk.bf16.mxu1 %vm1233_vm4, %v1212_v26  ;;  %2307 = vmatmul.mubr.msk.bf16.gmra.mrb[12].mxu0 %vm1233_vm4, %v1212_v26 }
  0xf0   : > { %2314 = vmatprep.mubr.msk.bf16.mxu0 %vm1233_vm4, %v1207_v9 }
  0xf5   : > { %v2611_v48 = vpop.permute.xlu0 %2610 }
  0xf6   : > { %v2613_v21 = vunpack.i.h.bf16 %v2611_v48  ;;  %v2612_v45 = vunpack.i.l.bf16 %v2611_v48 }
  0xf7   : > { %2315 = vmatmul.mubr.msk.bf16.vlgmr.msra.gmra.mrb[0].mxu0 %vm1233_vm4, %v3416_v57 }
  0xf8   : > { %2318 = vmatprep.mubr.msk.bf16.mxu0 %vm1233_vm4, %v1209_v40  ;;  %v1181_v38 = vsel %vm1163_vm8, %v3353_v56, %v2613_v21  ;;  %v1180_v18 = vsel %vm1163_vm8, %v3347_v23, %v2612_v45  ;;  %v2616_v46 = vpop.permute.xlu1 %2615 }
  0xf9   : > { %v2621_v47 = vpop.permute.xlu0 %2620  ;;  %v2618_v57 = vunpack.i.h.bf16 %v2616_v46  ;;  %v2617_v56 = vunpack.i.l.bf16 %v2616_v46 }
  0xfa   : > { %v2623_v42 = vunpack.i.h.bf16 %v2621_v47  ;;  %v2622_v51 = vunpack.i.l.bf16 %v2621_v47 }
  0xfb   : > { %v1183_v9 = vsel %vm1163_vm8, %v3370_v25, %v2618_v57  ;;  %v1182_v16 = vsel %vm1163_vm8, %v3362_v37, %v2617_v56 }
  0xfc   : > { %v1201_v52 = vsel %vm1184_vm9, %v1180_v18, %v2622_v51  ;;  %v1202_v54 = vsel %vm1184_vm9, %v1181_v38, %v2623_v42  ;;  %v2626_v44 = vpop.permute.xlu1 %2625 }
  0xfd   : > { %v1213_v58 = vpack.c.bf16 %v1202_v54, %v1201_v52  ;;  %v2628_v28 = vunpack.i.h.bf16 %v2626_v44  ;;  %v2627_v23 = vunpack.i.l.bf16 %v2626_v44 }
  0xff   : > { %2287 = vmatmul.mubr.msk.bf16.gmra.mrb[12].mxu1 %vm1233_vm4, %v1213_v58  ;;  %2319 = vmatmul.mubr.msk.bf16.gmra.mrb[4].mxu0 %vm1233_vm4, %v1210_v41  ;;  %v1203_v1 = vsel %vm1184_vm9, %v1182_v16, %v2627_v23  ;;  %v1204_v49 = vsel %vm1184_vm9, %v1183_v9, %v2628_v28 }
 0x100   : > { %2322 = vmatprep.mubr.msk.bf16.mxu0 %vm1233_vm4, %v1211_v32  ;;  %v1214_v10 = vpack.c.bf16 %v1204_v49, %v1203_v1  ;;  %2362 = vmatprep.mubr.msk.f32.mxu1 %vm2758_vm5, %v2759_v8 }
 0x107   : > { %2323 = vmatmul.mubr.msk.bf16.gmra.mrb[8].mxu0 %vm1233_vm4, %v1212_v26 }
 0x108   : > { %2326 = vmatprep.mubr.msk.bf16.mxu0 %vm1233_vm4, %v1213_v58 }
 0x10f   : > { %2327 = vmatmul.mubr.msk.bf16.gmra.mrb[12].mxu0 %vm1233_vm4, %v1214_v10 }
 0x1a0   : > { %v2276_v37 = vpop.f32.mrb[0].mxu1 }
 0x1a1   : > { %v1296_v25 = vpop.f32.mrb[1].mxu1 }
 0x1a2   : > { %v2277_v33 = vpop.f32.mrb[2].mxu1 }
 0x1a3   : > { %v1299_v63 = vpop.f32.mrb[3].mxu1 }
 0x1ac   : > { %v2280_v3 = vpop.f32.mrb[4].mxu1 }
 0x1ad   : > { %v1312_v19 = vpop.f32.mrb[5].mxu1 }
 0x1ae   : > { %v2281_v36 = vpop.f32.mrb[6].mxu1 }
 0x1af   : > { %v1315_v2 = vpop.f32.mrb[7].mxu1 }
 0x1c1   : > { %v3483_v59 = vpop.f32.mrb[8].mxu1 }
 0x1c2   : > { %v3485_v4 = vpop.f32.mrb[9].mxu1 }
 0x1c3   : > { %v3487_v7 = vpop.f32.mrb[10].mxu1 }
 0x1c4   : > { %v3489_v14 = vpop.f32.mrb[11].mxu1 }
 0x1ca   : > { %v2316_v17 = vpop.f32.mrb[0].mxu0 }
 0x1cb   : > { %v2448_v41 = vadd.f32 %v2316_v17, %v2276_v37  ;;  %v1520_v53 = vpop.f32.mrb[1].mxu0 }
 0x1cc   : > { %v2449_v60 = vadd.f32 %v1520_v53, %v1296_v25  ;;  %v2317_v40 = vpop.f32.mrb[2].mxu0 }
 0x1cd   : > { %v1608_v55 = vadd.f32 %v2448_v41, %v3494_v22  ;;  %v2450_v24 = vadd.f32 %v2317_v40, %v2277_v33  ;;  %v1523_v15 = vpop.f32.mrb[3].mxu0 }
 0x1ce   : > { %v1606_v43 = vadd.f32 %v2449_v60, %v3494_v22  ;;  %v2451_v29 = vadd.f32 %v1523_v15, %v1299_v63 }
 0x1cf   : > { %v2192_v12 = vpack.c.bf16 %v1608_v55, %v1608_v55  ;;  %v1609_v35 = vadd.f32 %v2450_v24, %v3494_v22  ;;  %v3508_v31 = vmul.f32 %v1608_v55, %v1608_v55 }
 0x1d0   : > { %v2190_v61 = vpack.c.bf16 %v1606_v43, %v1606_v43  ;;  %v1607_v30 = vadd.f32 %v2451_v29, %v3494_v22  ;;  %v3516_v0 = vmul.f32 %v1606_v43, %v1606_v43 }
 0x1d1   : > { %1689 = vst.msk [vmem:[%s3501_s25 + $0x8] sm:$0xf] %vm1686_vm10, %v2192_v12  ;;  %v2193_v34 = vpack.c.bf16 %v1609_v35, %v1609_v35  ;;  %v2404_v5 = vpack.c.bf16 %v1609_v35, %v1608_v55  ;;  %v3510_v20 = vmul.f32 %v1609_v35, %v1609_v35 }
 0x1d2   : > { %v3512_v50 = vpop.f32.mrb[12].mxu1  ;;  %1687 = vst.msk [vmem:[%s3501_s25] sm:$0xf] %vm1686_vm10, %v2190_v61  ;;  %v2191_v6 = vpack.c.bf16 %v1607_v30, %v1607_v30  ;;  %v2401_v62 = vpack.c.bf16 %v1607_v30, %v1606_v43  ;;  %v3518_v39 = vmul.f32 %v1607_v30, %v1607_v30  ;;  %v2320_v26 = vpop.f32.mrb[4].mxu0 }
 0x1d3   : > { %v3520_v27 = vpop.f32.mrb[13].mxu1  ;;  %1690 = vst.msk [vmem:[%s3501_s25 + $0xc] sm:$0xf] %vm1686_vm10, %v2193_v34  ;;  %v2452_v13 = vadd.f32 %v2320_v26, %v2280_v3  ;;  %v1536_v32 = vpop.f32.mrb[5].mxu0  ;;  %v2428_v21 = vpack.c.bf16 %v3510_v20, %v3508_v31 }
 0x1d4   : > { %v3524_v48 = vpop.f32.mrb[14].mxu1  ;;  %1688 = vst.msk [vmem:[%s3501_s25 + $0x4] sm:$0xf] %vm1686_vm10, %v2191_v6  ;;  %v2453_v45 = vadd.f32 %v1536_v32, %v1312_v19  ;;  %v2321_v38 = vpop.f32.mrb[6].mxu0  ;;  %2402 = vmatpush3.bf16.msra.mxu1 %v2401_v62  ;;  %v2425_v47 = vpack.c.bf16 %v3518_v39, %v3516_v0 }
 0x1d5   : > { %v3530_v18 = vpop.f32.mrb[15].mxu1  ;;  %v1612_v42 = vadd.f32 %v2452_v13, %v3494_v22  ;;  %v2454_v51 = vadd.f32 %v2321_v38, %v2281_v36  ;;  %v1539_v52 = vpop.f32.mrb[7].mxu0  ;;  %2403 = vmatprep.subr.bf16.mxu1 %v2757_v11 }
 0x1d6   : > { %v1610_v54 = vadd.f32 %v2453_v45, %v3494_v22  ;;  %v2455_v58 = vadd.f32 %v1539_v52, %v1315_v2 }
 0x1d7   : > { %v2196_v46 = vpack.c.bf16 %v1612_v42, %v1612_v42  ;;  %v1613_v57 = vadd.f32 %v2454_v51, %v3494_v22  ;;  %v3541_v28 = vmul.f32 %v1612_v42, %v1612_v42 }
 0x1d8   : > { %v2194_v56 = vpack.c.bf16 %v1610_v54, %v1610_v54  ;;  %v1611_v44 = vadd.f32 %v2455_v58, %v3494_v22  ;;  %2405 = vmatpush3.bf16.msra.mxu1 %v2404_v5  ;;  %v3548_v1 = vmul.f32 %v1610_v54, %v1610_v54 }
 0x1d9   : > { %1693 = vst.msk [vmem:[%s3501_s25 + $0x18] sm:$0xf] %vm1686_vm10, %v2196_v46  ;;  %v2197_v23 = vpack.c.bf16 %v1613_v57, %v1613_v57  ;;  %v2410_v9 = vpack.c.bf16 %v1613_v57, %v1612_v42  ;;  %v3543_v16 = vmul.f32 %v1613_v57, %v1613_v57  ;;  %2406 = vmatprep.subr.bf16.mxu1 %v2757_v11 }
 0x1da   : > { %1691 = vst.msk [vmem:[%s3501_s25 + $0x10] sm:$0xf] %vm1686_vm10, %v2194_v56  ;;  %v2195_v49 = vpack.c.bf16 %v1611_v44, %v1611_v44  ;;  %v2407_v10 = vpack.c.bf16 %v1611_v44, %v1610_v54  ;;  %v3550_v37 = vmul.f32 %v1611_v44, %v1611_v44  ;;  %v2324_v25 = vpop.f32.mrb[8].mxu0 }
 0x1db   : > { %1694 = vst.msk [vmem:[%s3501_s25 + $0x1c] sm:$0xf] %vm1686_vm10, %v2197_v23  ;;  %v2456_v33 = vadd.f32 %v2324_v25, %v3483_v59  ;;  %v1552_v63 = vpop.f32.mrb[9].mxu0  ;;  %v2434_v3 = vpack.c.bf16 %v3543_v16, %v3541_v28 }
 0x1dc   : > { %1692 = vst.msk [vmem:[%s3501_s25 + $0x14] sm:$0xf] %vm1686_vm10, %v2195_v49  ;;  %v2457_v19 = vadd.f32 %v1552_v63, %v3485_v4  ;;  %v2325_v36 = vpop.f32.mrb[10].mxu0  ;;  %2408 = vmatpush3.bf16.msra.mxu1 %v2407_v10  ;;  %v2431_v2 = vpack.c.bf16 %v3550_v37, %v3548_v1  ;;  %v2760_v49 = vmov 1.0  }
 0x1dd   : > { %v1616_v17 = vadd.f32 %v2456_v33, %v3494_v22  ;;  %v2458_v41 = vadd.f32 %v2325_v36, %v3487_v7  ;;  %v1555_v59 = vpop.f32.mrb[11].mxu0  ;;  %2409 = vmatprep.subr.bf16.mxu1 %v2757_v11 }
 0x1de   : > { %v1614_v53 = vadd.f32 %v2457_v19, %v3494_v22  ;;  %v2459_v60 = vadd.f32 %v1555_v59, %v3489_v14 }
 0x1df   : > { %v2200_v40 = vpack.c.bf16 %v1616_v17, %v1616_v17  ;;  %v1617_v4 = vadd.f32 %v2458_v41, %v3494_v22  ;;  %v3571_v7 = vmul.f32 %v1616_v17, %v1616_v17 }
 0x1e0   : > { %v2198_v55 = vpack.c.bf16 %v1614_v53, %v1614_v53  ;;  %v1615_v24 = vadd.f32 %v2459_v60, %v3494_v22  ;;  %2411 = vmatpush3.bf16.msra.mxu1 %v2410_v9  ;;  %v1781_v14 = vmul.f32 %v1614_v53, %v1614_v53 }
 0x1e1   : > { %1697 = vst.msk [vmem:[%s3501_s25 + $0x28] sm:$0xf] %vm1686_vm10, %v2200_v40  ;;  %v2201_v15 = vpack.c.bf16 %v1617_v4, %v1617_v4  ;;  %v2416_v43 = vpack.c.bf16 %v1617_v4, %v1616_v17  ;;  %v1784_v29 = vmul.f32 %v1617_v4, %v1617_v4  ;;  %2412 = vmatprep.subr.bf16.mxu1 %v2757_v11 }
 0x1e2   : > { %1695 = vst.msk [vmem:[%s3501_s25 + $0x20] sm:$0xf] %vm1686_vm10, %v2198_v55  ;;  %v2199_v12 = vpack.c.bf16 %v1615_v24, %v1615_v24  ;;  %v2413_v35 = vpack.c.bf16 %v1615_v24, %v1614_v53  ;;  %v1782_v61 = vmul.f32 %v1615_v24, %v1615_v24  ;;  %v2328_v30 = vpop.f32.mrb[12].mxu0 }
 0x1e3   : > { %1698 = vst.msk [vmem:[%s3501_s25 + $0x2c] sm:$0xf] %vm1686_vm10, %v2201_v15  ;;  %v2460_v34 = vadd.f32 %v2328_v30, %v3512_v50  ;;  %v1568_v5 = vpop.f32.mrb[13].mxu0  ;;  %v2440_v6 = vpack.c.bf16 %v1784_v29, %v3571_v7 }
 0x1e4   : > { %1696 = vst.msk [vmem:[%s3501_s25 + $0x24] sm:$0xf] %vm1686_vm10, %v2199_v12  ;;  %v2461_v62 = vadd.f32 %v1568_v5, %v3520_v27  ;;  %v2329_v26 = vpop.f32.mrb[14].mxu0  ;;  %2414 = vmatpush3.bf16.msra.mxu1 %v2413_v35  ;;  %v2437_v13 = vpack.c.bf16 %v1782_v61, %v1781_v14 }
 0x1e5   : > { %v1620_v32 = vadd.f32 %v2460_v34, %v3494_v22  ;;  %v2462_v45 = vadd.f32 %v2329_v26, %v3524_v48  ;;  %v1571_v38 = vpop.f32.mrb[15].mxu0  ;;  %2415 = vmatprep.subr.bf16.mxu1 %v2757_v11 }
 0x1e6   : > { %v1618_v50 = vadd.f32 %v2461_v62, %v3494_v22  ;;  %v2463_v42 = vadd.f32 %v1571_v38, %v3530_v18 }
 0x1e7   : > { %v2204_v51 = vpack.c.bf16 %v1620_v32, %v1620_v32  ;;  %v1621_v52 = vadd.f32 %v2462_v45, %v3494_v22  ;;  %v1787_v48 = vmul.f32 %v1620_v32, %v1620_v32 }
 0x1e8   : > { %v2202_v27 = vpack.c.bf16 %v1618_v50, %v1618_v50  ;;  %v1619_v54 = vadd.f32 %v2463_v42, %v3494_v22  ;;  %2417 = vmatpush3.bf16.msra.mxu1 %v2416_v43  ;;  %v1785_v18 = vmul.f32 %v1618_v50, %v1618_v50 }
 0x1e9   : > { %1701 = vst.msk [vmem:[%s3501_s25 + $0x38] sm:$0xf] %vm1686_vm10, %v2204_v51  ;;  %v2205_v58 = vpack.c.bf16 %v1621_v52, %v1621_v52  ;;  %v2422_v46 = vpack.c.bf16 %v1621_v52, %v1620_v32  ;;  %v1788_v57 = vmul.f32 %v1621_v52, %v1621_v52  ;;  %2418 = vmatprep.subr.bf16.mxu1 %v2757_v11 }
 0x1ea   : > { %1699 = vst.msk [vmem:[%s3501_s25 + $0x30] sm:$0xf] %vm1686_vm10, %v2202_v27  ;;  %v2203_v56 = vpack.c.bf16 %v1619_v54, %v1619_v54  ;;  %v2419_v44 = vpack.c.bf16 %v1619_v54, %v1618_v50  ;;  %v1786_v23 = vmul.f32 %v1619_v54, %v1619_v54 }
 0x1eb   : > { %1702 = vst.msk [vmem:[%s3501_s25 + $0x3c] sm:$0xf] %vm1686_vm10, %v2205_v58  ;;  %v2446_v9 = vpack.c.bf16 %v1788_v57, %v1787_v48 }
 0x1ec   : > { %1700 = vst.msk [vmem:[%s3501_s25 + $0x34] sm:$0xf] %vm1686_vm10, %v2203_v56  ;;  %2420 = vmatpush3.bf16.msra.mxu1 %v2419_v44  ;;  %v2443_v22 = vpack.c.bf16 %v1786_v23, %v1785_v18 }
 0x1ed   : > { %2421 = vmatprep.subr.bf16.mxu1 %v2757_v11 }
 0x1f0   : > { %2423 = vmatpush3.bf16.msra.mxu1 %v2422_v46 }
 0x1f1   : > { %2424 = vmatprep.subr.bf16.mxu1 %v2757_v11 }
 0x1f3   : > { %2363 = vmatmul.mubr.f32.vlgmr.msra.gmra.mrb[16].mxu1 %v2760_v49 }
 0x1f4   : > { %2426 = vmatpush3.bf16.msra.mxu1 %v2425_v47  ;;  %2397 = vmatprep.mubr.msk.f32.mxu1 %vm2758_vm5, %v2759_v8 }
 0x1f5   : > { %2427 = vmatprep.subr.bf16.mxu1 %v2757_v11 }
 0x1f8   : > { %2429 = vmatpush3.bf16.msra.mxu1 %v2428_v21 }
 0x1f9   : > { %2430 = vmatprep.subr.bf16.mxu1 %v2757_v11 }
 0x1fc   : > { %2432 = vmatpush3.bf16.msra.mxu1 %v2431_v2 }
 0x1fd   : > { %2433 = vmatprep.subr.bf16.mxu1 %v2757_v11 }
 0x200   : > { %2435 = vmatpush3.bf16.msra.mxu1 %v2434_v3 }
 0x201   : > { %2436 = vmatprep.subr.bf16.mxu1 %v2757_v11 }
 0x204   : > { %2438 = vmatpush3.bf16.msra.mxu1 %v2437_v13 }
 0x205   : > { %2439 = vmatprep.subr.bf16.mxu1 %v2757_v11 }
 0x208   : > { %2441 = vmatpush3.bf16.msra.mxu1 %v2440_v6 }
 0x209   : > { %2442 = vmatprep.subr.bf16.mxu1 %v2757_v11 }
 0x20c   : > { %2444 = vmatpush3.bf16.msra.mxu1 %v2443_v22 }
 0x20d   : > { %2445 = vmatprep.subr.bf16.mxu1 %v2757_v11 }
 0x210   : > { %2447 = vmatpush3.bf16.msra.mxu1 %v2446_v9 }
 0x213   : > { %2398 = vmatmul.mubr.f32.vlgmr.msra.gmra.mrb[18].mxu1 %v2760_v49 }
 0x2c6   : > { %v1769_v8 = vpop.f32.mrb[16].mxu1 }
 0x2c7   : > { %v2364_v31 = vpop.f32.mrb[17].mxu1 }
 0x2e6   : > { %v1855_v20 = vpop.f32.mrb[18].mxu1 }
 0x2e7   : > { %v1860_v0 = vrot.slane %v1855_v20, 7  ;;  %v2399_v39 = vpop.f32.mrb[19].mxu1 }
 0x2e9   : > { %v1862_v21 = vsel %vm840_vm2, %v1769_v8, %v1860_v0 }
 0x2ea   : > { %1864 = vst.msk [vmem:[%s522_s21] sm:$0x3] %vm1863_vm11, %v1862_v21 }
 0x2eb PF: > { %s19_s9 = sadd.s32 1, %s2753_s9   ;;  %s3676_s28 = sld [smem:[#allocation2_spill]] }
 0x2ec   : > { %p16_p11 = scmp.ge.s32.totalorder %s19_s9, 6   ;;  %s3677_s20 = sld [smem:[#allocation3_spill]] }
 0x2ed   : > { %s3678_s30 = sld [smem:[#allocation4_spill]]  ;;  %s3679_s27 = smov %s2745_s29 }
 0x2ee   :  { %18 = sbr.rel (!%p16_p11) target bundleno = 3 (0x3), region = 102 }
 0x2f2   : > { %s3680_s29 = smov %s3677_s20 }

// kernel: non_resnet_block_nchw.5
= control target key start
LH: loop header
LB: loop body
LE: loop exit
PB: predicated region body
PF: predicated region fallthrough
CT: control target
= control target key end

     0   :  { %s2396_s24 = smov 0   ;;  %s2398_s25 = smov 0   ;;  %s3186_s0 = inlined_call_operand.vmem [shape: bf16[2,16,16,16], index: 0, kind: input, shape index: {}, may-alias: {0,1,2}]   ;;  %s3187_s1 = inlined_call_operand.vmem [shape: bf16[2,16,16,16], index: 1, kind: input, shape index: {}, may-alias: {0,1,2}]   ;;  %s3188_s2 = inlined_call_operand.vmem [shape: bf16[2,16,16,16], index: 2, kind: input, shape index: {}, may-alias: {0,1,2}]   ;;  %s3189_s3 = inlined_call_operand.vmem [shape: f32[2,1,16], index: 3, kind: input, shape index: {}]   ;;  %s3190_s4 = inlined_call_operand.vmem [shape: f32[2,1,16], index: 4, kind: input, shape index: {}]   ;;  %s3191_s5 = inlined_call_operand.vmem [shape: bf16[3,48,16], index: 5, kind: input, shape index: {}]   ;;  %s3192_s6 = inlined_call_operand.vmem [shape: f32[1,1,16], index: 6, kind: input, shape index: {}]   ;;  %s3193_s7 = inlined_call_operand.vmem [shape: f32[2,16,16,16], index: 7, kind: output, shape index: {}]  }
   0x1   :  { %s2400_s26 = smov 0   ;;  %s2402_s27 = smov 0  }
   0x2   :  { %s2404_s28 = smov 0  }
   0x3 LB: > { %s26_s29 = sadd.s32 1, %s2344_s26  ;;  %s29_s30 = sadd.s32 1, %s2348_s27  ;;  %s2352_s28 = sphi %s2404_s28, %s17_s28   ;;  %s2348_s27 = sphi %s2402_s27, %s3218_s27   ;;  %s2344_s26 = sphi %s2400_s26, %s3217_s26   ;;  %s2340_s25 = sphi %s2398_s25, %s3216_s25   ;;  %s2336_s24 = sphi %s2396_s24, %s3215_s24  }
   0x4   : > { %p27_p0 = scmp.ge.s32.totalorder %s26_s29, 2  ;;  %p1805_p1 = scmp.ge.s32.totalorder %s2352_s28, 1 }
   0x5   : > { %p339_p2 = scmp.lt.s32.totalorder %s2352_s28, 5 }
   0x6   : > { %s3220_s29 = smov (%p27_p0, %s26_s29), 0  ;;  %s3222_s30 = smov (!%p27_p0, %s29_s30), %s2348_s27 }
   0x7   : > { %p340_p3 = pnand %p1805_p1, %p339_p2  ;;  %p31_p4 = scmp.ge.s32.totalorder %s3222_s30, 2 }
   0x8   : > { %s2426_s8 = sshll.u32 (!%p340_p3), %s2336_s24, 3  ;;  %p414_p5 = scmp.lt.s32.totalorder (!%p340_p3), %s2340_s25, 1  ;;  %vm812_vm3 = vcmask (!%p340_p3), 1040384   ;;  %vm913_vm4 = vcmask (!%p340_p3), 1046528   ;;  %vm1024_vm12 = vcmask (!%p340_p3), 1045504  }
   0x9   : > { %s3224_s30 = smov (%p31_p4, %s3222_s30), 0  ;;  %343 = sbr.rel (%p340_p3) target bundleno = 490 (0x1ea), region = 48 }
   0xa   : > { %p416_p6 = scmp.lt.s32.totalorder (!%p340_p3), %s2426_s8, 15  ;;  %s2439_s16 = sadd.s32 (!%p340_p3), 4294967295, %s2426_s8 }
   0xb   : > { %p426_p7 = scmp.gt.s32.totalorder (!%p340_p3), %s2439_s16, 0  ;;  %p1812_p8 = scmp.lt.s32.totalorder (!%p340_p3), %s2439_s16, 15  ;;  %v2542_v56 = vstv (!%p340_p3), %s2439_s16 }
   0xc   : > { %s1898_s24 = sadd.s32 (!%p340_p3), 8, %s2426_s8  ;;  %vm722_vm6 = vcmp.ge.s32.totalorder (!%p340_p3), %v2542_v56, 0  ;;  %vm732_vm7 = vcmp.lt.s32.totalorder (!%p340_p3), %v2542_v56, 16  ;;  %s2354_s13 = smov (!%p340_p3), 16  }
   0xd   : > { %p2466_p9 = scmp.lt.s32.totalorder (!%p340_p3), %s1898_s24, 15  ;;  %vm2701_vm15 = vmand (!%p340_p3), %vm722_vm6, %vm732_vm7 }
  0x10   : > { %s3226_s25 = smov (!%p414_p5, %s2340_s25), 1  ;;  %s3230_s24 = smov (!%p2466_p9, %s1898_s24), 15 }
  0x11   : > { %s417_s9 = scalar_select %p416_p6, %s2426_s8, 15 }
  0x12   : > { %s2430_s10 = sshll.u32 %s3226_s25, 5  ;;  %s460_s14 = scalar_lea.vmem %s3189_s3, %s3226_s25 }
  0x13   : > { %s1807_s11 = sshll.u32 %s417_s9, 1  ;;  %s463_s23 = scalar_lea.vmem %s3190_s4, %s3226_s25  ;;  %v2450_v0 = vld [vmem:[%s460_s14] ss:$0 sm:$0xff] }
  0x14   : > { %s2436_s15 = sadd.s32 %s2430_s10, %s1807_s11  ;;  %v2459_v9 = vld [vmem:[%s463_s23] ss:$0 sm:$0xff]  ;;  %s3232_s24 = smov (!%p2466_p9, %s3230_s24), 15 }
  0x15   : > { %s1809_s17 = sshll.u32 %s2436_s15, 2  ;;  %s1824_s18 = sshll.u32 %s3232_s24, 1 }
  0x16   : > { %s2445_s20 = scalar_lea.vmem %s3186_s0, %s1809_s17  ;;  %s451_s19 = sadd.s32 %s1824_s18, %s2430_s10 }
  0x17   : > { %v1939_v1 = vld [vmem:[%s2445_s20 + $0x8] sm:$0xff]   ;;  %v1904_v2 = vld [vmem:[%s2445_s20] sm:$0xff]   ;;  %v1941_v3 = vld [vmem:[%s2445_s20 + $0x18] sm:$0xff]   ;;  %s427_s9 = scalar_select %p426_p7, %s2439_s16, 0 }
  0x18   : > { %v1909_v4 = vunpack.c.l.bf16 %v1939_v1  ;;  %v1910_v5 = vunpack.c.h.bf16 %v1939_v1  ;;  %v1905_v6 = vunpack.c.l.bf16 %v1904_v2  ;;  %v1906_v7 = vunpack.c.h.bf16 %v1904_v2  ;;  %v1940_v8 = vld [vmem:[%s2445_s20 + $0x10] sm:$0xff]   ;;  %v1943_v22 = vld [vmem:[%s2445_s20 + $0x28] sm:$0xff]   ;;  %v2490_v27 = vld [vmem:[%s2445_s20 + $0x20] sm:$0xff]   ;;  %s1826_s21 = sshll.u32 %s451_s19, 2  ;;  %s2355_s16 = smov 32  }
  0x19   : > { %v1917_v10 = vunpack.c.l.bf16 %v1941_v3  ;;  %v1918_v11 = vunpack.c.h.bf16 %v1941_v3  ;;  %v1913_v12 = vunpack.c.l.bf16 %v1940_v8  ;;  %v1914_v13 = vunpack.c.h.bf16 %v1940_v8  ;;  %s3228_s9 = smov (!%p1812_p8, %s427_s9), 15  ;;  %v1945_v60 = vld [vmem:[%s2445_s20 + $0x38] sm:$0xff]   ;;  %v1944_v3 = vld [vmem:[%s2445_s20 + $0x30] sm:$0xff]   ;;  %s453_s22 = scalar_lea.vmem %s3188_s2, %s1826_s21 }
  0x1a   : > { %v528_v14 = vmul.f32 %v1909_v4, %v2450_v0  ;;  %v529_v15 = vmul.f32 %v1910_v5, %v2450_v0  ;;  %v526_v16 = vmul.f32 %v1905_v6, %v2450_v0  ;;  %v527_v17 = vmul.f32 %v1906_v7, %v2450_v0  ;;  %s1817_s8 = sshll.u32 %s3228_s9, 1  ;;  %s1830_s9 = sshll.u32 %s2436_s15, 3 }
  0x1b   : > { %v532_v18 = vmul.f32 %v1917_v10, %v2450_v0  ;;  %v533_v19 = vmul.f32 %v1918_v11, %v2450_v0  ;;  %v530_v20 = vmul.f32 %v1913_v12, %v2450_v0  ;;  %v531_v21 = vmul.f32 %v1914_v13, %v2450_v0  ;;  %s434_s11 = sadd.s32 %s1817_s8, %s2430_s10 }
  0x1c   : > { %v2478_v23 = vadd.f32 %v2459_v9, %v528_v14  ;;  %v2481_v24 = vadd.f32 %v2459_v9, %v529_v15  ;;  %v2484_v25 = vadd.f32 %v2459_v9, %v526_v16  ;;  %v2487_v26 = vadd.f32 %v2459_v9, %v527_v17  ;;  %s1819_s12 = sshll.u32 %s434_s11, 2  ;;  %v1936_v17 = vld [vmem:[%s453_s22] sm:$0xff]  }
  0x1d   : > { %v2497_v28 = vadd.f32 %v2459_v9, %v532_v18  ;;  %v2500_v29 = vadd.f32 %v2459_v9, %v533_v19  ;;  %v2503_v30 = vadd.f32 %v2459_v9, %v530_v20  ;;  %v1925_v34 = vunpack.c.l.bf16 %v1943_v22  ;;  %s436_s17 = scalar_lea.vmem %s3187_s1, %s1819_s12 }
  0x1e   : > { %v1837_v31 = vmul.f32 -1.442695, %v2478_v23  ;;  %v1838_v32 = vmul.f32 -1.442695, %v2481_v24  ;;  %v1835_v33 = vmul.f32 -1.442695, %v2484_v25  ;;  %v2511_v36 = vadd.f32 %v2459_v9, %v531_v21 }
  0x1f   : > { %v1836_v35 = vmul.f32 -1.442695, %v2487_v26  ;;  %v1926_v37 = vunpack.c.h.bf16 %v1943_v22  ;;  %v1921_v38 = vunpack.c.l.bf16 %v2490_v27  ;;  %v1841_v39 = vmul.f32 -1.442695, %v2497_v28  ;;  %v1900_v42 = vld [vmem:[%s436_s17] sm:$0xff]  }
  0x20   : > { %2234 = vpow2.f32 %v1837_v31  ;;  %v1842_v40 = vmul.f32 -1.442695, %v2500_v29  ;;  %v1839_v41 = vmul.f32 -1.442695, %v2503_v30  ;;  %v536_v43 = vmul.f32 %v1925_v34, %v2450_v0 }
  0x21   : > { %2236 = vpow2.f32 %v1838_v32  ;;  %v537_v44 = vmul.f32 %v1926_v37, %v2450_v0  ;;  %v1901_v45 = vunpack.c.l.bf16 %v1900_v42  ;;  %v1902_v46 = vunpack.c.h.bf16 %v1900_v42 }
  0x22   : > { %2238 = vpow2.f32 %v1835_v33  ;;  %v534_v47 = vmul.f32 %v1921_v38, %v2450_v0  ;;  %v1840_v48 = vmul.f32 -1.442695, %v2511_v36  ;;  %v2528_v49 = vadd.f32 %v2459_v9, %v536_v43 }
  0x23   : > { %2240 = vpow2.f32 %v1836_v35  ;;  %v2531_v50 = vadd.f32 %v2459_v9, %v537_v44  ;;  %v524_v51 = vmul.f32 %v1901_v45, %v2450_v0  ;;  %v525_v52 = vmul.f32 %v1902_v46, %v2450_v0 }
  0x24   : > { %2242 = vpow2.f32 %v1841_v39  ;;  %v2536_v53 = vadd.f32 %v2459_v9, %v534_v47  ;;  %v1845_v54 = vmul.f32 -1.442695, %v2528_v49  ;;  %v1922_v59 = vunpack.c.h.bf16 %v2490_v27 }
  0x25   : > { %2244 = vpow2.f32 %v1842_v40  ;;  %v1846_v55 = vmul.f32 -1.442695, %v2531_v50  ;;  %v2545_v57 = vadd.f32 %v2459_v9, %v524_v51  ;;  %v2548_v58 = vadd.f32 %v2459_v9, %v525_v52 }
  0x26   : > { %2246 = vpow2.f32 %v1839_v41  ;;  %v1843_v63 = vmul.f32 -1.442695, %v2536_v53  ;;  %v2556_v1 = vadd.s32 2, %v2542_v56  ;;  %v2559_v2 = vadd.s32 1, %v2542_v56 }
  0x27   : > { %2248 = vpow2.f32 %v1840_v48  ;;  %v1833_v61 = vmul.f32 -1.442695, %v2545_v57  ;;  %v1834_v62 = vmul.f32 -1.442695, %v2548_v58  ;;  %v2566_v5 = vadd.s32 4, %v2542_v56 }
  0x28   : > { %2250 = vpow2.f32 %v1845_v54  ;;  %v2569_v6 = vadd.s32 3, %v2542_v56  ;;  %v1933_v7 = vunpack.c.l.bf16 %v1945_v60  ;;  %v2572_v11 = vadd.s32 6, %v2542_v56 }
  0x29   : > { %2252 = vpow2.f32 %v1846_v55  ;;  %v535_v12 = vmul.f32 %v1922_v59, %v2450_v0  ;;  %v1934_v15 = vunpack.c.h.bf16 %v1945_v60  ;;  %v1929_v16 = vunpack.c.l.bf16 %v1944_v3 }
  0x2a   : > { %v2235_v4 = vpop.eup %2234  ;;  %2254 = vpow2.f32 %v1833_v61  ;;  %vm724_vm0 = vcmp.ge.s32.totalorder %v2556_v1, 0  ;;  %vm734_vm1 = vcmp.lt.s32.totalorder %v2556_v1, 16  ;;  %vm723_vm2 = vcmp.ge.s32.totalorder %v2559_v2, 0 }
  0x2b   : > { %v2237_v8 = vpop.eup %2236  ;;  %v634_v10 = vadd.f32 1.0, %v2235_v4  ;;  %2256 = vpow2.f32 %v1834_v62  ;;  %v540_v22 = vmul.f32 %v1933_v7, %v2450_v0  ;;  %v1930_v27 = vunpack.c.h.bf16 %v1944_v3  ;;  %vm2613_vm8 = vmand %vm724_vm0, %vm734_vm1 }
  0x2c   : > { %v2239_v13 = vpop.eup %2238  ;;  %v635_v14 = vadd.f32 1.0, %v2237_v8  ;;  %2258 = vpow2.f32 %v1843_v63  ;;  %v2580_v33 = vadd.f32 %v2459_v9, %v535_v12  ;;  %v1937_v34 = vunpack.c.l.bf16 %v1936_v17 }
  0x2d   : > { %v2241_v18 = vpop.eup %2240  ;;  %2260 = vrcp.f32 %v634_v10  ;;  %v632_v19 = vadd.f32 1.0, %v2239_v13  ;;  %v541_v38 = vmul.f32 %v1934_v15, %v2450_v0  ;;  %v538_v39 = vmul.f32 %v1929_v16, %v2450_v0 }
  0x2e   : > { %v2243_v20 = vpop.eup %2242  ;;  %2262 = vrcp.f32 %v635_v14  ;;  %v633_v21 = vadd.f32 1.0, %v2241_v18  ;;  %v1938_v42 = vunpack.c.h.bf16 %v1936_v17  ;;  %v542_v43 = vmul.f32 %v1937_v34, %v2450_v0 }
  0x2f   : > { %v2245_v31 = vpop.eup %2244  ;;  %2264 = vrcp.f32 %v632_v19  ;;  %v638_v32 = vadd.f32 1.0, %v2243_v20  ;;  %v2586_v46 = vadd.f32 %v2459_v9, %v540_v22  ;;  %v539_v47 = vmul.f32 %v1930_v27, %v2450_v0  ;;  %v2225_v20 = vld [vmem:[%s3191_s5 + $0x18] sm:$0xff]  }
  0x30   : > { %v2247_v35 = vpop.eup %2246  ;;  %2266 = vrcp.f32 %v633_v21  ;;  %v639_v37 = vadd.f32 1.0, %v2245_v31  ;;  %v543_v52 = vmul.f32 %v1938_v42, %v2450_v0  ;;  %v2591_v54 = vadd.f32 %v2459_v9, %v542_v43  ;;  %1979 = vmatprep.subr.bf16.mxu1 %v2225_v20 }
  0x31   : > { %v2249_v40 = vpop.eup %2248  ;;  %2268 = vrcp.f32 %v638_v32  ;;  %v636_v41 = vadd.f32 1.0, %v2247_v35  ;;  %v1844_v60 = vmul.f32 -1.442695, %v2580_v33  ;;  %v2595_v61 = vadd.f32 %v2459_v9, %v541_v38  ;;  %1980 = vmatpush3.bf16.msra.mxu1 %v2225_v20 }
  0x32   : > { %v2251_v44 = vpop.eup %2250  ;;  %2270 = vrcp.f32 %v639_v37  ;;  %v637_v45 = vadd.f32 1.0, %v2249_v40  ;;  %v2598_v3 = vadd.f32 %v2459_v9, %v538_v39  ;;  %v2601_v4 = vadd.f32 %v2459_v9, %v543_v52 }
  0x33   : > { %v2253_v48 = vpop.eup %2252  ;;  %2272 = vrcp.f32 %v636_v41  ;;  %v642_v51 = vadd.f32 1.0, %v2251_v44  ;;  %vm733_vm5 = vcmp.lt.s32.totalorder %v2559_v2, 16  ;;  %v2607_v8 = vadd.f32 %v2459_v9, %v539_v47 }
  0x34   : > { %v2255_v55 = vpop.eup %2254  ;;  %2274 = vrcp.f32 %v637_v45  ;;  %v643_v59 = vadd.f32 1.0, %v2253_v48  ;;  %v2618_v14 = vadd.s32 5, %v2542_v56  ;;  %v1849_v15 = vmul.f32 -1.442695, %v2586_v46  ;;  %vm2629_vm10 = vmand %vm723_vm2, %vm733_vm5 }
  0x35   : > { %v2257_v62 = vpop.eup %2256  ;;  %v630_v63 = vadd.f32 1.0, %v2255_v55  ;;  %2276 = vrcp.f32 %v642_v51  ;;  %vm726_vm9 = vcmp.ge.s32.totalorder %v2566_v5, 0  ;;  %v1850_v17 = vmul.f32 -1.442695, %v2595_v61 }
  0x36   : > { %v2259_v0 = vpop.eup %2258  ;;  %v631_v7 = vadd.f32 1.0, %v2257_v62  ;;  %2278 = vrcp.f32 %v643_v59  ;;  %vm736_vm11 = vcmp.lt.s32.totalorder %v2566_v5, 16  ;;  %v2649_v27 = vmul.f32 -1.442695, %v2607_v8 }
  0x37   : > { %v2261_v10 = vpop.eup %2260  ;;  %2280 = vrcp.f32 %v630_v63  ;;  %v640_v13 = vadd.f32 1.0, %v2259_v0  ;;  %vm725_vm13 = vcmp.ge.s32.totalorder %v2569_v6, 0  ;;  %vm735_vm14 = vcmp.lt.s32.totalorder %v2569_v6, 16  ;;  %vm2725_vm0 = vmand %vm726_vm9, %vm736_vm11 }
  0x38   : > { %v2263_v16 = vpop.eup %2262  ;;  %v694_v9 = vmul.f32 %v2261_v10, %v2478_v23  ;;  %2282 = vrcp.f32 %v631_v7  ;;  %v2635_v23 = vmul.f32 -1.442695, %v2598_v3  ;;  %vm728_vm1 = vcmp.ge.s32.totalorder %v2572_v11, 0  ;;  %vm2792_vm5 = vmand %vm725_vm13, %vm735_vm14 }
  0x39   : > { %v2265_v1 = vpop.eup %2264  ;;  %v695_v18 = vmul.f32 %v2263_v16, %v2481_v24  ;;  %2284 = vpow2.f32 %v1844_v60  ;;  %v2643_v24 = vld [vmem:[%s3191_s5] sm:$0xff]   ;;  %vm738_vm2 = vcmp.lt.s32.totalorder %v2572_v11, 16  ;;  %vm727_vm6 = vcmp.ge.s32.totalorder %v2618_v14, 0 }
  0x3a   : > { %v2267_v2 = vpop.eup %2266  ;;  %v776_v21 = vsel %vm2613_vm8, %v694_v9, 0.0  ;;  %v692_v22 = vmul.f32 %v2265_v1, %v2484_v25  ;;  %2286 = vrcp.f32 %v640_v13  ;;  %2001 = vmatprep.subr.bf16.mxu0 %v2643_v24  ;;  %v2711_v1 = vld [vmem:[%s3191_s5 + $0x8] sm:$0xff]   ;;  %vm737_vm7 = vcmp.lt.s32.totalorder %v2618_v14, 16 }
  0x3b   : > { %v2269_v31 = vpop.eup %2268  ;;  %v777_v32 = vsel %vm2613_vm8, %v695_v18, 0.0  ;;  %v819_v34 = vrot.slane %v776_v21, 7  ;;  %v693_v35 = vmul.f32 %v2267_v2, %v2487_v26  ;;  %2288 = vpow2.f32 %v1849_v15  ;;  %2002 = vmatpush3.bf16.msra.mxu0 %v2643_v24  ;;  %vm2837_vm8 = vmand %vm728_vm1, %vm738_vm2 }
  0x3c   : > { %v2271_v37 = vpop.eup %2270  ;;  %v820_v38 = vrot.slane %v777_v32, 7  ;;  %v774_v25 = vsel %vm2629_vm10, %v692_v22, 0.0  ;;  %v2658_v39 = vmul.f32 %v2269_v31, %v2497_v28  ;;  %2290 = vpow2.f32 %v1850_v17  ;;  %v2227_v17 = vld [vmem:[%s3191_s5 + $0x20] sm:$0xff]   ;;  %2003 = vmatprep.subr.bf16.mxu0 %v2711_v1  ;;  %vm2878_vm9 = vmand %vm727_vm6, %vm737_vm7 }
  0x3d   : > { %v2661_v40 = vpop.eup %2272  ;;  %v2664_v26 = vsel %vm812_vm3, 0.0, %v819_v34  ;;  %v775_v41 = vsel %vm2629_vm10, %v693_v35, 0.0  ;;  %v816_v42 = vrot.slane %v774_v25, 7  ;;  %v2669_v43 = vmul.f32 %v2271_v37, %v2500_v29  ;;  %1981 = vmatprep.subr.bf16.mxu1 %v2227_v17 }
  0x3e   : > { %v2671_v44 = vpop.eup %2274  ;;  %v2674_v28 = vsel %vm812_vm3, %v819_v34, %v820_v38  ;;  %v885_v45 = vsel %vm812_vm3, %v820_v38, 0.0  ;;  %v924_v47 = vrot.slane %v2664_v26, 1  ;;  %v817_v48 = vrot.slane %v775_v41, 7  ;;  %1982 = vmatpush3.bf16.msra.mxu1 %v2227_v17 }
  0x3f   : > { %v2678_v51 = vpop.eup %2276  ;;  %v925_v52 = vrot.slane %v2674_v28, 1  ;;  %v927_v55 = vrot.slane %v885_v45, 1  ;;  %v1038_v59 = vrot.slane %v885_v45, 2  ;;  %v2682_v60 = vsel %vm812_vm3, 0.0, %v816_v42  ;;  %2004 = vmatpush3.bf16.msra.mxu0 %v2711_v1 }
  0x40   : > { %v2686_v29 = vpop.eup %2278  ;;  %v2689_v62 = vsel %vm812_vm3, %v816_v42, %v817_v48  ;;  %v884_v63 = vsel %vm812_vm3, %v817_v48, 0.0  ;;  %v919_v0 = vrot.slane %v2682_v60, 1  ;;  %v1035_v7 = vrot.slane %v2664_v26, 2 }
  0x41   : > { %v2281_v10 = vpop.eup %2280  ;;  %v926_v12 = vsel %vm913_vm4, %v924_v47, %v925_v52  ;;  %v928_v13 = vsel %vm913_vm4, %v925_v52, %v927_v55  ;;  %v920_v15 = vrot.slane %v2689_v62, 1  ;;  %v922_v16 = vrot.slane %v884_v63, 1 }
  0x42   : > { %v2283_v18 = vpop.eup %2282  ;;  %v2130_v19 = vpack.i.bf16 %v928_v13, %v926_v12  ;;  %v1033_v20 = vrot.slane %v884_v63, 2  ;;  %v690_v2 = vmul.f32 %v2281_v10, %v2545_v57  ;;  %v1036_v21 = vrot.slane %v2674_v28, 2 }
  0x43   : > { %v2715_v22 = vpop.eup %2284  ;;  %v921_v31 = vsel %vm913_vm4, %v919_v0, %v920_v15  ;;  %v923_v32 = vsel %vm913_vm4, %v920_v15, %v922_v16  ;;  %v691_v34 = vmul.f32 %v2283_v18, %v2548_v58  ;;  %v1030_v35 = vrot.slane %v2682_v60, 2 }
  0x44   : > { %v2730_v57 = vpop.eup %2286  ;;  %2131 = vrot.lane.b32.xlu1 %v2130_v19, %s2354_s13  ;;  %v2125_v38 = vpack.i.bf16 %v923_v32, %v921_v31  ;;  %v772_v58 = vsel %vm2701_vm15, %v690_v2, 0.0  ;;  %v2736_v25 = vsel %vm1024_vm12, %v1035_v7, %v1036_v21  ;;  %v2739_v5 = vsel %vm1024_vm12, %v1036_v21, %v1038_v59 }
  0x45   : > { %v2741_v41 = vpop.eup %2288  ;;  %v773_v42 = vsel %vm2701_vm15, %v691_v34, 0.0  ;;  %v813_v45 = vrot.slane %v772_v58, 7  ;;  %v2150_v47 = vpack.i.bf16 %v2739_v5, %v2736_v25  ;;  %v1031_v48 = vrot.slane %v2689_v62, 2 }
  0x46   : > { %v2751_v52 = vpop.eup %2290  ;;  %2126 = vrot.lane.b32.xlu0 %v2125_v38, %s2354_s13  ;;  %v814_v55 = vrot.slane %v773_v42, 7  ;;  %v780_v59 = vsel %vm2725_vm0, %v2658_v39, 0.0  ;;  %v781_v63 = vsel %vm2725_vm0, %v2669_v43, 0.0  ;;  %v696_v0 = vmul.f32 %v2661_v40, %v2503_v30  ;;  %v2229_v30 = vld [vmem:[%s3191_s5 + $0x28] sm:$0xff]   ;;  %v2779_v40 = vld [vmem:[%s3191_s5 + $0x10] sm:$0xff]  }
  0x47   : > { %v2763_v7 = vsel %vm812_vm3, 0.0, %v813_v45  ;;  %v1032_v10 = vsel %vm1024_vm12, %v1030_v35, %v1031_v48  ;;  %v1034_v12 = vsel %vm1024_vm12, %v1031_v48, %v1033_v20  ;;  %v825_v13 = vrot.slane %v780_v59, 7  ;;  %1983 = vmatprep.subr.bf16.mxu1 %v2229_v30  ;;  %2005 = vmatprep.subr.bf16.mxu0 %v2779_v40  ;;  %v2812_v42 = vld [vmem:[%s3191_s5 + $0x30] sm:$0xff]  }
  0x48   : > { %v2768_v15 = vsel %vm812_vm3, %v813_v45, %v814_v55  ;;  %v883_v39 = vsel %vm812_vm3, %v814_v55, 0.0  ;;  %v1025_v16 = vrot.slane %v2763_v7, 2  ;;  %v914_v43 = vrot.slane %v2763_v7, 1  ;;  %1984 = vmatpush3.bf16.msra.mxu1 %v2229_v30  ;;  %2006 = vmatpush3.bf16.msra.mxu0 %v2779_v40 }
  0x49   : > { %v1026_v9 = vrot.slane %v2768_v15, 2  ;;  %v1028_v17 = vrot.slane %v883_v39, 2  ;;  %v915_v18 = vrot.slane %v2768_v15, 1  ;;  %v917_v19 = vrot.slane %v883_v39, 1  ;;  %2045 = vmatprep.subr.bf16.mxu1 %v2643_v24  ;;  %2023 = vmatprep.subr.bf16.mxu0 %v2812_v42 }
  0x4a   : > { %v2140_v20 = vpack.i.bf16 %v1034_v12, %v1032_v10  ;;  %v826_v2 = vrot.slane %v781_v63, 7  ;;  %v2784_v21 = vsel %vm812_vm3, 0.0, %v825_v13  ;;  %v697_v31 = vmul.f32 %v2671_v44, %v2511_v36 }
  0x4b   : > { %v1027_v34 = vsel %vm1024_vm12, %v1025_v16, %v1026_v9  ;;  %v1029_v35 = vsel %vm1024_vm12, %v1026_v9, %v1028_v17  ;;  %v916_v37 = vsel %vm913_vm4, %v914_v43, %v915_v18  ;;  %v918_v38 = vsel %vm913_vm4, %v915_v18, %v917_v19 }
  0x4c   : > { %v2145_v36 = vpack.i.bf16 %v1029_v35, %v1027_v34  ;;  %v2135_v44 = vpack.i.bf16 %v918_v38, %v916_v37  ;;  %v2802_v6 = vsel %vm812_vm3, %v825_v13, %v826_v2  ;;  %v887_v58 = vsel %vm812_vm3, %v826_v2, 0.0 }
  0x4d   : > { %v934_v45 = vrot.slane %v2784_v21, 1  ;;  %v935_v48 = vrot.slane %v2802_v6, 1  ;;  %v937_v55 = vrot.slane %v887_v58, 1  ;;  %v778_v59 = vsel %vm2792_vm5, %v696_v0, 0.0 }
  0x4e   : > { %2146 = vrot.lane.b32.xlu1 %v2145_v36, %s2355_s16  ;;  %2136 = vrot.lane.b32.xlu0 %v2135_v44, %s2354_s13  ;;  %v779_v63 = vsel %vm2792_vm5, %v697_v31, 0.0  ;;  %v822_v10 = vrot.slane %v778_v59, 7  ;;  %v1045_v12 = vrot.slane %v2784_v21, 2  ;;  %v1046_v13 = vrot.slane %v2802_v6, 2 }
  0x4f   : > { %v936_v39 = vsel %vm913_vm4, %v934_v45, %v935_v48  ;;  %v938_v16 = vsel %vm913_vm4, %v935_v48, %v937_v55  ;;  %v823_v43 = vrot.slane %v779_v63, 7  ;;  %v1048_v30 = vrot.slane %v887_v58, 2 }
  0x50   : > { %v2160_v0 = vpack.i.bf16 %v938_v16, %v936_v39  ;;  %v2828_v9 = vsel %vm812_vm3, 0.0, %v822_v10  ;;  %v1047_v17 = vsel %vm1024_vm12, %v1045_v12, %v1046_v13  ;;  %v702_v18 = vmul.f32 %v2678_v51, %v2528_v49 }
  0x51   : > { %v2842_v2 = vsel %vm812_vm3, %v822_v10, %v823_v43  ;;  %v886_v31 = vsel %vm812_vm3, %v823_v43, 0.0  ;;  %v929_v32 = vrot.slane %v2828_v9, 1  ;;  %v1049_v34 = vsel %vm1024_vm12, %v1046_v13, %v1048_v30 }
  0x52   : > { %2151 = vrot.lane.b32.xlu1 %v2150_v47, %s2355_s16  ;;  %2141 = vrot.lane.b32.xlu0 %v2140_v20, %s2355_s16  ;;  %v930_v49 = vrot.slane %v2842_v2, 1  ;;  %v932_v11 = vrot.slane %v886_v31, 1  ;;  %v2170_v51 = vpack.i.bf16 %v1049_v34, %v1047_v17  ;;  %v1040_v35 = vrot.slane %v2828_v9, 2 }
  0x53   : > { %v1041_v37 = vrot.slane %v2842_v2, 2  ;;  %v1043_v38 = vrot.slane %v886_v31, 2  ;;  %v703_v36 = vmul.f32 %v2686_v29, %v2531_v50  ;;  %v784_v44 = vsel %vm2837_vm8, %v702_v18, 0.0 }
  0x54   : > { %v931_v25 = vsel %vm913_vm4, %v929_v32, %v930_v49  ;;  %v933_v5 = vsel %vm913_vm4, %v930_v49, %v932_v11  ;;  %v831_v47 = vrot.slane %v784_v44, 7  ;;  %v641_v20 = vadd.f32 1.0, %v2715_v22 }
  0x55   : > { %v2155_v58 = vpack.i.bf16 %v933_v5, %v931_v25  ;;  %v1042_v45 = vsel %vm1024_vm12, %v1040_v35, %v1041_v37  ;;  %v1044_v48 = vsel %vm1024_vm12, %v1041_v37, %v1043_v38  ;;  %v785_v55 = vsel %vm2837_vm8, %v703_v36, 0.0 }
  0x56   : > { %2161 = vrot.lane.b32.xlu1 %v2160_v0, %s2354_s13  ;;  %v2165_v50 = vpack.i.bf16 %v1044_v48, %v1042_v45  ;;  %v832_v29 = vrot.slane %v785_v55, 7  ;;  %v2868_v59 = vsel %vm812_vm3, 0.0, %v831_v47  ;;  %2292 = vrcp.f32 %v641_v20 }
  0x57   : > { %2156 = vrot.lane.b32.xlu0 %v2155_v58, %s2354_s13  ;;  %v944_v22 = vrot.slane %v2868_v59, 1  ;;  %v700_v63 = vmul.f32 %v2730_v57, %v2536_v53  ;;  %v1055_v12 = vrot.slane %v2868_v59, 2  ;;  %v646_v13 = vadd.f32 1.0, %v2741_v41 }
  0x58   : > { %v2885_v39 = vsel %vm812_vm3, %v831_v47, %v832_v29  ;;  %v889_v16 = vsel %vm812_vm3, %v832_v29, 0.0  ;;  %v647_v43 = vadd.f32 1.0, %v2751_v52  ;;  %2294 = vpow2.f32 %v2635_v23 }
  0x59   : > { %v945_v53 = vrot.slane %v2885_v39, 1  ;;  %v947_v14 = vrot.slane %v889_v16, 1  ;;  %v1056_v57 = vrot.slane %v2885_v39, 2  ;;  %v1851_v30 = vmul.f32 -1.442695, %v2591_v54 }
  0x5a   : > { %2171 = vrot.lane.b32.xlu1 %v2170_v51, %s2355_s16  ;;  %v782_v41 = vsel %vm2878_vm9, %v700_v63, 0.0  ;;  %v1058_v0 = vrot.slane %v889_v16, 2  ;;  %2296 = vrcp.f32 %v646_v13  ;;  %v1852_v17 = vmul.f32 -1.442695, %v2601_v4 }
  0x5b   : > { %2166 = vrot.lane.b32.xlu0 %v2165_v50, %s2355_s16  ;;  %v946_v23 = vsel %vm913_vm4, %v944_v22, %v945_v53  ;;  %v948_v52 = vsel %vm913_vm4, %v945_v53, %v947_v14  ;;  %v1057_v18 = vsel %vm1024_vm12, %v1055_v12, %v1056_v57  ;;  %2298 = vrcp.f32 %v647_v43 }
  0x5c   : > { %v2180_v19 = vpack.i.bf16 %v948_v52, %v946_v23  ;;  %v1059_v31 = vsel %vm1024_vm12, %v1056_v57, %v1058_v0  ;;  %2300 = vpow2.f32 %v2649_v27  ;;  %v828_v32 = vrot.slane %v782_v41, 7 }
  0x5d   : > { %2302 = vpow2.f32 %v1851_v30  ;;  %v2190_v34 = vpack.i.bf16 %v1059_v31, %v1057_v18  ;;  %v720_v49 = vadd.s32 8, %v2542_v56  ;;  %v719_v50 = vadd.s32 7, %v2542_v56 }
  0x5e   : > { %2181 = vrot.lane.b32.xlu1 %v2180_v19, %s2354_s13  ;;  %2304 = vpow2.f32 %v1852_v17  ;;  %v2907_v37 = vsel %vm812_vm3, 0.0, %v828_v32  ;;  %vm1156_vm6 = vcmask 261120  }
  0x5f   : > { %vm730_vm10 = vcmp.ge.s32.totalorder %v720_v49, 0  ;;  %vm740_vm11 = vcmp.lt.s32.totalorder %v720_v49, 16  ;;  %v939_v5 = vrot.slane %v2907_v37, 1  ;;  %v1050_v47 = vrot.slane %v2907_v37, 2 }
  0x60   : > { %v2293_v11 = vpop.eup %2292  ;;  %vm2915_vm13 = vmand %vm730_vm10, %vm740_vm11  ;;  %vm729_vm14 = vcmp.ge.s32.totalorder %v719_v50, 0  ;;  %vm739_vm15 = vcmp.lt.s32.totalorder %v719_v50, 16 }
  0x61   : > { %v701_v51 = vmul.f32 %v2293_v11, %v2580_v33  ;;  %vm2951_vm0 = vmand %vm729_vm14, %vm739_vm15 }
  0x62   : > { %v2295_v35 = vpop.eup %2294  ;;  %2191 = vrot.lane.b32.xlu1 %v2190_v34, %s2355_s16 }
  0x63   : > { %v783_v27 = vsel %vm2878_vm9, %v701_v51, 0.0  ;;  %v644_v38 = vadd.f32 1.0, %v2295_v35 }
  0x64   : > { %v2297_v36 = vpop.eup %2296  ;;  %v829_v44 = vrot.slane %v783_v27, 7 }
  0x65   : > { %v2299_v25 = vpop.eup %2298  ;;  %v706_v33 = vmul.f32 %v2297_v36, %v2586_v46  ;;  %2306 = vrcp.f32 %v644_v38 }
  0x66   : > { %v2301_v58 = vpop.eup %2300  ;;  %v2920_v45 = vsel %vm812_vm3, %v828_v32, %v829_v44  ;;  %v888_v48 = vsel %vm812_vm3, %v829_v44, 0.0  ;;  %v707_v55 = vmul.f32 %v2299_v25, %v2595_v61  ;;  %v721_v25 = vadd.s32 9, %v2542_v56 }
  0x67   : > { %v2303_v29 = vpop.eup %2302  ;;  %v940_v22 = vrot.slane %v2920_v45, 1  ;;  %v942_v63 = vrot.slane %v888_v48, 1  ;;  %v1051_v46 = vrot.slane %v2920_v45, 2  ;;  %v1053_v10 = vrot.slane %v888_v48, 2 }
  0x68   : > { %v2305_v12 = vpop.eup %2304  ;;  %v788_v13 = vsel %vm2915_vm13, %v706_v33, 0.0  ;;  %v789_v16 = vsel %vm2915_vm13, %v707_v55, 0.0  ;;  %v645_v43 = vadd.f32 1.0, %v2301_v58  ;;  %v648_v53 = vadd.f32 1.0, %v2303_v29 }
  0x69   : > { %v941_v61 = vsel %vm913_vm4, %v939_v5, %v940_v22  ;;  %v943_v14 = vsel %vm913_vm4, %v940_v22, %v942_v63  ;;  %v1052_v57 = vsel %vm1024_vm12, %v1050_v47, %v1051_v46  ;;  %v1054_v30 = vsel %vm1024_vm12, %v1051_v46, %v1053_v10 }
  0x6a   : > { %v2175_v41 = vpack.i.bf16 %v943_v14, %v941_v61  ;;  %v837_v0 = vrot.slane %v788_v13, 7  ;;  %v838_v17 = vrot.slane %v789_v16, 7  ;;  %v2185_v23 = vpack.i.bf16 %v1054_v30, %v1052_v57 }
  0x6b   : > { %2308 = vrcp.f32 %v645_v43  ;;  %v649_v52 = vadd.f32 1.0, %v2305_v12  ;;  %vm731_vm1 = vcmp.ge.s32.totalorder %v721_v25, 0  ;;  %vm741_vm2 = vcmp.lt.s32.totalorder %v721_v25, 16 }
  0x6c   : > { %2176 = vrot.lane.b32.xlu0 %v2175_v41, %s2354_s13  ;;  %v2937_v18 = vsel %vm812_vm3, %v837_v0, %v838_v17  ;;  %v2940_v19 = vsel %vm812_vm3, 0.0, %v837_v0  ;;  %v891_v31 = vsel %vm812_vm3, %v838_v17, 0.0  ;;  %2310 = vrcp.f32 %v648_v53  ;;  %vm2965_vm5 = vmand %vm731_vm1, %vm741_vm2 }
  0x6d   : > { %v954_v32 = vrot.slane %v2940_v19, 1  ;;  %v955_v34 = vrot.slane %v2937_v18, 1  ;;  %v957_v49 = vrot.slane %v891_v31, 1  ;;  %v1065_v11 = vrot.slane %v2940_v19, 2 }
  0x6e   : > { %v1066_v51 = vrot.slane %v2937_v18, 2  ;;  %v1068_v35 = vrot.slane %v891_v31, 2  ;;  %2312 = vrcp.f32 %v649_v52 }
  0x6f   : > { %v2307_v27 = vpop.eup %2306  ;;  %v956_v38 = vsel %vm913_vm4, %v954_v32, %v955_v34  ;;  %v958_v36 = vsel %vm913_vm4, %v955_v34, %v957_v49 }
  0x70   : > { %2186 = vrot.lane.b32.xlu0 %v2185_v23, %s2355_s16  ;;  %v2200_v5 = vpack.i.bf16 %v958_v36, %v956_v38  ;;  %v704_v47 = vmul.f32 %v2307_v27, %v2598_v3  ;;  %v1067_v33 = vsel %vm1024_vm12, %v1065_v11, %v1066_v51  ;;  %v1069_v20 = vsel %vm1024_vm12, %v1066_v51, %v1068_v35 }
  0x71   : > { %v2210_v48 = vpack.i.bf16 %v1069_v20, %v1067_v33 }
  0x72   : > { %2201 = vrot.lane.b32.xlu1 %v2200_v5, %s2354_s13  ;;  %v786_v58 = vsel %vm2951_vm0, %v704_v47, 0.0 }
  0x73   : > { %v834_v55 = vrot.slane %v786_v58, 7 }
  0x75   : > { %v2309_v50 = vpop.eup %2308  ;;  %v2970_v22 = vsel %vm812_vm3, 0.0, %v834_v55 }
  0x76   : > { %v2311_v56 = vpop.eup %2310  ;;  %v705_v29 = vmul.f32 %v2309_v50, %v2607_v8  ;;  %2211 = vrot.lane.b32.xlu1 %v2210_v48, %s2355_s16  ;;  %v949_v16 = vrot.slane %v2970_v22, 1  ;;  %v1060_v43 = vrot.slane %v2970_v22, 2 }
  0x77   : > { %v708_v63 = vmul.f32 %v2311_v56, %v2591_v54 }
  0x78   : > { %v2313_v46 = vpop.eup %2312  ;;  %v787_v10 = vsel %vm2951_vm0, %v705_v29, 0.0 }
  0x79   : > { %v835_v12 = vrot.slane %v787_v10, 7  ;;  %v709_v13 = vmul.f32 %v2313_v46, %v2601_v4  ;;  %v790_v8 = vsel %vm2965_vm5, %v708_v63, 0.0 }
  0x7a   : > { %v840_v53 = vrot.slane %v790_v8, 7 }
  0x7b   : > { %v2981_v61 = vsel %vm812_vm3, %v834_v55, %v835_v12  ;;  %v890_v54 = vsel %vm812_vm3, %v835_v12, 0.0  ;;  %v791_v14 = vsel %vm2965_vm5, %v709_v13, 0.0 }
  0x7c   : > { %v950_v57 = vrot.slane %v2981_v61, 1  ;;  %v952_v30 = vrot.slane %v890_v54, 1  ;;  %v1061_v4 = vrot.slane %v2981_v61, 2  ;;  %v1063_v41 = vrot.slane %v890_v54, 2 }
  0x7d   : > { %v841_v0 = vrot.slane %v791_v14, 7  ;;  %v2989_v17 = vsel %vm812_vm3, 0.0, %v840_v53 }
  0x7e   : > { %v951_v23 = vsel %vm913_vm4, %v949_v16, %v950_v57  ;;  %v953_v52 = vsel %vm913_vm4, %v950_v57, %v952_v30  ;;  %v1062_v31 = vsel %vm1024_vm12, %v1060_v43, %v1061_v4  ;;  %v1064_v32 = vsel %vm1024_vm12, %v1061_v4, %v1063_v41 }
  0x7f   : > { %v2195_v34 = vpack.i.bf16 %v953_v52, %v951_v23  ;;  %v2996_v49 = vsel %vm812_vm3, %v840_v53, %v841_v0  ;;  %v892_v11 = vsel %vm812_vm3, %v841_v0, 0.0  ;;  %v959_v51 = vrot.slane %v2989_v17, 1 }
  0x80   : > { %v960_v35 = vrot.slane %v2996_v49, 1  ;;  %v962_v27 = vrot.slane %v892_v11, 1  ;;  %v1070_v38 = vrot.slane %v2989_v17, 2  ;;  %v2205_v36 = vpack.i.bf16 %v1064_v32, %v1062_v31 }
  0x81   : > { %2196 = vrot.lane.b32.xlu0 %v2195_v34, %s2354_s13  ;;  %v1071_v44 = vrot.slane %v2996_v49, 2  ;;  %v1073_v25 = vrot.slane %v892_v11, 2  ;;  %vm1135_vm3 = vcmask 130048  }
  0x82   : > { %v961_v5 = vsel %vm913_vm4, %v959_v51, %v960_v35  ;;  %v963_v47 = vsel %vm913_vm4, %v960_v35, %v962_v27  ;;  %vm1223_vm4 = vcmask 392192  }
  0x83   : > { %v1072_v33 = vsel %vm1024_vm12, %v1070_v38, %v1071_v44  ;;  %v1074_v20 = vsel %vm1024_vm12, %v1071_v44, %v1073_v25  ;;  %v2215_v48 = vpack.i.bf16 %v963_v47, %v961_v5 }
  0x84   : > { %v2220_v58 = vpack.i.bf16 %v1074_v20, %v1072_v33 }
  0x85   : > { %2206 = vrot.lane.b32.xlu0 %v2205_v36, %s2355_s16 }
  0x86   : > { %2221 = vrot.lane.b32.xlu1 %v2220_v58, %s2355_s16  ;;  %v2233_v58 = vld [vmem:[%s3191_s5 + $0x40] sm:$0xff]  }
  0x89   : > { %2216 = vrot.lane.b32.xlu0 %v2215_v48, %s2354_s13  ;;  %s3121_s13 = scalar_lea.vmem %s3193_s7, %s1830_s9 }
  0xb6   : > { %v2132_v55 = vpop.permute.xlu1 %2131 }
  0xb7   : > { %v2134_v56 = vunpack.i.h.bf16 %v2132_v55  ;;  %v2133_v13 = vunpack.i.l.bf16 %v2132_v55 }
  0xb8   : > { %v2127_v50 = vpop.permute.xlu0 %2126 }
  0xb9   : > { %v2129_v8 = vunpack.i.h.bf16 %v2127_v50  ;;  %v2128_v16 = vunpack.i.l.bf16 %v2127_v50  ;;  %v1141_v54 = vsel %vm1135_vm3, %v2674_v28, %v2134_v56 }
  0xbb   : > { %v1139_v28 = vsel %vm1135_vm3, %v2689_v62, %v2129_v8 }
  0xc0   : > { %v2147_v29 = vpop.permute.xlu1 %2146  ;;  %v2137_v3 = vpop.permute.xlu0 %2136 }
  0xc1   : > { %v2149_v63 = vunpack.i.h.bf16 %v2147_v29  ;;  %v2148_v46 = vunpack.i.l.bf16 %v2147_v29  ;;  %v2139_v10 = vunpack.i.h.bf16 %v2137_v3  ;;  %v2138_v12 = vunpack.i.l.bf16 %v2137_v3 }
  0xc3   : > { %v1136_v43 = vsel %vm1135_vm3, %v2763_v7, %v2138_v12  ;;  %v1137_v53 = vsel %vm1135_vm3, %v2768_v15, %v2139_v10  ;;  %v1140_v7 = vsel %vm1135_vm3, %v2664_v26, %v2133_v13  ;;  %v1138_v15 = vsel %vm1135_vm3, %v2682_v60, %v2128_v16  ;;  %v2232_v60 = vld [vmem:[%s3191_s5 + $0x38] sm:$0xff]  }
  0xc4   : > { %v2152_v14 = vpop.permute.xlu1 %2151  ;;  %v2142_v57 = vpop.permute.xlu0 %2141  ;;  %v1157_v30 = vsel %vm1156_vm6, %v1136_v43, %v2148_v46  ;;  %v1158_v4 = vsel %vm1156_vm6, %v1137_v53, %v2149_v63 }
  0xc5   : > { %v2154_v41 = vunpack.i.h.bf16 %v2152_v14  ;;  %v2153_v0 = vunpack.i.l.bf16 %v2152_v14  ;;  %v2144_v23 = vunpack.i.h.bf16 %v2142_v57  ;;  %v2143_v52 = vunpack.i.l.bf16 %v2142_v57 }
  0xc6   : > { %v1177_v31 = vpack.c.bf16 %v1158_v4, %v1157_v30 }
  0xc7   : > { %v1161_v32 = vsel %vm1156_vm6, %v1140_v7, %v2153_v0  ;;  %v1162_v34 = vsel %vm1156_vm6, %v1141_v54, %v2154_v41  ;;  %v1159_v11 = vsel %vm1156_vm6, %v1138_v15, %v2143_v52  ;;  %v1160_v51 = vsel %vm1156_vm6, %v1139_v28, %v2144_v23 }
  0xc8   : > { %v1179_v35 = vpack.c.bf16 %v1162_v34, %v1161_v32  ;;  %2007 = vmatprep.mubr.msk.bf16.mxu0 %vm1223_vm4, %v1177_v31  ;;  %v2162_v27 = vpop.permute.xlu1 %2161  ;;  %v1178_v26 = vpack.c.bf16 %v1160_v51, %v1159_v11 }
  0xc9   : > { %v2157_v38 = vpop.permute.xlu0 %2156  ;;  %v2164_v36 = vunpack.i.h.bf16 %v2162_v27  ;;  %v2163_v62 = vunpack.i.l.bf16 %v2162_v27 }
  0xca   : > { %1985 = vmatprep.mubr.msk.bf16.mxu1 %vm1223_vm4, %v1178_v26  ;;  %2008 = vmatmul.mubr.msk.bf16.vlgmr.msra.gmra.mrb[0].mxu0 %vm1223_vm4, %v1178_v26  ;;  %v2159_v44 = vunpack.i.h.bf16 %v2157_v38  ;;  %v2158_v25 = vunpack.i.l.bf16 %v2157_v38 }
  0xcb   : > { %1986 = vmatmul.mubr.msk.bf16.vlgmr.msra.gmra.mrb[0].mxu1 %vm1223_vm4, %v1179_v35  ;;  %2011 = vmatprep.mubr.msk.bf16.mxu0 %vm1223_vm4, %v1179_v35  ;;  %v1145_v48 = vsel %vm1135_vm3, %v2802_v6, %v2164_v36  ;;  %v1144_v55 = vsel %vm1135_vm3, %v2784_v21, %v2163_v62 }
  0xcc   : > { %2048 = vmatpush3.bf16.msra.mxu1 %v2643_v24  ;;  %2024 = vmatpush3.bf16.msra.mxu0 %v2812_v42  ;;  %v2172_v5 = vpop.permute.xlu1 %2171  ;;  %v1143_v42 = vsel %vm1135_vm3, %v2842_v2, %v2159_v44  ;;  %v1142_v56 = vsel %vm1135_vm3, %v2828_v9, %v2158_v25 }
  0xcd   : > { %v2174_v47 = vunpack.i.h.bf16 %v2172_v5  ;;  %v2173_v33 = vunpack.i.l.bf16 %v2172_v5  ;;  %v2167_v20 = vpop.permute.xlu0 %2166  ;;  %2025 = vmatprep.subr.bf16.mxu0 %v2232_v60  ;;  %2046 = vmatprep.subr.bf16.mxu1 %v2711_v1 }
  0xce   : > { %v2169_v24 = vunpack.i.h.bf16 %v2167_v20  ;;  %v2168_v50 = vunpack.i.l.bf16 %v2167_v20 }
  0xcf   : > { %v1165_v29 = vsel %vm1156_vm6, %v1144_v55, %v2173_v33  ;;  %v1166_v3 = vsel %vm1156_vm6, %v1145_v48, %v2174_v47 }
  0xd0   : > { %v3053_v63 = vpack.c.bf16 %v1166_v3, %v1165_v29  ;;  %v1163_v46 = vsel %vm1156_vm6, %v1142_v56, %v2168_v50  ;;  %v1164_v6 = vsel %vm1156_vm6, %v1143_v42, %v2169_v24  ;;  %2026 = vmatpush3.bf16.msra.mxu0 %v2232_v60  ;;  %2049 = vmatpush3.bf16.msra.mxu1 %v2711_v1  ;;  %v2182_v9 = vpop.permute.xlu1 %2181 }
  0xd1   : > { %v1180_v21 = vpack.c.bf16 %v1164_v6, %v1163_v46  ;;  %2027 = vmatprep.subr.bf16.mxu0 %v2233_v58  ;;  %2047 = vmatprep.subr.bf16.mxu1 %v2779_v40  ;;  %v2184_v1 = vunpack.i.h.bf16 %v2182_v9  ;;  %v2183_v10 = vunpack.i.l.bf16 %v2182_v9  ;;  %v3116_v9 = vld [vmem:[%s3192_s6] ss:$0 sm:$0xff] }
  0xd3   : > { %1989 = vmatprep.mubr.msk.bf16.mxu1 %vm1223_vm4, %v1180_v21  ;;  %2012 = vmatmul.mubr.msk.bf16.gmra.mrb[4].mxu0 %vm1223_vm4, %v1180_v21  ;;  %v1149_v53 = vsel %vm1135_vm3, %v2885_v39, %v2184_v1  ;;  %v1148_v54 = vsel %vm1135_vm3, %v2868_v59, %v2183_v10 }
  0xd4   : > { %1990 = vmatmul.mubr.msk.bf16.gmra.mrb[4].mxu1 %vm1223_vm4, %v3053_v63  ;;  %2029 = vmatprep.mubr.msk.bf16.mxu0 %vm1223_vm4, %v1179_v35  ;;  %v2192_v2 = vpop.permute.xlu1 %2191 }
  0xd5   : > { %2028 = vmatpush3.bf16.msra.mxu0 %v2233_v58  ;;  %2050 = vmatpush3.bf16.msra.mxu1 %v2779_v40  ;;  %v2194_v13 = vunpack.i.h.bf16 %v2192_v2  ;;  %v2193_v8 = vunpack.i.l.bf16 %v2192_v2 }
  0xd7   : > { %v1169_v40 = vsel %vm1156_vm6, %v1148_v54, %v2193_v8  ;;  %v1170_v14 = vsel %vm1156_vm6, %v1149_v53, %v2194_v13 }
  0xd8   : > { %v1183_v23 = vpack.c.bf16 %v1170_v14, %v1169_v40 }
  0xdb   : > { %2030 = vmatmul.mubr.msk.bf16.vlgmr.msra.gmra.mrb[0].mxu0 %vm1223_vm4, %v1180_v21 }
  0xdc   : > { %2033 = vmatprep.mubr.msk.bf16.mxu0 %vm1223_vm4, %v3053_v63 }
  0xde   : > { %v2177_v12 = vpop.permute.xlu0 %2176 }
  0xdf   : > { %v2179_v16 = vunpack.i.h.bf16 %v2177_v12  ;;  %v2178_v43 = vunpack.i.l.bf16 %v2177_v12 }
  0xe1   : > { %v1147_v41 = vsel %vm1135_vm3, %v2920_v45, %v2179_v16  ;;  %v1146_v0 = vsel %vm1135_vm3, %v2907_v37, %v2178_v43 }
  0xe2   : > { %v2187_v57 = vpop.permute.xlu0 %2186 }
  0xe3   : > { %v2189_v30 = vunpack.i.h.bf16 %v2187_v57  ;;  %v2188_v4 = vunpack.i.l.bf16 %v2187_v57 }
  0xe4   : > { %v2202_v59 = vpop.permute.xlu1 %2201 }
  0xe5   : > { %v1167_v52 = vsel %vm1156_vm6, %v1146_v0, %v2188_v4  ;;  %v1168_v39 = vsel %vm1156_vm6, %v1147_v41, %v2189_v30  ;;  %v2204_v45 = vunpack.i.h.bf16 %v2202_v59  ;;  %v2203_v15 = vunpack.i.l.bf16 %v2202_v59 }
  0xe6   : > { %v1182_v7 = vpack.c.bf16 %v1168_v39, %v1167_v52 }
  0xe7   : > { %v1153_v51 = vsel %vm1135_vm3, %v2937_v18, %v2204_v45  ;;  %v1152_v35 = vsel %vm1135_vm3, %v2940_v19, %v2203_v15 }
  0xe8   : > { %1993 = vmatprep.mubr.msk.bf16.mxu1 %vm1223_vm4, %v1182_v7  ;;  %2034 = vmatmul.mubr.msk.bf16.gmra.mrb[4].mxu0 %vm1223_vm4, %v1182_v7  ;;  %v2212_v31 = vpop.permute.xlu1 %2211 }
  0xe9   : > { %1994 = vmatmul.mubr.msk.bf16.gmra.mrb[8].mxu1 %vm1223_vm4, %v1183_v23  ;;  %2037 = vmatprep.mubr.msk.bf16.mxu0 %vm1223_vm4, %v1183_v23  ;;  %v2214_v37 = vunpack.i.h.bf16 %v2212_v31  ;;  %v2213_v32 = vunpack.i.l.bf16 %v2212_v31 }
  0xeb   : > { %v1173_v27 = vsel %vm1156_vm6, %v1152_v35, %v2213_v32  ;;  %v1174_v26 = vsel %vm1156_vm6, %v1153_v51, %v2214_v37 }
  0xec   : > { %v1185_v5 = vpack.c.bf16 %v1174_v26, %v1173_v27 }
  0xf3   : > { %v2197_v28 = vpop.permute.xlu0 %2196 }
  0xf4   : > { %v2199_v34 = vunpack.i.h.bf16 %v2197_v28  ;;  %v2198_v11 = vunpack.i.l.bf16 %v2197_v28 }
  0xf6   : > { %v1151_v44 = vsel %vm1135_vm3, %v2981_v61, %v2199_v34  ;;  %v1150_v25 = vsel %vm1135_vm3, %v2970_v22, %v2198_v11 }
  0xf7   : > { %v2207_v38 = vpop.permute.xlu0 %2206 }
  0xf8   : > { %v2209_v60 = vunpack.i.h.bf16 %v2207_v38  ;;  %v2208_v36 = vunpack.i.l.bf16 %v2207_v38  ;;  %v2222_v62 = vpop.permute.xlu1 %2221 }
  0xf9   : > { %v2224_v20 = vunpack.i.h.bf16 %v2222_v62  ;;  %v2223_v58 = vunpack.i.l.bf16 %v2222_v62 }
  0xfa   : > { %v1171_v18 = vsel %vm1156_vm6, %v1150_v25, %v2208_v36  ;;  %v1172_v47 = vsel %vm1156_vm6, %v1151_v44, %v2209_v60 }
  0xfb   : > { %v1184_v19 = vpack.c.bf16 %v1172_v47, %v1171_v18  ;;  %v2217_v33 = vpop.permute.xlu0 %2216 }
  0xfc   : > { %v2219_v48 = vunpack.i.h.bf16 %v2217_v33  ;;  %v2218_v55 = vunpack.i.l.bf16 %v2217_v33 }
  0xfd   : > { %1997 = vmatprep.mubr.msk.bf16.mxu1 %vm1223_vm4, %v1184_v19  ;;  %2038 = vmatmul.mubr.msk.bf16.gmra.mrb[8].mxu0 %vm1223_vm4, %v1184_v19 }
  0xfe   : > { %1998 = vmatmul.mubr.msk.bf16.gmra.mrb[12].mxu1 %vm1223_vm4, %v1185_v5  ;;  %v1155_v22 = vsel %vm1135_vm3, %v2996_v49, %v2219_v48  ;;  %v1154_v61 = vsel %vm1135_vm3, %v2989_v17, %v2218_v55  ;;  %2041 = vmatprep.mubr.msk.bf16.mxu0 %vm1223_vm4, %v1185_v5 }
  0xff   : > { %2015 = vmatprep.mubr.msk.bf16.mxu1 %vm1223_vm4, %v3053_v63  ;;  %v1175_v24 = vsel %vm1156_vm6, %v1154_v61, %v2223_v58  ;;  %v1176_v50 = vsel %vm1156_vm6, %v1155_v22, %v2224_v20 }
 0x100   : > { %v1186_v42 = vpack.c.bf16 %v1176_v50, %v1175_v24 }
 0x105   : > { %2042 = vmatmul.mubr.msk.bf16.gmra.mrb[12].mxu0 %vm1223_vm4, %v1186_v42 }
 0x106   : > { %2016 = vmatmul.mubr.msk.bf16.vlgmr.msra.gmra.mrb[8].mxu1 %vm1223_vm4, %v1182_v7 }
 0x107   : > { %2019 = vmatprep.mubr.msk.bf16.mxu1 %vm1223_vm4, %v1183_v23 }
 0x10e   : > { %2020 = vmatmul.mubr.msk.bf16.gmra.mrb[12].mxu1 %vm1223_vm4, %v1184_v19 }
 0x19e   : > { %v1987_v17 = vpop.f32.mrb[0].mxu1 }
 0x19f   : > { %v1282_v49 = vpop.f32.mrb[1].mxu1 }
 0x1a0   : > { %v1988_v56 = vpop.f32.mrb[2].mxu1 }
 0x1a1   : > { %v1285_v29 = vpop.f32.mrb[3].mxu1 }
 0x1a7   : > { %v1991_v3 = vpop.f32.mrb[4].mxu1 }
 0x1a8   : > { %v1298_v63 = vpop.f32.mrb[5].mxu1 }
 0x1a9   : > { %v1992_v46 = vpop.f32.mrb[6].mxu1 }
 0x1aa   : > { %v1301_v6 = vpop.f32.mrb[7].mxu1 }
 0x1ae   : > { %v2031_v21 = vpop.f32.mrb[0].mxu0 }
 0x1af   : > { %v2051_v2 = vadd.f32 %v2031_v21, %v1987_v17  ;;  %v1518_v1 = vpop.f32.mrb[1].mxu0 }
 0x1b0   : > { %v2052_v10 = vadd.f32 %v1518_v1, %v1282_v49  ;;  %v2032_v12 = vpop.f32.mrb[2].mxu0 }
 0x1b1   : > { %v1606_v13 = vadd.f32 %v2051_v2, %v3116_v9  ;;  %v2053_v8 = vadd.f32 %v2032_v12, %v1988_v56  ;;  %v1521_v16 = vpop.f32.mrb[3].mxu0 }
 0x1b2   : > { %v1604_v43 = vadd.f32 %v2052_v10, %v3116_v9  ;;  %v2054_v53 = vadd.f32 %v1521_v16, %v1285_v29 }
 0x1b3   : > { %1622 = vst.msk [vmem:[%s3121_s13 + $0x10] sm:$0xff] %vm1135_vm3, %v1606_v13  ;;  %v1607_v54 = vadd.f32 %v2053_v8, %v3116_v9 }
 0x1b4   : > { %1620 = vst.msk [vmem:[%s3121_s13] sm:$0xff] %vm1135_vm3, %v1604_v43  ;;  %v1605_v40 = vadd.f32 %v2054_v53, %v3116_v9 }
 0x1b5   : > { %1623 = vst.msk [vmem:[%s3121_s13 + $0x18] sm:$0xff] %vm1135_vm3, %v1607_v54 }
 0x1b6   : > { %1621 = vst.msk [vmem:[%s3121_s13 + $0x8] sm:$0xff] %vm1135_vm3, %v1605_v40 }
 0x1bb   : > { %v2035_v14 = vpop.f32.mrb[4].mxu0 }
 0x1bc   : > { %v2055_v57 = vadd.f32 %v2035_v14, %v1991_v3  ;;  %v1534_v30 = vpop.f32.mrb[5].mxu0 }
 0x1bd   : > { %v2056_v4 = vadd.f32 %v1534_v30, %v1298_v63  ;;  %v2036_v41 = vpop.f32.mrb[6].mxu0 }
 0x1be   : > { %v1610_v0 = vadd.f32 %v2055_v57, %v3116_v9  ;;  %v2057_v23 = vadd.f32 %v2036_v41, %v1992_v46  ;;  %v1537_v52 = vpop.f32.mrb[7].mxu0 }
 0x1bf   : > { %v1608_v39 = vadd.f32 %v2056_v4, %v3116_v9  ;;  %v2058_v7 = vadd.f32 %v1537_v52, %v1301_v6 }
 0x1c0   : > { %1626 = vst.msk [vmem:[%s3121_s13 + $0x30] sm:$0xff] %vm1135_vm3, %v1610_v0  ;;  %v1611_v59 = vadd.f32 %v2057_v23, %v3116_v9 }
 0x1c1   : > { %1624 = vst.msk [vmem:[%s3121_s13 + $0x20] sm:$0xff] %vm1135_vm3, %v1608_v39  ;;  %v1609_v31 = vadd.f32 %v2058_v7, %v3116_v9 }
 0x1c2   : > { %1627 = vst.msk [vmem:[%s3121_s13 + $0x38] sm:$0xff] %vm1135_vm3, %v1611_v59 }
 0x1c3   : > { %1625 = vst.msk [vmem:[%s3121_s13 + $0x28] sm:$0xff] %vm1135_vm3, %v1609_v31 }
 0x1d0   : > { %v2039_v45 = vpop.f32.mrb[8].mxu0 }
 0x1d1   : > { %v1550_v15 = vpop.f32.mrb[9].mxu0 }
 0x1d2   : > { %v2040_v28 = vpop.f32.mrb[10].mxu0 }
 0x1d3   : > { %v1553_v37 = vpop.f32.mrb[11].mxu0 }
 0x1d8   : > { %v2043_v32 = vpop.f32.mrb[12].mxu0 }
 0x1d9   : > { %v2017_v34 = vpop.f32.mrb[8].mxu1  ;;  %v1566_v11 = vpop.f32.mrb[13].mxu0 }
 0x1da   : > { %v2059_v51 = vadd.f32 %v2039_v45, %v2017_v34  ;;  %v1432_v35 = vpop.f32.mrb[9].mxu1  ;;  %v2044_v27 = vpop.f32.mrb[14].mxu0 }
 0x1db   : > { %v2060_v26 = vadd.f32 %v1550_v15, %v1432_v35  ;;  %v2018_v38 = vpop.f32.mrb[10].mxu1  ;;  %v1569_v60 = vpop.f32.mrb[15].mxu0 }
 0x1dc   : > { %v1614_v36 = vadd.f32 %v2059_v51, %v3116_v9  ;;  %v2061_v62 = vadd.f32 %v2040_v28, %v2018_v38  ;;  %v1435_v44 = vpop.f32.mrb[11].mxu1 }
 0x1dd   : > { %v1612_v25 = vadd.f32 %v2060_v26, %v3116_v9  ;;  %v2062_v5 = vadd.f32 %v1553_v37, %v1435_v44 }
 0x1de   : > { %1630 = vst.msk [vmem:[%s3121_s13 + $0x50] sm:$0xff] %vm1135_vm3, %v1614_v36  ;;  %v1615_v18 = vadd.f32 %v2061_v62, %v3116_v9 }
 0x1df   : > { %1628 = vst.msk [vmem:[%s3121_s13 + $0x40] sm:$0xff] %vm1135_vm3, %v1612_v25  ;;  %v1613_v47 = vadd.f32 %v2062_v5, %v3116_v9 }
 0x1e0   : > { %1631 = vst.msk [vmem:[%s3121_s13 + $0x58] sm:$0xff] %vm1135_vm3, %v1615_v18 }
 0x1e1   : > { %1629 = vst.msk [vmem:[%s3121_s13 + $0x48] sm:$0xff] %vm1135_vm3, %v1613_v47  ;;  %v2021_v19 = vpop.f32.mrb[12].mxu1 }
 0x1e2   : > { %v2063_v33 = vadd.f32 %v2043_v32, %v2021_v19  ;;  %v1448_v20 = vpop.f32.mrb[13].mxu1 }
 0x1e3   : > { %v2064_v58 = vadd.f32 %v1566_v11, %v1448_v20  ;;  %v2022_v48 = vpop.f32.mrb[14].mxu1 }
 0x1e4   : > { %v1618_v55 = vadd.f32 %v2063_v33, %v3116_v9  ;;  %v2065_v22 = vadd.f32 %v2044_v27, %v2022_v48  ;;  %v1451_v61 = vpop.f32.mrb[15].mxu1 }
 0x1e5   : > { %v1616_v24 = vadd.f32 %v2064_v58, %v3116_v9  ;;  %v2066_v50 = vadd.f32 %v1569_v60, %v1451_v61 }
 0x1e6   : > { %1634 = vst.msk [vmem:[%s3121_s13 + $0x70] sm:$0xff] %vm1135_vm3, %v1618_v55  ;;  %v1619_v42 = vadd.f32 %v2065_v22, %v3116_v9 }
 0x1e7   : > { %1632 = vst.msk [vmem:[%s3121_s13 + $0x60] sm:$0xff] %vm1135_vm3, %v1616_v24  ;;  %v1617_v17 = vadd.f32 %v2066_v50, %v3116_v9 }
 0x1e8   : > { %1635 = vst.msk [vmem:[%s3121_s13 + $0x78] sm:$0xff] %vm1135_vm3, %v1619_v42 }
 0x1e9   : > { %1633 = vst.msk [vmem:[%s3121_s13 + $0x68] sm:$0xff] %vm1135_vm3, %v1617_v17 }
 0x1ea PF: > { %s17_s28 = sadd.s32 1, %s2352_s28   ;;  %s3215_s24 = smov %s2344_s26 }
 0x1eb   : > { %p14_p10 = scmp.ge.s32.totalorder %s17_s28, 6   ;;  %s3216_s25 = smov %s2348_s27 }
 0x1ec   : > { %s3217_s26 = smov %s3220_s29  ;;  %s3218_s27 = smov %s3224_s30 }
 0x1ed   :  { %16 = sbr.rel (!%p14_p10) target bundleno = 3 (0x3), region = 90 }

</bundles_post_ra>
